<compile_context>
chip_gen: v7x
topology: tpu7x:2x2x1
jax: 0.10.0
libtpu: 0.0.40
codegen_flags: <defaults>
</compile_context>

<pallas_src>
import functools

import jax
import jax.numpy as jnp
from jax.experimental import pallas as pl
from jax.experimental.pallas import tpu as pltpu

EPS = 1e-5
CP = 128                      # lane-padded channel width (MXU / vreg lane count)
MATMUL_DTYPE = jnp.float32    # set to jnp.bfloat16 on v6e/v7x for MXU peak throughput
                              # (accumulation + BN math stay f32 either way)


# ------------------------------ fused kernel --------------------------------

def _resblock_kernel(*refs, N, H, W, Ho, Wo, stride, has_proj):
    """Whole ResBlock in one kernel.  All intermediates live in VMEM scratch."""
    if has_proj:
        (xps_ref, w1_ref, g1_ref, b1_ref, w2_ref, g2_ref, b2_ref,
         wr_ref, gr_ref, br_ref, o_ref, acc_ref, hp_ref, res_ref) = refs
    else:
        (xps_ref, w1_ref, g1_ref, b1_ref, w2_ref, g2_ref, b2_ref,
         o_ref, acc_ref, hp_ref) = refs

    M = N * Ho * Wo

    def tap(src_ref, kh, kw, s, n_imgs):
        # LHS rows for conv tap (kh, kw) at stride s.  src_ref is either the
        # parity-decomposed padded input (stride handled by parity index p) or the
        # padded conv1 output; only unit-stride static slices are used.
        p = (kh % s) * s + (kw % s)
        bh, bw = kh // s, kw // s
        blk = src_ref[p * n_imgs:(p + 1) * n_imgs, bh:bh + Ho, bw:bw + Wo, :]
        return blk.reshape(n_imgs * Ho * Wo, CP).astype(MATMUL_DTYPE)

    def batchnorm(y, g_ref, b_ref):
        # Training-mode BN over rows (rows = N*Ho*Wo), f32 math.
        # NOTE: for real ResNet sizes with an M-tiled grid this would become per-tile
        # sum / sum-of-squares accumulators + a finalize pass; here the whole (M, 128)
        # tensor is VMEM-resident so the direct two-pass form is exact and cheap.
        mean = jnp.mean(y, axis=0, keepdims=True)
        var = jnp.mean((y - mean) ** 2, axis=0, keepdims=True)
        return g_ref[...] * (y - mean) * jax.lax.rsqrt(var + EPS) + b_ref[...]

    def accumulate_conv3x3(src_ref, w_ref, s, n_imgs):
        # 9-tap implicit GEMM: acc_ref <- sum_{kh,kw} tap @ W[kh,kw]  (f32 accumulation)
        for kh in range(3):
            for kw in range(3):
                contrib = jnp.dot(tap(src_ref, kh, kw, s, n_imgs),
                                  w_ref[kh, kw].astype(MATMUL_DTYPE),
                                  preferred_element_type=jnp.float32)
                if kh == 0 and kw == 0:
                    acc_ref[...] = contrib
                else:
                    acc_ref[...] += contrib

    # ---- residual branch: 1x1 conv (center tap of padded input) + BN ----
    if has_proj:
        r = jnp.dot(tap(xps_ref, 1, 1, stride, N),
                    wr_ref[...].astype(MATMUL_DTYPE),
                    preferred_element_type=jnp.float32)
        res_ref[...] = batchnorm(r, gr_ref, br_ref)

    # ---- conv1 (3x3, stride s, pad 1) ----
    accumulate_conv3x3(xps_ref, w1_ref, stride, N)

    # ---- BN1 + ReLU, written into a zero-padded VMEM scratch for conv2 ----
    h1 = jnp.maximum(batchnorm(acc_ref[...], g1_ref, b1_ref), 0.0)
    hp_ref[...] = jnp.zeros_like(hp_ref)
    hp_ref[:, 1:1 + Ho, 1:1 + Wo, :] = h1.reshape(N, Ho, Wo, CP)

    # ---- conv2 (3x3, stride 1, pad 1) ----
    accumulate_conv3x3(hp_ref, w2_ref, 1, N)

    # ---- BN2 + residual add + ReLU ; (M, 128) lane-dense output store ----
    h2 = batchnorm(acc_ref[...], g2_ref, b2_ref)
    if has_proj:
        identity = res_ref[...]
    else:
        # identity path implies stride == 1 and Cin == Cout: slice the original
        # (channel-padded) input straight out of the padded input already in VMEM.
        identity = xps_ref[:, 1:1 + H, 1:1 + W, :].reshape(M, CP).astype(jnp.float32)
    o_ref[...] = jnp.maximum(h2 + identity, 0.0)


# ------------------------------ host wrappers --------------------------------

def _full_spec(shape):
    nd = len(shape)
    return pl.BlockSpec(shape, lambda i, nd=nd: (0,) * nd)


def _pad_last(a, target):
    pad = target - a.shape[-1]
    if pad == 0:
        return a
    return jnp.pad(a, [(0, 0)] * (a.ndim - 1) + [(0, pad)])


def prepare_resblock_params(params):
    """One-time (hoisted) weight / BN-param preparation for the fused kernel."""
    def prep_w(w_oihw):
        o, i, kh, kw = w_oihw.shape
        w = jnp.transpose(w_oihw, (2, 3, 1, 0))                    # (kh, kw, I, O)
        w = jnp.pad(w, ((0, 0), (0, 0), (0, CP - i), (0, CP - o)))  # lane/contraction pad
        return w.astype(MATMUL_DTYPE)

    def prep_vec(v):
        return _pad_last(v.reshape(1, -1).astype(jnp.float32), CP)

    prepped = {
        "w1": prep_w(params["conv1"]),
        "g1": prep_vec(params["gamma1"]), "b1": prep_vec(params["beta1"]),
        "w2": prep_w(params["conv2"]),
        "g2": prep_vec(params["gamma2"]), "b2": prep_vec(params["beta2"]),
    }
    if "conv_r" in params:
        prepped["wr"] = prep_w(params["conv_r"])[0, 0]             # (CP, CP)
        prepped["gr"] = prep_vec(params["gamma_r"])
        prepped["br"] = prep_vec(params["beta_r"])
    return prepped


@functools.partial(jax.jit, static_argnames=("stride", "out_chan"))
def resblock_forward(prepped, x_nhwc, *, stride, out_chan):
    N, H, W, _ = x_nhwc.shape
    Ho = (H + 2 - 3) // stride + 1
    Wo = (W + 2 - 3) // stride + 1
    M = N * Ho * Wo
    has_proj = "wr" in prepped
    if not has_proj:
        assert stride == 1, "identity residual implies stride == 1"

    # Channel-pad to 128 lanes and spatially pad by 1 (conv padding).  1x traffic.
    xc = _pad_last(x_nhwc.astype(MATMUL_DTYPE), CP)
    xp = jnp.pad(xc, ((0, 0), (1, 1), (1, 1), (0, 0)))
    if stride == 1:
        xps = xp                                                   # parity grid 1x1
    else:
        # Parity split so the kernel's 9 conv taps are unit-stride slices even for
        # stride 2 (same total bytes as xp -- NOT the 9x im2col blow-up).
        xps = jnp.concatenate(
            [xp[:, i::stride, j::stride, :]
             for i in range(stride) for j in range(stride)], axis=0)

    inputs = [xps, prepped["w1"], prepped["g1"], prepped["b1"],
              prepped["w2"], prepped["g2"], prepped["b2"]]
    in_specs = [_full_spec(xps.shape),
                _full_spec(prepped["w1"].shape), _full_spec((1, CP)), _full_spec((1, CP)),
                _full_spec(prepped["w2"].shape), _full_spec((1, CP)), _full_spec((1, CP))]
    if has_proj:
        inputs += [prepped["wr"], prepped["gr"], prepped["br"]]
        in_specs += [_full_spec((CP, CP)), _full_spec((1, CP)), _full_spec((1, CP))]

    scratch = [pltpu.VMEM((M, CP), jnp.float32),                   # matmul accumulator
               pltpu.VMEM((N, Ho + 2, Wo + 2, CP), jnp.float32)]   # padded h1 for conv2
    if has_proj:
        scratch.append(pltpu.VMEM((M, CP), jnp.float32))           # residual branch

    kernel = functools.partial(_resblock_kernel, N=N, H=H, W=W, Ho=Ho, Wo=Wo,
                               stride=stride, has_proj=has_proj)

    # Single fused launch: the whole block fits comfortably in one core's VMEM on
    # v5e/v6e/v7x at these sizes.  For real ResNet activations, tile M (>=512 rows),
    # mark it "parallel" (v7x second TensorCore) and switch BN stats to carried
    # sum/sumsq accumulators; not needed here.
    out2d = pl.pallas_call(
        kernel,
        grid=(1,),
        in_specs=in_specs,
        out_specs=_full_spec((M, CP)),
        out_shape=jax.ShapeDtypeStruct((M, CP), jnp.float32),
        scratch_shapes=scratch,
        compiler_params=pltpu.CompilerParams(
            dimension_semantics=("arbitrary",),
            vmem_limit_bytes=32 * 1024 * 1024),
    )(*inputs)

    return out2d.reshape(N, Ho, Wo, CP)[..., :out_chan]


# ------------------------------ params / reference ---------------------------

def init_resblock_params(key, in_chan, out_chan, stride):
    def conv_init(k, o, i, kh, kw):
        fan_in = i * kh * kw
        bound = 1.0 / (fan_in ** 0.5)   # PyTorch default kaiming_uniform(a=sqrt(5))
        return jax.random.uniform(k, (o, i, kh, kw), jnp.float32, -bound, bound)

    k1, k2, k3 = jax.random.split(key, 3)
    params = {
        "conv1": conv_init(k1, out_chan, in_chan, 3, 3),
        "gamma1": jnp.ones((out_chan,), jnp.float32),
        "beta1": jnp.zeros((out_chan,), jnp.float32),
        "conv2": conv_init(k2, out_chan, out_chan, 3, 3),
        "gamma2": jnp.ones((out_chan,), jnp.float32),
        "beta2": jnp.zeros((out_chan,), jnp.float32),
    }
    if stride != 1 or in_chan != out_chan:
        params["conv_r"] = conv_init(k3, out_chan, in_chan, 1, 1)
        params["gamma_r"] = jnp.ones((out_chan,), jnp.float32)
        params["beta_r"] = jnp.zeros((out_chan,), jnp.float32)
    return params


def _conv_ref(x, w, stride, pad):
    return jax.lax.conv_general_dilated(
        x, jnp.transpose(w, (2, 3, 1, 0)), (stride, stride),
        [(pad, pad), (pad, pad)],
        dimension_numbers=("NHWC", "HWIO", "NHWC"),
        precision=jax.lax.Precision.HIGHEST)


def _bn_ref(y, g, b):
    m = y.mean(axis=(0, 1, 2))
    v = ((y - m) ** 2).mean(axis=(0, 1, 2))
    return g * (y - m) / jnp.sqrt(v + EPS) + b


def _resblock_ref(params, x, stride):
    if "conv_r" in params:
        identity = _bn_ref(_conv_ref(x, params["conv_r"], stride, 0),
                           params["gamma_r"], params["beta_r"])
    else:
        identity = x
    h = jnp.maximum(_bn_ref(_conv_ref(x, params["conv1"], stride, 1),
                            params["gamma1"], params["beta1"]), 0.0)
    h = _bn_ref(_conv_ref(h, params["conv2"], 1, 1), params["gamma2"], params["beta2"])
    return jnp.maximum(h + identity, 0.0)


# ------------------------------------ main ------------------------------------

if __name__ == "__main__":
    key = jax.random.PRNGKey(0)
    kx, kp1, kp2 = jax.random.split(key, 3)

    # Matches PyTorch NCHW input x = [2, 4, 16, 16]; converted to NHWC internally.
    x_nchw = jax.random.normal(kx, (2, 4, 16, 16), jnp.float32)
    x_nhwc = jnp.transpose(x_nchw, (0, 2, 3, 1))

    configs = [
        (4, 8, 2, kp1),   # downsampling block (1x1-conv + BN projection residual)
        (4, 4, 1, kp2),   # identity-residual block
    ]
    for in_c, out_c, stride, kp in configs:
        params = init_resblock_params(kp, in_c, out_c, stride)
        prepped = prepare_resblock_params(params)      # hoisted weight/BN prep
        out = resblock_forward(prepped, x_nhwc, stride=stride, out_chan=out_c)
        out = jax.block_until_ready(out)
        ref = _resblock_ref(params, x_nhwc, stride)
        assert out.shape == ref.shape
        assert jnp.allclose(out, ref, atol=1e-2, rtol=1e-2), (
            f"mismatch for config {(in_c, out_c, stride)}")

    print("KERNEL_OK")
</pallas_src>

<mosaic_0001>
module attributes {stable_mosaic.version = 11 : i64} {
  func.func @_resblock_kernel(%arg0: i32, %arg1: memref<8x9x9x128xf32, #tpu.memory_space<vmem>>, %arg2: memref<3x3x128x128xf32, #tpu.memory_space<vmem>>, %arg3: memref<1x128xf32, #tpu.memory_space<vmem>>, %arg4: memref<1x128xf32, #tpu.memory_space<vmem>>, %arg5: memref<3x3x128x128xf32, #tpu.memory_space<vmem>>, %arg6: memref<1x128xf32, #tpu.memory_space<vmem>>, %arg7: memref<1x128xf32, #tpu.memory_space<vmem>>, %arg8: memref<128x128xf32, #tpu.memory_space<vmem>>, %arg9: memref<1x128xf32, #tpu.memory_space<vmem>>, %arg10: memref<1x128xf32, #tpu.memory_space<vmem>>, %arg11: memref<128x128xf32, #tpu.memory_space<vmem>>, %arg12: memref<128x128xf32, #tpu.memory_space<vmem>>, %arg13: memref<2x10x10x128xf32, #tpu.memory_space<vmem>>, %arg14: memref<128x128xf32, #tpu.memory_space<vmem>>) attributes {dimension_semantics = [#tpu.dimension_semantics<arbitrary>], iteration_bounds = array<i64: 1>, scalar_prefetch = 0 : i64, scratch_operands = 3 : i64, tpu.core_type = #tpu.core_type<tc>, window_params = [{pipeline_mode = #tpu.pipeline_mode<synchronous>, transform_indices = @transform_0, window_bounds = array<i64: 8, 9, 9, 128>}, {pipeline_mode = #tpu.pipeline_mode<synchronous>, transform_indices = @transform_1, window_bounds = array<i64: 3, 3, 128, 128>}, {pipeline_mode = #tpu.pipeline_mode<synchronous>, transform_indices = @transform_2, window_bounds = array<i64: 1, 128>}, {pipeline_mode = #tpu.pipeline_mode<synchronous>, transform_indices = @transform_3, window_bounds = array<i64: 1, 128>}, {pipeline_mode = #tpu.pipeline_mode<synchronous>, transform_indices = @transform_4, window_bounds = array<i64: 3, 3, 128, 128>}, {pipeline_mode = #tpu.pipeline_mode<synchronous>, transform_indices = @transform_5, window_bounds = array<i64: 1, 128>}, {pipeline_mode = #tpu.pipeline_mode<synchronous>, transform_indices = @transform_6, window_bounds = array<i64: 1, 128>}, {pipeline_mode = #tpu.pipeline_mode<synchronous>, transform_indices = @transform_7, window_bounds = array<i64: 128, 128>}, {pipeline_mode = #tpu.pipeline_mode<synchronous>, transform_indices = @transform_8, window_bounds = array<i64: 1, 128>}, {pipeline_mode = #tpu.pipeline_mode<synchronous>, transform_indices = @transform_9, window_bounds = array<i64: 1, 128>}, {pipeline_mode = #tpu.pipeline_mode<synchronous>, transform_indices = @transform_10, window_bounds = array<i64: 128, 128>}]} {
    %c6 = arith.constant 6 : index
    %c0 = arith.constant 0 : index
    %c0_0 = arith.constant 0 : index
    %c0_1 = arith.constant 0 : index
    %0 = vector.load %arg1[%c6, %c0, %c0_0, %c0_1] : memref<8x9x9x128xf32, #tpu.memory_space<vmem>>, vector<2x8x8x128xf32>
    %1 = vector.shape_cast %0 : vector<2x8x8x128xf32> to vector<128x128xf32>
    %c0_2 = arith.constant 0 : index
    %c0_3 = arith.constant 0 : index
    %2 = vector.load %arg8[%c0_2, %c0_3] : memref<128x128xf32, #tpu.memory_space<vmem>>, vector<128x128xf32>
    %cst = arith.constant dense<0.000000e+00> : vector<128x128xf32>
    %3 = tpu.matmul %1, %2, %cst {dimension_numbers = #tpu.dot_dimension_numbers<[1], [0], [0], [1], [0, 0, 1, 1], [], []>} : vector<128x128xf32>, vector<128x128xf32>, vector<128x128xf32> -> vector<128x128xf32>
    %cst_4 = arith.constant dense<0.000000e+00> : vector<128xf32>
    %4 = vector.multi_reduction <add>, %3, %cst_4 [0] : vector<128x128xf32> to vector<128xf32>
    %5 = vector.shape_cast %4 : vector<128xf32> to vector<1x128xf32>
    %cst_5 = arith.constant 1.280000e+02 : f32
    %6 = vector.broadcast %cst_5 : f32 to vector<1x128xf32>
    %7 = arith.divf %5, %6 : vector<1x128xf32>
    %8 = vector.broadcast %7 : vector<1x128xf32> to vector<128x128xf32>
    %9 = arith.subf %3, %8 : vector<128x128xf32>
    %10 = arith.mulf %9, %9 : vector<128x128xf32>
    %cst_6 = arith.constant dense<0.000000e+00> : vector<128xf32>
    %11 = vector.multi_reduction <add>, %10, %cst_6 [0] : vector<128x128xf32> to vector<128xf32>
    %12 = vector.shape_cast %11 : vector<128xf32> to vector<1x128xf32>
    %cst_7 = arith.constant 1.280000e+02 : f32
    %13 = vector.broadcast %cst_7 : f32 to vector<1x128xf32>
    %14 = arith.divf %12, %13 : vector<1x128xf32>
    %c0_8 = arith.constant 0 : index
    %c0_9 = arith.constant 0 : index
    %15 = vector.load %arg9[%c0_8, %c0_9] : memref<1x128xf32, #tpu.memory_space<vmem>>, vector<1x128xf32>
    %16 = vector.broadcast %7 : vector<1x128xf32> to vector<128x128xf32>
    %17 = arith.subf %3, %16 : vector<128x128xf32>
    %18 = vector.broadcast %15 : vector<1x128xf32> to vector<128x128xf32>
    %19 = arith.mulf %18, %17 : vector<128x128xf32>
    %cst_10 = arith.constant 9.99999974E-6 : f32
    %20 = vector.broadcast %cst_10 : f32 to vector<1x128xf32>
    %21 = arith.addf %14, %20 : vector<1x128xf32>
    %22 = math.rsqrt %21 : vector<1x128xf32>
    %23 = vector.broadcast %22 : vector<1x128xf32> to vector<128x128xf32>
    %24 = arith.mulf %19, %23 : vector<128x128xf32>
    %c0_11 = arith.constant 0 : index
    %c0_12 = arith.constant 0 : index
    %25 = vector.load %arg10[%c0_11, %c0_12] : memref<1x128xf32, #tpu.memory_space<vmem>>, vector<1x128xf32>
    %26 = vector.broadcast %25 : vector<1x128xf32> to vector<128x128xf32>
    %27 = arith.addf %24, %26 : vector<128x128xf32>
    %c0_13 = arith.constant 0 : index
    %c0_14 = arith.constant 0 : index
    %28 = vector.load %arg14[%c0_13, %c0_14] : memref<128x128xf32, #tpu.memory_space<vmem>>, vector<128x128xf32>
    tpu.vector_store %arg14[%c0_13, %c0_14], %27 {strides = array<i32>} : memref<128x128xf32, #tpu.memory_space<vmem>>, vector<128x128xf32>,
    %c0_15 = arith.constant 0 : index
    %c0_16 = arith.constant 0 : index
    %c0_17 = arith.constant 0 : index
    %c0_18 = arith.constant 0 : index
    %29 = vector.load %arg1[%c0_15, %c0_16, %c0_17, %c0_18] : memref<8x9x9x128xf32, #tpu.memory_space<vmem>>, vector<2x8x8x128xf32>
    %30 = vector.shape_cast %29 : vector<2x8x8x128xf32> to vector<128x128xf32>
    %c0_19 = arith.constant 0 : index
    %c0_20 = arith.constant 0 : index
    %c0_21 = arith.constant 0 : index
    %c0_22 = arith.constant 0 : index
    %31 = vector.load %arg2[%c0_19, %c0_20, %c0_21, %c0_22] : memref<3x3x128x128xf32, #tpu.memory_space<vmem>>, vector<1x1x128x128xf32>
    %32 = vector.shape_cast %31 : vector<1x1x128x128xf32> to vector<128x128xf32>
    %cst_23 = arith.constant dense<0.000000e+00> : vector<128x128xf32>
    %33 = tpu.matmul %30, %32, %cst_23 {dimension_numbers = #tpu.dot_dimension_numbers<[1], [0], [0], [1], [0, 0, 1, 1], [], []>} : vector<128x128xf32>, vector<128x128xf32>, vector<128x128xf32> -> vector<128x128xf32>
    %c0_24 = arith.constant 0 : index
    %c0_25 = arith.constant 0 : index
    %34 = vector.load %arg12[%c0_24, %c0_25] : memref<128x128xf32, #tpu.memory_space<vmem>>, vector<128x128xf32>
    tpu.vector_store %arg12[%c0_24, %c0_25], %33 {strides = array<i32>} : memref<128x128xf32, #tpu.memory_space<vmem>>, vector<128x128xf32>,
    %c2 = arith.constant 2 : index
    %c0_26 = arith.constant 0 : index
    %c0_27 = arith.constant 0 : index
    %c0_28 = arith.constant 0 : index
    %35 = vector.load %arg1[%c2, %c0_26, %c0_27, %c0_28] : memref<8x9x9x128xf32, #tpu.memory_space<vmem>>, vector<2x8x8x128xf32>
    %36 = vector.shape_cast %35 : vector<2x8x8x128xf32> to vector<128x128xf32>
    %c0_29 = arith.constant 0 : index
    %c1 = arith.constant 1 : index
    %c0_30 = arith.constant 0 : index
    %c0_31 = arith.constant 0 : index
    %37 = vector.load %arg2[%c0_29, %c1, %c0_30, %c0_31] : memref<3x3x128x128xf32, #tpu.memory_space<vmem>>, vector<1x1x128x128xf32>
    %38 = vector.shape_cast %37 : vector<1x1x128x128xf32> to vector<128x128xf32>
    %cst_32 = arith.constant dense<0.000000e+00> : vector<128x128xf32>
    %39 = tpu.matmul %36, %38, %cst_32 {dimension_numbers = #tpu.dot_dimension_numbers<[1], [0], [0], [1], [0, 0, 1, 1], [], []>} : vector<128x128xf32>, vector<128x128xf32>, vector<128x128xf32> -> vector<128x128xf32>
    %c0_33 = arith.constant 0 : index
    %c0_34 = arith.constant 0 : index
    %40 = vector.load %arg12[%c0_33, %c0_34] : memref<128x128xf32, #tpu.memory_space<vmem>>, vector<128x128xf32>
    %41 = arith.addf %40, %39 : vector<128x128xf32>
    %c0_35 = arith.constant 0 : index
    %c0_36 = arith.constant 0 : index
    %42 = vector.load %arg12[%c0_35, %c0_36] : memref<128x128xf32, #tpu.memory_space<vmem>>, vector<128x128xf32>
    tpu.vector_store %arg12[%c0_35, %c0_36], %41 {strides = array<i32>} : memref<128x128xf32, #tpu.memory_space<vmem>>, vector<128x128xf32>,
    %c0_37 = arith.constant 0 : index
    %c0_38 = arith.constant 0 : index
    %c1_39 = arith.constant 1 : index
    %c0_40 = arith.constant 0 : index
    %43 = vector.load %arg1[%c0_37, %c0_38, %c1_39, %c0_40] : memref<8x9x9x128xf32, #tpu.memory_space<vmem>>, vector<2x8x8x128xf32>
    %44 = vector.shape_cast %43 : vector<2x8x8x128xf32> to vector<128x128xf32>
    %c0_41 = arith.constant 0 : index
    %c2_42 = arith.constant 2 : index
    %c0_43 = arith.constant 0 : index
    %c0_44 = arith.constant 0 : index
    %45 = vector.load %arg2[%c0_41, %c2_42, %c0_43, %c0_44] : memref<3x3x128x128xf32, #tpu.memory_space<vmem>>, vector<1x1x128x128xf32>
    %46 = vector.shape_cast %45 : vector<1x1x128x128xf32> to vector<128x128xf32>
    %cst_45 = arith.constant dense<0.000000e+00> : vector<128x128xf32>
    %47 = tpu.matmul %44, %46, %cst_45 {dimension_numbers = #tpu.dot_dimension_numbers<[1], [0], [0], [1], [0, 0, 1, 1], [], []>} : vector<128x128xf32>, vector<128x128xf32>, vector<128x128xf32> -> vector<128x128xf32>
    %c0_46 = arith.constant 0 : index
    %c0_47 = arith.constant 0 : index
    %48 = vector.load %arg12[%c0_46, %c0_47] : memref<128x128xf32, #tpu.memory_space<vmem>>, vector<128x128xf32>
    %49 = arith.addf %48, %47 : vector<128x128xf32>
    %c0_48 = arith.constant 0 : index
    %c0_49 = arith.constant 0 : index
    %50 = vector.load %arg12[%c0_48, %c0_49] : memref<128x128xf32, #tpu.memory_space<vmem>>, vector<128x128xf32>
    tpu.vector_store %arg12[%c0_48, %c0_49], %49 {strides = array<i32>} : memref<128x128xf32, #tpu.memory_space<vmem>>, vector<128x128xf32>,
    %c4 = arith.constant 4 : index
    %c0_50 = arith.constant 0 : index
    %c0_51 = arith.constant 0 : index
    %c0_52 = arith.constant 0 : index
    %51 = vector.load %arg1[%c4, %c0_50, %c0_51, %c0_52] : memref<8x9x9x128xf32, #tpu.memory_space<vmem>>, vector<2x8x8x128xf32>
    %52 = vector.shape_cast %51 : vector<2x8x8x128xf32> to vector<128x128xf32>
    %c1_53 = arith.constant 1 : index
    %c0_54 = arith.constant 0 : index
    %c0_55 = arith.constant 0 : index
    %c0_56 = arith.constant 0 : index
    %53 = vector.load %arg2[%c1_53, %c0_54, %c0_55, %c0_56] : memref<3x3x128x128xf32, #tpu.memory_space<vmem>>, vector<1x1x128x128xf32>
    %54 = vector.shape_cast %53 : vector<1x1x128x128xf32> to vector<128x128xf32>
    %cst_57 = arith.constant dense<0.000000e+00> : vector<128x128xf32>
    %55 = tpu.matmul %52, %54, %cst_57 {dimension_numbers = #tpu.dot_dimension_numbers<[1], [0], [0], [1], [0, 0, 1, 1], [], []>} : vector<128x128xf32>, vector<128x128xf32>, vector<128x128xf32> -> vector<128x128xf32>
    %c0_58 = arith.constant 0 : index
    %c0_59 = arith.constant 0 : index
    %56 = vector.load %arg12[%c0_58, %c0_59] : memref<128x128xf32, #tpu.memory_space<vmem>>, vector<128x128xf32>
    %57 = arith.addf %56, %55 : vector<128x128xf32>
    %c0_60 = arith.constant 0 : index
    %c0_61 = arith.constant 0 : index
    %58 = vector.load %arg12[%c0_60, %c0_61] : memref<128x128xf32, #tpu.memory_space<vmem>>, vector<128x128xf32>
    tpu.vector_store %arg12[%c0_60, %c0_61], %57 {strides = array<i32>} : memref<128x128xf32, #tpu.memory_space<vmem>>, vector<128x128xf32>,
    %c6_62 = arith.constant 6 : index
    %c0_63 = arith.constant 0 : index
    %c0_64 = arith.constant 0 : index
    %c0_65 = arith.constant 0 : index
    %59 = vector.load %arg1[%c6_62, %c0_63, %c0_64, %c0_65] : memref<8x9x9x128xf32, #tpu.memory_space<vmem>>, vector<2x8x8x128xf32>
    %60 = vector.shape_cast %59 : vector<2x8x8x128xf32> to vector<128x128xf32>
    %c1_66 = arith.constant 1 : index
    %c1_67 = arith.constant 1 : index
    %c0_68 = arith.constant 0 : index
    %c0_69 = arith.constant 0 : index
    %61 = vector.load %arg2[%c1_66, %c1_67, %c0_68, %c0_69] : memref<3x3x128x128xf32, #tpu.memory_space<vmem>>, vector<1x1x128x128xf32>
    %62 = vector.shape_cast %61 : vector<1x1x128x128xf32> to vector<128x128xf32>
    %cst_70 = arith.constant dense<0.000000e+00> : vector<128x128xf32>
    %63 = tpu.matmul %60, %62, %cst_70 {dimension_numbers = #tpu.dot_dimension_numbers<[1], [0], [0], [1], [0, 0, 1, 1], [], []>} : vector<128x128xf32>, vector<128x128xf32>, vector<128x128xf32> -> vector<128x128xf32>
    %c0_71 = arith.constant 0 : index
    %c0_72 = arith.constant 0 : index
    %64 = vector.load %arg12[%c0_71, %c0_72] : memref<128x128xf32, #tpu.memory_space<vmem>>, vector<128x128xf32>
    %65 = arith.addf %64, %63 : vector<128x128xf32>
    %c0_73 = arith.constant 0 : index
    %c0_74 = arith.constant 0 : index
    %66 = vector.load %arg12[%c0_73, %c0_74] : memref<128x128xf32, #tpu.memory_space<vmem>>, vector<128x128xf32>
    tpu.vector_store %arg12[%c0_73, %c0_74], %65 {strides = array<i32>} : memref<128x128xf32, #tpu.memory_space<vmem>>, vector<128x128xf32>,
    %c4_75 = arith.constant 4 : index
    %c0_76 = arith.constant 0 : index
    %c1_77 = arith.constant 1 : index
    %c0_78 = arith.constant 0 : index
    %67 = vector.load %arg1[%c4_75, %c0_76, %c1_77, %c0_78] : memref<8x9x9x128xf32, #tpu.memory_space<vmem>>, vector<2x8x8x128xf32>
    %68 = vector.shape_cast %67 : vector<2x8x8x128xf32> to vector<128x128xf32>
    %c1_79 = arith.constant 1 : index
    %c2_80 = arith.constant 2 : index
    %c0_81 = arith.constant 0 : index
    %c0_82 = arith.constant 0 : index
    %69 = vector.load %arg2[%c1_79, %c2_80, %c0_81, %c0_82] : memref<3x3x128x128xf32, #tpu.memory_space<vmem>>, vector<1x1x128x128xf32>
    %70 = vector.shape_cast %69 : vector<1x1x128x128xf32> to vector<128x128xf32>
    %cst_83 = arith.constant dense<0.000000e+00> : vector<128x128xf32>
    %71 = tpu.matmul %68, %70, %cst_83 {dimension_numbers = #tpu.dot_dimension_numbers<[1], [0], [0], [1], [0, 0, 1, 1], [], []>} : vector<128x128xf32>, vector<128x128xf32>, vector<128x128xf32> -> vector<128x128xf32>
    %c0_84 = arith.constant 0 : index
    %c0_85 = arith.constant 0 : index
    %72 = vector.load %arg12[%c0_84, %c0_85] : memref<128x128xf32, #tpu.memory_space<vmem>>, vector<128x128xf32>
    %73 = arith.addf %72, %71 : vector<128x128xf32>
    %c0_86 = arith.constant 0 : index
    %c0_87 = arith.constant 0 : index
    %74 = vector.load %arg12[%c0_86, %c0_87] : memref<128x128xf32, #tpu.memory_space<vmem>>, vector<128x128xf32>
    tpu.vector_store %arg12[%c0_86, %c0_87], %73 {strides = array<i32>} : memref<128x128xf32, #tpu.memory_space<vmem>>, vector<128x128xf32>,
    %c0_88 = arith.constant 0 : index
    %c1_89 = arith.constant 1 : index
    %c0_90 = arith.constant 0 : index
    %c0_91 = arith.constant 0 : index
    %75 = vector.load %arg1[%c0_88, %c1_89, %c0_90, %c0_91] : memref<8x9x9x128xf32, #tpu.memory_space<vmem>>, vector<2x8x8x128xf32>
    %76 = vector.shape_cast %75 : vector<2x8x8x128xf32> to vector<128x128xf32>
    %c2_92 = arith.constant 2 : index
    %c0_93 = arith.constant 0 : index
    %c0_94 = arith.constant 0 : index
    %c0_95 = arith.constant 0 : index
    %77 = vector.load %arg2[%c2_92, %c0_93, %c0_94, %c0_95] : memref<3x3x128x128xf32, #tpu.memory_space<vmem>>, vector<1x1x128x128xf32>
    %78 = vector.shape_cast %77 : vector<1x1x128x128xf32> to vector<128x128xf32>
    %cst_96 = arith.constant dense<0.000000e+00> : vector<128x128xf32>
    %79 = tpu.matmul %76, %78, %cst_96 {dimension_numbers = #tpu.dot_dimension_numbers<[1], [0], [0], [1], [0, 0, 1, 1], [], []>} : vector<128x128xf32>, vector<128x128xf32>, vector<128x128xf32> -> vector<128x128xf32>
    %c0_97 = arith.constant 0 : index
    %c0_98 = arith.constant 0 : index
    %80 = vector.load %arg12[%c0_97, %c0_98] : memref<128x128xf32, #tpu.memory_space<vmem>>, vector<128x128xf32>
    %81 = arith.addf %80, %79 : vector<128x128xf32>
    %c0_99 = arith.constant 0 : index
    %c0_100 = arith.constant 0 : index
    %82 = vector.load %arg12[%c0_99, %c0_100] : memref<128x128xf32, #tpu.memory_space<vmem>>, vector<128x128xf32>
    tpu.vector_store %arg12[%c0_99, %c0_100], %81 {strides = array<i32>} : memref<128x128xf32, #tpu.memory_space<vmem>>, vector<128x128xf32>,
    %c2_101 = arith.constant 2 : index
    %c1_102 = arith.constant 1 : index
    %c0_103 = arith.constant 0 : index
    %c0_104 = arith.constant 0 : index
    %83 = vector.load %arg1[%c2_101, %c1_102, %c0_103, %c0_104] : memref<8x9x9x128xf32, #tpu.memory_space<vmem>>, vector<2x8x8x128xf32>
    %84 = vector.shape_cast %83 : vector<2x8x8x128xf32> to vector<128x128xf32>
    %c2_105 = arith.constant 2 : index
    %c1_106 = arith.constant 1 : index
    %c0_107 = arith.constant 0 : index
    %c0_108 = arith.constant 0 : index
    %85 = vector.load %arg2[%c2_105, %c1_106, %c0_107, %c0_108] : memref<3x3x128x128xf32, #tpu.memory_space<vmem>>, vector<1x1x128x128xf32>
    %86 = vector.shape_cast %85 : vector<1x1x128x128xf32> to vector<128x128xf32>
    %cst_109 = arith.constant dense<0.000000e+00> : vector<128x128xf32>
    %87 = tpu.matmul %84, %86, %cst_109 {dimension_numbers = #tpu.dot_dimension_numbers<[1], [0], [0], [1], [0, 0, 1, 1], [], []>} : vector<128x128xf32>, vector<128x128xf32>, vector<128x128xf32> -> vector<128x128xf32>
    %c0_110 = arith.constant 0 : index
    %c0_111 = arith.constant 0 : index
    %88 = vector.load %arg12[%c0_110, %c0_111] : memref<128x128xf32, #tpu.memory_space<vmem>>, vector<128x128xf32>
    %89 = arith.addf %88, %87 : vector<128x128xf32>
    %c0_112 = arith.constant 0 : index
    %c0_113 = arith.constant 0 : index
    %90 = vector.load %arg12[%c0_112, %c0_113] : memref<128x128xf32, #tpu.memory_space<vmem>>, vector<128x128xf32>
    tpu.vector_store %arg12[%c0_112, %c0_113], %89 {strides = array<i32>} : memref<128x128xf32, #tpu.memory_space<vmem>>, vector<128x128xf32>,
    %c0_114 = arith.constant 0 : index
    %c1_115 = arith.constant 1 : index
    %c1_116 = arith.constant 1 : index
    %c0_117 = arith.constant 0 : index
    %91 = vector.load %arg1[%c0_114, %c1_115, %c1_116, %c0_117] : memref<8x9x9x128xf32, #tpu.memory_space<vmem>>, vector<2x8x8x128xf32>
    %92 = vector.shape_cast %91 : vector<2x8x8x128xf32> to vector<128x128xf32>
    %c2_118 = arith.constant 2 : index
    %c2_119 = arith.constant 2 : index
    %c0_120 = arith.constant 0 : index
    %c0_121 = arith.constant 0 : index
    %93 = vector.load %arg2[%c2_118, %c2_119, %c0_120, %c0_121] : memref<3x3x128x128xf32, #tpu.memory_space<vmem>>, vector<1x1x128x128xf32>
    %94 = vector.shape_cast %93 : vector<1x1x128x128xf32> to vector<128x128xf32>
    %cst_122 = arith.constant dense<0.000000e+00> : vector<128x128xf32>
    %95 = tpu.matmul %92, %94, %cst_122 {dimension_numbers = #tpu.dot_dimension_numbers<[1], [0], [0], [1], [0, 0, 1, 1], [], []>} : vector<128x128xf32>, vector<128x128xf32>, vector<128x128xf32> -> vector<128x128xf32>
    %c0_123 = arith.constant 0 : index
    %c0_124 = arith.constant 0 : index
    %96 = vector.load %arg12[%c0_123, %c0_124] : memref<128x128xf32, #tpu.memory_space<vmem>>, vector<128x128xf32>
    %97 = arith.addf %96, %95 : vector<128x128xf32>
    %c0_125 = arith.constant 0 : index
    %c0_126 = arith.constant 0 : index
    %98 = vector.load %arg12[%c0_125, %c0_126] : memref<128x128xf32, #tpu.memory_space<vmem>>, vector<128x128xf32>
    tpu.vector_store %arg12[%c0_125, %c0_126], %97 {strides = array<i32>} : memref<128x128xf32, #tpu.memory_space<vmem>>, vector<128x128xf32>,
    %c0_127 = arith.constant 0 : index
    %c0_128 = arith.constant 0 : index
    %99 = vector.load %arg12[%c0_127, %c0_128] : memref<128x128xf32, #tpu.memory_space<vmem>>, vector<128x128xf32>
    %cst_129 = arith.constant dense<0.000000e+00> : vector<128xf32>
    %100 = vector.multi_reduction <add>, %99, %cst_129 [0] : vector<128x128xf32> to vector<128xf32>
    %101 = vector.shape_cast %100 : vector<128xf32> to vector<1x128xf32>
    %cst_130 = arith.constant 1.280000e+02 : f32
    %102 = vector.broadcast %cst_130 : f32 to vector<1x128xf32>
    %103 = arith.divf %101, %102 : vector<1x128xf32>
    %104 = vector.broadcast %103 : vector<1x128xf32> to vector<128x128xf32>
    %105 = arith.subf %99, %104 : vector<128x128xf32>
    %106 = arith.mulf %105, %105 : vector<128x128xf32>
    %cst_131 = arith.constant dense<0.000000e+00> : vector<128xf32>
    %107 = vector.multi_reduction <add>, %106, %cst_131 [0] : vector<128x128xf32> to vector<128xf32>
    %108 = vector.shape_cast %107 : vector<128xf32> to vector<1x128xf32>
    %cst_132 = arith.constant 1.280000e+02 : f32
    %109 = vector.broadcast %cst_132 : f32 to vector<1x128xf32>
    %110 = arith.divf %108, %109 : vector<1x128xf32>
    %c0_133 = arith.constant 0 : index
    %c0_134 = arith.constant 0 : index
    %111 = vector.load %arg3[%c0_133, %c0_134] : memref<1x128xf32, #tpu.memory_space<vmem>>, vector<1x128xf32>
    %112 = vector.broadcast %103 : vector<1x128xf32> to vector<128x128xf32>
    %113 = arith.subf %99, %112 : vector<128x128xf32>
    %114 = vector.broadcast %111 : vector<1x128xf32> to vector<128x128xf32>
    %115 = arith.mulf %114, %113 : vector<128x128xf32>
    %cst_135 = arith.constant 9.99999974E-6 : f32
    %116 = vector.broadcast %cst_135 : f32 to vector<1x128xf32>
    %117 = arith.addf %110, %116 : vector<1x128xf32>
    %118 = math.rsqrt %117 : vector<1x128xf32>
    %119 = vector.broadcast %118 : vector<1x128xf32> to vector<128x128xf32>
    %120 = arith.mulf %115, %119 : vector<128x128xf32>
    %c0_136 = arith.constant 0 : index
    %c0_137 = arith.constant 0 : index
    %121 = vector.load %arg4[%c0_136, %c0_137] : memref<1x128xf32, #tpu.memory_space<vmem>>, vector<1x128xf32>
    %122 = vector.broadcast %121 : vector<1x128xf32> to vector<128x128xf32>
    %123 = arith.addf %120, %122 : vector<128x128xf32>
    %cst_138 = arith.constant 0.000000e+00 : f32
    %124 = vector.broadcast %cst_138 : f32 to vector<128x128xf32>
    %125 = arith.maximumf %123, %124 : vector<128x128xf32>
    %cst_139 = arith.constant 0.000000e+00 : f32
    %126 = vector.broadcast %cst_139 : f32 to vector<2x10x10x128xf32>
    %c0_140 = arith.constant 0 : index
    %c0_141 = arith.constant 0 : index
    %c0_142 = arith.constant 0 : index
    %c0_143 = arith.constant 0 : index
    %127 = vector.load %arg13[%c0_140, %c0_141, %c0_142, %c0_143] : memref<2x10x10x128xf32, #tpu.memory_space<vmem>>, vector<2x10x10x128xf32>
    tpu.vector_store %arg13[%c0_140, %c0_141, %c0_142, %c0_143], %126 {strides = array<i32>} : memref<2x10x10x128xf32, #tpu.memory_space<vmem>>, vector<2x10x10x128xf32>,
    %128 = vector.shape_cast %125 : vector<128x128xf32> to vector<2x8x8x128xf32>
    %c0_144 = arith.constant 0 : index
    %c1_145 = arith.constant 1 : index
    %c1_146 = arith.constant 1 : index
    %c0_147 = arith.constant 0 : index
    %129 = vector.load %arg13[%c0_144, %c1_145, %c1_146, %c0_147] : memref<2x10x10x128xf32, #tpu.memory_space<vmem>>, vector<2x8x8x128xf32>
    tpu.vector_store %arg13[%c0_144, %c1_145, %c1_146, %c0_147], %128 {strides = array<i32>} : memref<2x10x10x128xf32, #tpu.memory_space<vmem>>, vector<2x8x8x128xf32>,
    %c0_148 = arith.constant 0 : index
    %c0_149 = arith.constant 0 : index
    %c0_150 = arith.constant 0 : index
    %c0_151 = arith.constant 0 : index
    %130 = vector.load %arg13[%c0_148, %c0_149, %c0_150, %c0_151] : memref<2x10x10x128xf32, #tpu.memory_space<vmem>>, vector<2x8x8x128xf32>
    %131 = vector.shape_cast %130 : vector<2x8x8x128xf32> to vector<128x128xf32>
    %c0_152 = arith.constant 0 : index
    %c0_153 = arith.constant 0 : index
    %c0_154 = arith.constant 0 : index
    %c0_155 = arith.constant 0 : index
    %132 = vector.load %arg5[%c0_152, %c0_153, %c0_154, %c0_155] : memref<3x3x128x128xf32, #tpu.memory_space<vmem>>, vector<1x1x128x128xf32>
    %133 = vector.shape_cast %132 : vector<1x1x128x128xf32> to vector<128x128xf32>
    %cst_156 = arith.constant dense<0.000000e+00> : vector<128x128xf32>
    %134 = tpu.matmul %131, %133, %cst_156 {dimension_numbers = #tpu.dot_dimension_numbers<[1], [0], [0], [1], [0, 0, 1, 1], [], []>} : vector<128x128xf32>, vector<128x128xf32>, vector<128x128xf32> -> vector<128x128xf32>
    %c0_157 = arith.constant 0 : index
    %c0_158 = arith.constant 0 : index
    %135 = vector.load %arg12[%c0_157, %c0_158] : memref<128x128xf32, #tpu.memory_space<vmem>>, vector<128x128xf32>
    tpu.vector_store %arg12[%c0_157, %c0_158], %134 {strides = array<i32>} : memref<128x128xf32, #tpu.memory_space<vmem>>, vector<128x128xf32>,
    %c0_159 = arith.constant 0 : index
    %c0_160 = arith.constant 0 : index
    %c1_161 = arith.constant 1 : index
    %c0_162 = arith.constant 0 : index
    %136 = vector.load %arg13[%c0_159, %c0_160, %c1_161, %c0_162] : memref<2x10x10x128xf32, #tpu.memory_space<vmem>>, vector<2x8x8x128xf32>
    %137 = vector.shape_cast %136 : vector<2x8x8x128xf32> to vector<128x128xf32>
    %c0_163 = arith.constant 0 : index
    %c1_164 = arith.constant 1 : index
    %c0_165 = arith.constant 0 : index
    %c0_166 = arith.constant 0 : index
    %138 = vector.load %arg5[%c0_163, %c1_164, %c0_165, %c0_166] : memref<3x3x128x128xf32, #tpu.memory_space<vmem>>, vector<1x1x128x128xf32>
    %139 = vector.shape_cast %138 : vector<1x1x128x128xf32> to vector<128x128xf32>
    %cst_167 = arith.constant dense<0.000000e+00> : vector<128x128xf32>
    %140 = tpu.matmul %137, %139, %cst_167 {dimension_numbers = #tpu.dot_dimension_numbers<[1], [0], [0], [1], [0, 0, 1, 1], [], []>} : vector<128x128xf32>, vector<128x128xf32>, vector<128x128xf32> -> vector<128x128xf32>
    %c0_168 = arith.constant 0 : index
    %c0_169 = arith.constant 0 : index
    %141 = vector.load %arg12[%c0_168, %c0_169] : memref<128x128xf32, #tpu.memory_space<vmem>>, vector<128x128xf32>
    %142 = arith.addf %141, %140 : vector<128x128xf32>
    %c0_170 = arith.constant 0 : index
    %c0_171 = arith.constant 0 : index
    %143 = vector.load %arg12[%c0_170, %c0_171] : memref<128x128xf32, #tpu.memory_space<vmem>>, vector<128x128xf32>
    tpu.vector_store %arg12[%c0_170, %c0_171], %142 {strides = array<i32>} : memref<128x128xf32, #tpu.memory_space<vmem>>, vector<128x128xf32>,
    %c0_172 = arith.constant 0 : index
    %c0_173 = arith.constant 0 : index
    %c2_174 = arith.constant 2 : index
    %c0_175 = arith.constant 0 : index
    %144 = vector.load %arg13[%c0_172, %c0_173, %c2_174, %c0_175] : memref<2x10x10x128xf32, #tpu.memory_space<vmem>>, vector<2x8x8x128xf32>
    %145 = vector.shape_cast %144 : vector<2x8x8x128xf32> to vector<128x128xf32>
    %c0_176 = arith.constant 0 : index
    %c2_177 = arith.constant 2 : index
    %c0_178 = arith.constant 0 : index
    %c0_179 = arith.constant 0 : index
    %146 = vector.load %arg5[%c0_176, %c2_177, %c0_178, %c0_179] : memref<3x3x128x128xf32, #tpu.memory_space<vmem>>, vector<1x1x128x128xf32>
    %147 = vector.shape_cast %146 : vector<1x1x128x128xf32> to vector<128x128xf32>
    %cst_180 = arith.constant dense<0.000000e+00> : vector<128x128xf32>
    %148 = tpu.matmul %145, %147, %cst_180 {dimension_numbers = #tpu.dot_dimension_numbers<[1], [0], [0], [1], [0, 0, 1, 1], [], []>} : vector<128x128xf32>, vector<128x128xf32>, vector<128x128xf32> -> vector<128x128xf32>
    %c0_181 = arith.constant 0 : index
    %c0_182 = arith.constant 0 : index
    %149 = vector.load %arg12[%c0_181, %c0_182] : memref<128x128xf32, #tpu.memory_space<vmem>>, vector<128x128xf32>
    %150 = arith.addf %149, %148 : vector<128x128xf32>
    %c0_183 = arith.constant 0 : index
    %c0_184 = arith.constant 0 : index
    %151 = vector.load %arg12[%c0_183, %c0_184] : memref<128x128xf32, #tpu.memory_space<vmem>>, vector<128x128xf32>
    tpu.vector_store %arg12[%c0_183, %c0_184], %150 {strides = array<i32>} : memref<128x128xf32, #tpu.memory_space<vmem>>, vector<128x128xf32>,
    %c0_185 = arith.constant 0 : index
    %c1_186 = arith.constant 1 : index
    %c0_187 = arith.constant 0 : index
    %c0_188 = arith.constant 0 : index
    %152 = vector.load %arg13[%c0_185, %c1_186, %c0_187, %c0_188] : memref<2x10x10x128xf32, #tpu.memory_space<vmem>>, vector<2x8x8x128xf32>
    %153 = vector.shape_cast %152 : vector<2x8x8x128xf32> to vector<128x128xf32>
    %c1_189 = arith.constant 1 : index
    %c0_190 = arith.constant 0 : index
    %c0_191 = arith.constant 0 : index
    %c0_192 = arith.constant 0 : index
    %154 = vector.load %arg5[%c1_189, %c0_190, %c0_191, %c0_192] : memref<3x3x128x128xf32, #tpu.memory_space<vmem>>, vector<1x1x128x128xf32>
    %155 = vector.shape_cast %154 : vector<1x1x128x128xf32> to vector<128x128xf32>
    %cst_193 = arith.constant dense<0.000000e+00> : vector<128x128xf32>
    %156 = tpu.matmul %153, %155, %cst_193 {dimension_numbers = #tpu.dot_dimension_numbers<[1], [0], [0], [1], [0, 0, 1, 1], [], []>} : vector<128x128xf32>, vector<128x128xf32>, vector<128x128xf32> -> vector<128x128xf32>
    %c0_194 = arith.constant 0 : index
    %c0_195 = arith.constant 0 : index
    %157 = vector.load %arg12[%c0_194, %c0_195] : memref<128x128xf32, #tpu.memory_space<vmem>>, vector<128x128xf32>
    %158 = arith.addf %157, %156 : vector<128x128xf32>
    %c0_196 = arith.constant 0 : index
    %c0_197 = arith.constant 0 : index
    %159 = vector.load %arg12[%c0_196, %c0_197] : memref<128x128xf32, #tpu.memory_space<vmem>>, vector<128x128xf32>
    tpu.vector_store %arg12[%c0_196, %c0_197], %158 {strides = array<i32>} : memref<128x128xf32, #tpu.memory_space<vmem>>, vector<128x128xf32>,
    %c0_198 = arith.constant 0 : index
    %c1_199 = arith.constant 1 : index
    %c1_200 = arith.constant 1 : index
    %c0_201 = arith.constant 0 : index
    %160 = vector.load %arg13[%c0_198, %c1_199, %c1_200, %c0_201] : memref<2x10x10x128xf32, #tpu.memory_space<vmem>>, vector<2x8x8x128xf32>
    %161 = vector.shape_cast %160 : vector<2x8x8x128xf32> to vector<128x128xf32>
    %c1_202 = arith.constant 1 : index
    %c1_203 = arith.constant 1 : index
    %c0_204 = arith.constant 0 : index
    %c0_205 = arith.constant 0 : index
    %162 = vector.load %arg5[%c1_202, %c1_203, %c0_204, %c0_205] : memref<3x3x128x128xf32, #tpu.memory_space<vmem>>, vector<1x1x128x128xf32>
    %163 = vector.shape_cast %162 : vector<1x1x128x128xf32> to vector<128x128xf32>
    %cst_206 = arith.constant dense<0.000000e+00> : vector<128x128xf32>
    %164 = tpu.matmul %161, %163, %cst_206 {dimension_numbers = #tpu.dot_dimension_numbers<[1], [0], [0], [1], [0, 0, 1, 1], [], []>} : vector<128x128xf32>, vector<128x128xf32>, vector<128x128xf32> -> vector<128x128xf32>
    %c0_207 = arith.constant 0 : index
    %c0_208 = arith.constant 0 : index
    %165 = vector.load %arg12[%c0_207, %c0_208] : memref<128x128xf32, #tpu.memory_space<vmem>>, vector<128x128xf32>
    %166 = arith.addf %165, %164 : vector<128x128xf32>
    %c0_209 = arith.constant 0 : index
    %c0_210 = arith.constant 0 : index
    %167 = vector.load %arg12[%c0_209, %c0_210] : memref<128x128xf32, #tpu.memory_space<vmem>>, vector<128x128xf32>
    tpu.vector_store %arg12[%c0_209, %c0_210], %166 {strides = array<i32>} : memref<128x128xf32, #tpu.memory_space<vmem>>, vector<128x128xf32>,
    %c0_211 = arith.constant 0 : index
    %c1_212 = arith.constant 1 : index
    %c2_213 = arith.constant 2 : index
    %c0_214 = arith.constant 0 : index
    %168 = vector.load %arg13[%c0_211, %c1_212, %c2_213, %c0_214] : memref<2x10x10x128xf32, #tpu.memory_space<vmem>>, vector<2x8x8x128xf32>
    %169 = vector.shape_cast %168 : vector<2x8x8x128xf32> to vector<128x128xf32>
    %c1_215 = arith.constant 1 : index
    %c2_216 = arith.constant 2 : index
    %c0_217 = arith.constant 0 : index
    %c0_218 = arith.constant 0 : index
    %170 = vector.load %arg5[%c1_215, %c2_216, %c0_217, %c0_218] : memref<3x3x128x128xf32, #tpu.memory_space<vmem>>, vector<1x1x128x128xf32>
    %171 = vector.shape_cast %170 : vector<1x1x128x128xf32> to vector<128x128xf32>
    %cst_219 = arith.constant dense<0.000000e+00> : vector<128x128xf32>
    %172 = tpu.matmul %169, %171, %cst_219 {dimension_numbers = #tpu.dot_dimension_numbers<[1], [0], [0], [1], [0, 0, 1, 1], [], []>} : vector<128x128xf32>, vector<128x128xf32>, vector<128x128xf32> -> vector<128x128xf32>
    %c0_220 = arith.constant 0 : index
    %c0_221 = arith.constant 0 : index
    %173 = vector.load %arg12[%c0_220, %c0_221] : memref<128x128xf32, #tpu.memory_space<vmem>>, vector<128x128xf32>
    %174 = arith.addf %173, %172 : vector<128x128xf32>
    %c0_222 = arith.constant 0 : index
    %c0_223 = arith.constant 0 : index
    %175 = vector.load %arg12[%c0_222, %c0_223] : memref<128x128xf32, #tpu.memory_space<vmem>>, vector<128x128xf32>
    tpu.vector_store %arg12[%c0_222, %c0_223], %174 {strides = array<i32>} : memref<128x128xf32, #tpu.memory_space<vmem>>, vector<128x128xf32>,
    %c0_224 = arith.constant 0 : index
    %c2_225 = arith.constant 2 : index
    %c0_226 = arith.constant 0 : index
    %c0_227 = arith.constant 0 : index
    %176 = vector.load %arg13[%c0_224, %c2_225, %c0_226, %c0_227] : memref<2x10x10x128xf32, #tpu.memory_space<vmem>>, vector<2x8x8x128xf32>
    %177 = vector.shape_cast %176 : vector<2x8x8x128xf32> to vector<128x128xf32>
    %c2_228 = arith.constant 2 : index
    %c0_229 = arith.constant 0 : index
    %c0_230 = arith.constant 0 : index
    %c0_231 = arith.constant 0 : index
    %178 = vector.load %arg5[%c2_228, %c0_229, %c0_230, %c0_231] : memref<3x3x128x128xf32, #tpu.memory_space<vmem>>, vector<1x1x128x128xf32>
    %179 = vector.shape_cast %178 : vector<1x1x128x128xf32> to vector<128x128xf32>
    %cst_232 = arith.constant dense<0.000000e+00> : vector<128x128xf32>
    %180 = tpu.matmul %177, %179, %cst_232 {dimension_numbers = #tpu.dot_dimension_numbers<[1], [0], [0], [1], [0, 0, 1, 1], [], []>} : vector<128x128xf32>, vector<128x128xf32>, vector<128x128xf32> -> vector<128x128xf32>
    %c0_233 = arith.constant 0 : index
    %c0_234 = arith.constant 0 : index
    %181 = vector.load %arg12[%c0_233, %c0_234] : memref<128x128xf32, #tpu.memory_space<vmem>>, vector<128x128xf32>
    %182 = arith.addf %181, %180 : vector<128x128xf32>
    %c0_235 = arith.constant 0 : index
    %c0_236 = arith.constant 0 : index
    %183 = vector.load %arg12[%c0_235, %c0_236] : memref<128x128xf32, #tpu.memory_space<vmem>>, vector<128x128xf32>
    tpu.vector_store %arg12[%c0_235, %c0_236], %182 {strides = array<i32>} : memref<128x128xf32, #tpu.memory_space<vmem>>, vector<128x128xf32>,
    %c0_237 = arith.constant 0 : index
    %c2_238 = arith.constant 2 : index
    %c1_239 = arith.constant 1 : index
    %c0_240 = arith.constant 0 : index
    %184 = vector.load %arg13[%c0_237, %c2_238, %c1_239, %c0_240] : memref<2x10x10x128xf32, #tpu.memory_space<vmem>>, vector<2x8x8x128xf32>
    %185 = vector.shape_cast %184 : vector<2x8x8x128xf32> to vector<128x128xf32>
    %c2_241 = arith.constant 2 : index
    %c1_242 = arith.constant 1 : index
    %c0_243 = arith.constant 0 : index
    %c0_244 = arith.constant 0 : index
    %186 = vector.load %arg5[%c2_241, %c1_242, %c0_243, %c0_244] : memref<3x3x128x128xf32, #tpu.memory_space<vmem>>, vector<1x1x128x128xf32>
    %187 = vector.shape_cast %186 : vector<1x1x128x128xf32> to vector<128x128xf32>
    %cst_245 = arith.constant dense<0.000000e+00> : vector<128x128xf32>
    %188 = tpu.matmul %185, %187, %cst_245 {dimension_numbers = #tpu.dot_dimension_numbers<[1], [0], [0], [1], [0, 0, 1, 1], [], []>} : vector<128x128xf32>, vector<128x128xf32>, vector<128x128xf32> -> vector<128x128xf32>
    %c0_246 = arith.constant 0 : index
    %c0_247 = arith.constant 0 : index
    %189 = vector.load %arg12[%c0_246, %c0_247] : memref<128x128xf32, #tpu.memory_space<vmem>>, vector<128x128xf32>
    %190 = arith.addf %189, %188 : vector<128x128xf32>
    %c0_248 = arith.constant 0 : index
    %c0_249 = arith.constant 0 : index
    %191 = vector.load %arg12[%c0_248, %c0_249] : memref<128x128xf32, #tpu.memory_space<vmem>>, vector<128x128xf32>
    tpu.vector_store %arg12[%c0_248, %c0_249], %190 {strides = array<i32>} : memref<128x128xf32, #tpu.memory_space<vmem>>, vector<128x128xf32>,
    %c0_250 = arith.constant 0 : index
    %c2_251 = arith.constant 2 : index
    %c2_252 = arith.constant 2 : index
    %c0_253 = arith.constant 0 : index
    %192 = vector.load %arg13[%c0_250, %c2_251, %c2_252, %c0_253] : memref<2x10x10x128xf32, #tpu.memory_space<vmem>>, vector<2x8x8x128xf32>
    %193 = vector.shape_cast %192 : vector<2x8x8x128xf32> to vector<128x128xf32>
    %c2_254 = arith.constant 2 : index
    %c2_255 = arith.constant 2 : index
    %c0_256 = arith.constant 0 : index
    %c0_257 = arith.constant 0 : index
    %194 = vector.load %arg5[%c2_254, %c2_255, %c0_256, %c0_257] : memref<3x3x128x128xf32, #tpu.memory_space<vmem>>, vector<1x1x128x128xf32>
    %195 = vector.shape_cast %194 : vector<1x1x128x128xf32> to vector<128x128xf32>
    %cst_258 = arith.constant dense<0.000000e+00> : vector<128x128xf32>
    %196 = tpu.matmul %193, %195, %cst_258 {dimension_numbers = #tpu.dot_dimension_numbers<[1], [0], [0], [1], [0, 0, 1, 1], [], []>} : vector<128x128xf32>, vector<128x128xf32>, vector<128x128xf32> -> vector<128x128xf32>
    %c0_259 = arith.constant 0 : index
    %c0_260 = arith.constant 0 : index
    %197 = vector.load %arg12[%c0_259, %c0_260] : memref<128x128xf32, #tpu.memory_space<vmem>>, vector<128x128xf32>
    %198 = arith.addf %197, %196 : vector<128x128xf32>
    %c0_261 = arith.constant 0 : index
    %c0_262 = arith.constant 0 : index
    %199 = vector.load %arg12[%c0_261, %c0_262] : memref<128x128xf32, #tpu.memory_space<vmem>>, vector<128x128xf32>
    tpu.vector_store %arg12[%c0_261, %c0_262], %198 {strides = array<i32>} : memref<128x128xf32, #tpu.memory_space<vmem>>, vector<128x128xf32>,
    %c0_263 = arith.constant 0 : index
    %c0_264 = arith.constant 0 : index
    %200 = vector.load %arg12[%c0_263, %c0_264] : memref<128x128xf32, #tpu.memory_space<vmem>>, vector<128x128xf32>
    %cst_265 = arith.constant dense<0.000000e+00> : vector<128xf32>
    %201 = vector.multi_reduction <add>, %200, %cst_265 [0] : vector<128x128xf32> to vector<128xf32>
    %202 = vector.shape_cast %201 : vector<128xf32> to vector<1x128xf32>
    %cst_266 = arith.constant 1.280000e+02 : f32
    %203 = vector.broadcast %cst_266 : f32 to vector<1x128xf32>
    %204 = arith.divf %202, %203 : vector<1x128xf32>
    %205 = vector.broadcast %204 : vector<1x128xf32> to vector<128x128xf32>
    %206 = arith.subf %200, %205 : vector<128x128xf32>
    %207 = arith.mulf %206, %206 : vector<128x128xf32>
    %cst_267 = arith.constant dense<0.000000e+00> : vector<128xf32>
    %208 = vector.multi_reduction <add>, %207, %cst_267 [0] : vector<128x128xf32> to vector<128xf32>
    %209 = vector.shape_cast %208 : vector<128xf32> to vector<1x128xf32>
    %cst_268 = arith.constant 1.280000e+02 : f32
    %210 = vector.broadcast %cst_268 : f32 to vector<1x128xf32>
    %211 = arith.divf %209, %210 : vector<1x128xf32>
    %c0_269 = arith.constant 0 : index
    %c0_270 = arith.constant 0 : index
    %212 = vector.load %arg6[%c0_269, %c0_270] : memref<1x128xf32, #tpu.memory_space<vmem>>, vector<1x128xf32>
    %213 = vector.broadcast %204 : vector<1x128xf32> to vector<128x128xf32>
    %214 = arith.subf %200, %213 : vector<128x128xf32>
    %215 = vector.broadcast %212 : vector<1x128xf32> to vector<128x128xf32>
    %216 = arith.mulf %215, %214 : vector<128x128xf32>
    %cst_271 = arith.constant 9.99999974E-6 : f32
    %217 = vector.broadcast %cst_271 : f32 to vector<1x128xf32>
    %218 = arith.addf %211, %217 : vector<1x128xf32>
    %219 = math.rsqrt %218 : vector<1x128xf32>
    %220 = vector.broadcast %219 : vector<1x128xf32> to vector<128x128xf32>
    %221 = arith.mulf %216, %220 : vector<128x128xf32>
    %c0_272 = arith.constant 0 : index
    %c0_273 = arith.constant 0 : index
    %222 = vector.load %arg7[%c0_272, %c0_273] : memref<1x128xf32, #tpu.memory_space<vmem>>, vector<1x128xf32>
    %223 = vector.broadcast %222 : vector<1x128xf32> to vector<128x128xf32>
    %224 = arith.addf %221, %223 : vector<128x128xf32>
    %c0_274 = arith.constant 0 : index
    %c0_275 = arith.constant 0 : index
    %225 = vector.load %arg14[%c0_274, %c0_275] : memref<128x128xf32, #tpu.memory_space<vmem>>, vector<128x128xf32>
    %226 = arith.addf %224, %225 : vector<128x128xf32>
    %cst_276 = arith.constant 0.000000e+00 : f32
    %227 = vector.broadcast %cst_276 : f32 to vector<128x128xf32>
    %228 = arith.maximumf %226, %227 : vector<128x128xf32>
    %c0_277 = arith.constant 0 : index
    %c0_278 = arith.constant 0 : index
    %229 = vector.load %arg11[%c0_277, %c0_278] : memref<128x128xf32, #tpu.memory_space<vmem>>, vector<128x128xf32>
    tpu.vector_store %arg11[%c0_277, %c0_278], %228 {strides = array<i32>} : memref<128x128xf32, #tpu.memory_space<vmem>>, vector<128x128xf32>,
    return
  }
  func.func @transform_0(%arg0: i32) -> (i32, i32, i32, i32) {
    %c0_i32 = arith.constant 0 : i32
    %c0_i32_0 = arith.constant 0 : i32
    %c0_i32_1 = arith.constant 0 : i32
    %c0_i32_2 = arith.constant 0 : i32
    %c0_i32_3 = arith.constant 0 : i32
    return %c0_i32, %c0_i32_0, %c0_i32_1, %c0_i32_2 : i32, i32, i32, i32
  }
  func.func @transform_1(%arg0: i32) -> (i32, i32, i32, i32) {
    %c0_i32 = arith.constant 0 : i32
    %c0_i32_0 = arith.constant 0 : i32
    %c0_i32_1 = arith.constant 0 : i32
    %c0_i32_2 = arith.constant 0 : i32
    %c0_i32_3 = arith.constant 0 : i32
    return %c0_i32, %c0_i32_0, %c0_i32_1, %c0_i32_2 : i32, i32, i32, i32
  }
  func.func @transform_2(%arg0: i32) -> (i32, i32) {
    %c0_i32 = arith.constant 0 : i32
    %c0_i32_0 = arith.constant 0 : i32
    %c0_i32_1 = arith.constant 0 : i32
    return %c0_i32, %c0_i32_0 : i32, i32
  }
  func.func @transform_3(%arg0: i32) -> (i32, i32) {
    %c0_i32 = arith.constant 0 : i32
    %c0_i32_0 = arith.constant 0 : i32
    %c0_i32_1 = arith.constant 0 : i32
    return %c0_i32, %c0_i32_0 : i32, i32
  }
  func.func @transform_4(%arg0: i32) -> (i32, i32, i32, i32) {
    %c0_i32 = arith.constant 0 : i32
    %c0_i32_0 = arith.constant 0 : i32
    %c0_i32_1 = arith.constant 0 : i32
    %c0_i32_2 = arith.constant 0 : i32
    %c0_i32_3 = arith.constant 0 : i32
    return %c0_i32, %c0_i32_0, %c0_i32_1, %c0_i32_2 : i32, i32, i32, i32
  }
  func.func @transform_5(%arg0: i32) -> (i32, i32) {
    %c0_i32 = arith.constant 0 : i32
    %c0_i32_0 = arith.constant 0 : i32
    %c0_i32_1 = arith.constant 0 : i32
    return %c0_i32, %c0_i32_0 : i32, i32
  }
  func.func @transform_6(%arg0: i32) -> (i32, i32) {
    %c0_i32 = arith.constant 0 : i32
    %c0_i32_0 = arith.constant 0 : i32
    %c0_i32_1 = arith.constant 0 : i32
    return %c0_i32, %c0_i32_0 : i32, i32
  }
  func.func @transform_7(%arg0: i32) -> (i32, i32) {
    %c0_i32 = arith.constant 0 : i32
    %c0_i32_0 = arith.constant 0 : i32
    %c0_i32_1 = arith.constant 0 : i32
    return %c0_i32, %c0_i32_0 : i32, i32
  }
  func.func @transform_8(%arg0: i32) -> (i32, i32) {
    %c0_i32 = arith.constant 0 : i32
    %c0_i32_0 = arith.constant 0 : i32
    %c0_i32_1 = arith.constant 0 : i32
    return %c0_i32, %c0_i32_0 : i32, i32
  }
  func.func @transform_9(%arg0: i32) -> (i32, i32) {
    %c0_i32 = arith.constant 0 : i32
    %c0_i32_0 = arith.constant 0 : i32
    %c0_i32_1 = arith.constant 0 : i32
    return %c0_i32, %c0_i32_0 : i32, i32
  }
  func.func @transform_10(%arg0: i32) -> (i32, i32) {
    %c0_i32 = arith.constant 0 : i32
    %c0_i32_0 = arith.constant 0 : i32
    %c0_i32_1 = arith.constant 0 : i32
    return %c0_i32, %c0_i32_0 : i32, i32
  }
}

</mosaic_0001>

<bundles_post_ra>
// kernel: resblock_forward.1
= control target key start
LH: loop header
LB: loop body
LE: loop exit
PB: predicated region body
PF: predicated region fallthrough
CT: control target
= control target key end

     0   :  { %s10138_s0 = inlined_call_operand.vmem [shape: f32[8,9,9,128], index: 0, kind: input, shape index: {}]   ;;  %s10139_s1 = inlined_call_operand.vmem [shape: f32[3,3,128,128], index: 1, kind: input, shape index: {}]   ;;  %s10140_s2 = inlined_call_operand.vmem [shape: f32[1,128], index: 2, kind: input, shape index: {}]   ;;  %s10141_s3 = inlined_call_operand.vmem [shape: f32[1,128], index: 3, kind: input, shape index: {}]   ;;  %s10142_s4 = inlined_call_operand.vmem [shape: f32[3,3,128,128], index: 4, kind: input, shape index: {}]   ;;  %s10143_s5 = inlined_call_operand.vmem [shape: f32[1,128], index: 5, kind: input, shape index: {}]   ;;  %s10144_s6 = inlined_call_operand.vmem [shape: f32[1,128], index: 6, kind: input, shape index: {}]   ;;  %s10145_s7 = inlined_call_operand.vmem [shape: f32[128,128], index: 7, kind: input, shape index: {}]   ;;  %s10146_s8 = inlined_call_operand.vmem [shape: f32[1,128], index: 8, kind: input, shape index: {}]   ;;  %s10147_s9 = inlined_call_operand.vmem [shape: f32[1,128], index: 9, kind: input, shape index: {}]   ;;  %s10148_s10 = inlined_call_operand.hbm [shape: f32[128,128], index: 10, kind: output, shape index: {}]  }
   0x1   :  { %v387_v0 = vld [vmem:[%s10139_s1] sm:$0xff]  ;;  %v388_v1 = vld [vmem:[%s10139_s1 + $0x8] sm:$0xff]  ;;  %v389_v2 = vld [vmem:[%s10139_s1 + $0x10] sm:$0xff] }
   0x2   :  { %v6937_v3 = vpack.c.bf16 %v388_v1, %v387_v0  ;;  %v390_v4 = vld [vmem:[%s10139_s1 + $0x18] sm:$0xff]  ;;  %v391_v6 = vld [vmem:[%s10139_s1 + $0x20] sm:$0xff]  ;;  %v392_v7 = vld [vmem:[%s10139_s1 + $0x28] sm:$0xff] }
   0x3   :  { %v6941_v5 = vpack.c.bf16 %v390_v4, %v389_v2  ;;  %v6945_v8 = vpack.c.bf16 %v392_v7, %v391_v6  ;;  %v371_v9 = vld [vmem:[%s10138_s0] sm:$0xff]  ;;  %v393_v10 = vld [vmem:[%s10139_s1 + $0x30] sm:$0xff]  ;;  %v394_v11 = vld [vmem:[%s10139_s1 + $0x38] sm:$0xff] }
   0x4   :  { %6938 = vmatprep.subr.bf16.mxu1 %v6937_v3  ;;  %5929 = vmatprep.mubr.f32.mxu1 %v371_v9  ;;  %v6949_v12 = vpack.c.bf16 %v394_v11, %v393_v10  ;;  %v395_v13 = vld [vmem:[%s10139_s1 + $0x40] sm:$0xff]  ;;  %v396_v14 = vld [vmem:[%s10139_s1 + $0x48] sm:$0xff]  ;;  %v397_v16 = vld [vmem:[%s10139_s1 + $0x50] sm:$0xff] }
   0x5   :  { %6940 = vmatpush3.bf16.msra.mxu1 %v6937_v3  ;;  %v6953_v15 = vpack.c.bf16 %v396_v14, %v395_v13  ;;  %v398_v17 = vld [vmem:[%s10139_s1 + $0x58] sm:$0xff]  ;;  %v399_v19 = vld [vmem:[%s10139_s1 + $0x60] sm:$0xff]  ;;  %v400_v20 = vld [vmem:[%s10139_s1 + $0x68] sm:$0xff] }
   0x6   :  { %6942 = vmatprep.subr.bf16.mxu1 %v6941_v5  ;;  %v6957_v18 = vpack.c.bf16 %v398_v17, %v397_v16  ;;  %v6961_v21 = vpack.c.bf16 %v400_v20, %v399_v19  ;;  %v401_v22 = vld [vmem:[%s10139_s1 + $0x70] sm:$0xff]  ;;  %v402_v23 = vld [vmem:[%s10139_s1 + $0x78] sm:$0xff]  ;;  %v4877_v25 = vld [vmem:[%s10139_s1 + $0x80] sm:$0xff] }
   0x7   :  { %v6965_v24 = vpack.c.bf16 %v402_v23, %v401_v22  ;;  %v4878_v26 = vld [vmem:[%s10139_s1 + $0x88] sm:$0xff]  ;;  %v4879_v28 = vld [vmem:[%s10139_s1 + $0x90] sm:$0xff]  ;;  %v4880_v29 = vld [vmem:[%s10139_s1 + $0x98] sm:$0xff] }
   0x8   :  { %v6969_v27 = vpack.c.bf16 %v4878_v26, %v4877_v25  ;;  %v7945_v30 = vld [vmem:[%s10138_s0 + $0x10] sm:$0xff]  ;;  %v7950_v31 = vld [vmem:[%s10138_s0 + $0x20] sm:$0xff]  ;;  %v6973_v32 = vpack.c.bf16 %v4880_v29, %v4879_v28  ;;  %v4882_v34 = vld [vmem:[%s10139_s1 + $0xa8] sm:$0xff] }
   0x9   :  { %6944 = vmatpush3.bf16.msra.mxu1 %v6941_v5  ;;  %v4881_v33 = vld [vmem:[%s10139_s1 + $0xa0] sm:$0xff]  ;;  %v7963_v35 = vld [vmem:[%s10138_s0 + $0x30] sm:$0xff]  ;;  %v4884_v39 = vld [vmem:[%s10139_s1 + $0xb8] sm:$0xff] }
   0xa   :  { %6946 = vmatprep.subr.bf16.mxu1 %v6945_v8  ;;  %v7968_v36 = vld [vmem:[%s10138_s0 + $0x40] sm:$0xff]  ;;  %v6977_v37 = vpack.c.bf16 %v4882_v34, %v4881_v33  ;;  %v4883_v38 = vld [vmem:[%s10139_s1 + $0xb0] sm:$0xff]  ;;  %v4886_v44 = vld [vmem:[%s10139_s1 + $0xc8] sm:$0xff] }
   0xb   :  { %v7981_v40 = vld [vmem:[%s10138_s0 + $0x50] sm:$0xff]  ;;  %v7986_v41 = vld [vmem:[%s10138_s0 + $0x60] sm:$0xff]  ;;  %v6981_v42 = vpack.c.bf16 %v4884_v39, %v4883_v38  ;;  %v4888_v49 = vld [vmem:[%s10139_s1 + $0xd8] sm:$0xff] }
   0xc   :  { %v4885_v43 = vld [vmem:[%s10139_s1 + $0xc0] sm:$0xff]  ;;  %v7999_v45 = vld [vmem:[%s10138_s0 + $0x70] sm:$0xff]  ;;  %v4890_v55 = vld [vmem:[%s10139_s1 + $0xe8] sm:$0xff] }
   0xd   :  { %6948 = vmatpush3.bf16.msra.mxu1 %v6945_v8  ;;  %v379_v46 = vld [vmem:[%s10138_s0 + $0x90] sm:$0xff]  ;;  %v6985_v47 = vpack.c.bf16 %v4886_v44, %v4885_v43  ;;  %v8014_v50 = vld [vmem:[%s10138_s0 + $0xa0] sm:$0xff]  ;;  %v4892_v60 = vld [vmem:[%s10139_s1 + $0xf8] sm:$0xff] }
   0xe   :  { %6950 = vmatprep.subr.bf16.mxu1 %v6949_v12  ;;  %v4887_v48 = vld [vmem:[%s10139_s1 + $0xd0] sm:$0xff]  ;;  %v8019_v51 = vld [vmem:[%s10138_s0 + $0x360] sm:$0xff] }
   0xf   :  { %v8024_v52 = vld [vmem:[%s10138_s0 + $0xb0] sm:$0xff]  ;;  %v6989_v53 = vpack.c.bf16 %v4888_v49, %v4887_v48  ;;  %5873 = vmatprep.mubr.f32.mxu0 %v8019_v51  ;;  %v4889_v54 = vld [vmem:[%s10139_s1 + $0xe0] sm:$0xff] }
  0x10   :  { %v8038_v56 = vld [vmem:[%s10138_s0 + $0xc0] sm:$0xff]  ;;  %v8043_v57 = vld [vmem:[%s10138_s0 + $0xd0] sm:$0xff]  ;;  %v6993_v58 = vpack.c.bf16 %v4890_v55, %v4889_v54 }
  0x11   :  { %6952 = vmatpush3.bf16.msra.mxu1 %v6949_v12  ;;  %v4891_v59 = vld [vmem:[%s10139_s1 + $0xf0] sm:$0xff]  ;;  %v8056_v61 = vld [vmem:[%s10138_s0 + $0xe0] sm:$0xff] }
  0x12   :  { %6954 = vmatprep.subr.bf16.mxu1 %v6953_v15  ;;  %v8061_v62 = vld [vmem:[%s10138_s0 + $0xf0] sm:$0xff]  ;;  %v6997_v63 = vpack.c.bf16 %v4892_v60, %v4891_v59 }
  0x15   :  { %6956 = vmatpush3.bf16.msra.mxu1 %v6953_v15 }
  0x16   :  { %6958 = vmatprep.subr.bf16.mxu1 %v6957_v18 }
  0x19   :  { %6960 = vmatpush3.bf16.msra.mxu1 %v6957_v18 }
  0x1a   :  { %6962 = vmatprep.subr.bf16.mxu1 %v6961_v21 }
  0x1d   :  { %6964 = vmatpush3.bf16.msra.mxu1 %v6961_v21 }
  0x1e   :  { %6966 = vmatprep.subr.bf16.mxu1 %v6965_v24 }
  0x21   :  { %6968 = vmatpush3.bf16.msra.mxu1 %v6965_v24 }
  0x22   :  { %6970 = vmatprep.subr.bf16.mxu1 %v6969_v27 }
  0x24   :  { %5930 = vmatmul.mubr.f32.vlgmr.msra.gmra.mrb[0].mxu1 %v7945_v30 }
  0x25   :  { %6972 = vmatpush3.bf16.msra.mxu1 %v6969_v27  ;;  %5932 = vmatprep.mubr.f32.mxu1 %v7950_v31 }
  0x26   :  { %6974 = vmatprep.subr.bf16.mxu1 %v6973_v32 }
  0x28   :  { %5933 = vmatmul.mubr.f32.gmra.mrb[2].mxu1 %v7963_v35 }
  0x29   :  { %6976 = vmatpush3.bf16.msra.mxu1 %v6973_v32  ;;  %5935 = vmatprep.mubr.f32.mxu1 %v7968_v36 }
  0x2a   :  { %6978 = vmatprep.subr.bf16.mxu1 %v6977_v37 }
  0x2c   :  { %5936 = vmatmul.mubr.f32.gmra.mrb[4].mxu1 %v7981_v40 }
  0x2d   :  { %6980 = vmatpush3.bf16.msra.mxu1 %v6977_v37  ;;  %5938 = vmatprep.mubr.f32.mxu1 %v7986_v41 }
  0x2e   :  { %6982 = vmatprep.subr.bf16.mxu1 %v6981_v42 }
  0x30   :  { %5939 = vmatmul.mubr.f32.gmra.mrb[6].mxu1 %v7999_v45 }
  0x31   :  { %6984 = vmatpush3.bf16.msra.mxu1 %v6981_v42  ;;  %5941 = vmatprep.mubr.f32.mxu1 %v379_v46 }
  0x32   :  { %6986 = vmatprep.subr.bf16.mxu1 %v6985_v47 }
  0x34   :  { %5942 = vmatmul.mubr.f32.gmra.mrb[8].mxu1 %v8014_v50 }
  0x35   :  { %6988 = vmatpush3.bf16.msra.mxu1 %v6985_v47  ;;  %5944 = vmatprep.mubr.f32.mxu1 %v8024_v52 }
  0x36   :  { %6990 = vmatprep.subr.bf16.mxu1 %v6989_v53 }
  0x38   :  { %5945 = vmatmul.mubr.f32.gmra.mrb[10].mxu1 %v8038_v56 }
  0x39   :  { %6992 = vmatpush3.bf16.msra.mxu1 %v6989_v53  ;;  %5947 = vmatprep.mubr.f32.mxu1 %v8043_v57 }
  0x3a   :  { %6994 = vmatprep.subr.bf16.mxu1 %v6993_v58 }
  0x3b   :  { %15 = vsyncpa [#allocation6], 0  ;;  %v4893_v0 = vld [vmem:[%s10139_s1 + $0x100] sm:$0xff]  ;;  %v4894_v1 = vld [vmem:[%s10139_s1 + $0x108] sm:$0xff] }
  0x3c   :  { %5948 = vmatmul.mubr.f32.gmra.mrb[12].mxu1 %v8056_v61  ;;  %v8074_v2 = vld [vmem:[%s10138_s0 + $0x100] sm:$0xff]  ;;  %v7001_v4 = vpack.c.bf16 %v4894_v1, %v4893_v0  ;;  %v4895_v5 = vld [vmem:[%s10139_s1 + $0x110] sm:$0xff]  ;;  %v4896_v6 = vld [vmem:[%s10139_s1 + $0x118] sm:$0xff] }
  0x3d   :  { %6996 = vmatpush3.bf16.msra.mxu1 %v6993_v58  ;;  %5950 = vmatprep.mubr.f32.mxu1 %v8061_v62  ;;  %v4861_v3 = vld [vmem:[%s10138_s0 + $0x120] sm:$0xff]  ;;  %v8089_v7 = vld [vmem:[%s10138_s0 + $0x130] sm:$0xff]  ;;  %v7005_v9 = vpack.c.bf16 %v4896_v6, %v4895_v5  ;;  %v4898_v11 = vld [vmem:[%s10139_s1 + $0x128] sm:$0xff] }
  0x3e   :  { %6998 = vmatprep.subr.bf16.mxu1 %v6997_v63  ;;  %v8094_v8 = vld [vmem:[%s10138_s0 + $0x140] sm:$0xff]  ;;  %v8107_v12 = vld [vmem:[%s10138_s0 + $0x150] sm:$0xff]  ;;  %v4900_v16 = vld [vmem:[%s10139_s1 + $0x138] sm:$0xff] }
  0x3f   :  { %v4897_v10 = vld [vmem:[%s10139_s1 + $0x120] sm:$0xff]  ;;  %v4899_v15 = vld [vmem:[%s10139_s1 + $0x130] sm:$0xff]  ;;  %v4902_v21 = vld [vmem:[%s10139_s1 + $0x148] sm:$0xff] }
  0x40   :  { %5951 = vmatmul.mubr.f32.gmra.mrb[14].mxu1 %v8074_v2  ;;  %v8112_v13 = vld [vmem:[%s10138_s0 + $0x160] sm:$0xff]  ;;  %v7009_v14 = vpack.c.bf16 %v4898_v11, %v4897_v10  ;;  %v8125_v17 = vld [vmem:[%s10138_s0 + $0x170] sm:$0xff]  ;;  %v7013_v19 = vpack.c.bf16 %v4900_v16, %v4899_v15  ;;  %v4904_v26 = vld [vmem:[%s10139_s1 + $0x158] sm:$0xff] }
  0x41   :  { %7000 = vmatpush3.bf16.msra.mxu1 %v6997_v63  ;;  %5985 = vmatprep.mubr.f32.mxu1 %v4861_v3  ;;  %v8130_v18 = vld [vmem:[%s10138_s0 + $0x180] sm:$0xff]  ;;  %v8143_v22 = vld [vmem:[%s10138_s0 + $0x190] sm:$0xff]  ;;  %v4906_v33 = vld [vmem:[%s10139_s1 + $0x168] sm:$0xff] }
  0x42   :  { %7002 = vmatprep.subr.bf16.mxu1 %v7001_v4  ;;  %v4901_v20 = vld [vmem:[%s10139_s1 + $0x140] sm:$0xff]  ;;  %v4869_v23 = vld [vmem:[%s10138_s0 + $0x1b0] sm:$0xff]  ;;  %v4908_v42 = vld [vmem:[%s10139_s1 + $0x178] sm:$0xff] }
  0x43   :  { %v7017_v24 = vpack.c.bf16 %v4902_v21, %v4901_v20  ;;  %v4903_v25 = vld [vmem:[%s10139_s1 + $0x150] sm:$0xff]  ;;  %v8158_v27 = vld [vmem:[%s10138_s0 + $0x1c0] sm:$0xff]  ;;  %v4926_v48 = vld [vmem:[%s10139_s1 + $0x188] sm:$0xff] }
  0x44   :  { %5986 = vmatmul.mubr.f32.vlgmr.msra.gmra.mrb[0].mxu1 %v8089_v7  ;;  %v8163_v28 = vld [vmem:[%s10138_s0 + $0x1d0] sm:$0xff]  ;;  %v7021_v29 = vpack.c.bf16 %v4904_v26, %v4903_v25  ;;  %v4905_v32 = vld [vmem:[%s10139_s1 + $0x160] sm:$0xff]  ;;  %v4928_v58 = vld [vmem:[%s10139_s1 + $0x198] sm:$0xff] }
  0x45   :  { %7004 = vmatpush3.bf16.msra.mxu1 %v7001_v4  ;;  %5988 = vmatprep.mubr.f32.mxu1 %v8094_v8  ;;  %v8176_v34 = vld [vmem:[%s10138_s0 + $0x1e0] sm:$0xff]  ;;  %v8181_v37 = vld [vmem:[%s10138_s0 + $0x1f0] sm:$0xff]  ;;  %v7025_v38 = vpack.c.bf16 %v4906_v33, %v4905_v32  ;;  %v4930_v1 = vld [vmem:[%s10139_s1 + $0x1a8] sm:$0xff] }
  0x46   :  { %7006 = vmatprep.subr.bf16.mxu1 %v7005_v9  ;;  %v4907_v39 = vld [vmem:[%s10139_s1 + $0x170] sm:$0xff]  ;;  %v8194_v43 = vld [vmem:[%s10138_s0 + $0x200] sm:$0xff]  ;;  %v4934_v16 = vld [vmem:[%s10139_s1 + $0x1c8] sm:$0xff] }
  0x47   :  { %v8199_v44 = vld [vmem:[%s10138_s0 + $0x210] sm:$0xff]  ;;  %v7029_v46 = vpack.c.bf16 %v4908_v42, %v4907_v39  ;;  %v4925_v47 = vld [vmem:[%s10139_s1 + $0x180] sm:$0xff]  ;;  %v4938_v33 = vld [vmem:[%s10139_s1 + $0x1e8] sm:$0xff] }
  0x48   :  { %5989 = vmatmul.mubr.f32.gmra.mrb[2].mxu1 %v8107_v12  ;;  %v8212_v49 = vld [vmem:[%s10138_s0 + $0x220] sm:$0xff]  ;;  %v7033_v54 = vpack.c.bf16 %v4926_v48, %v4925_v47  ;;  %v4927_v55 = vld [vmem:[%s10139_s1 + $0x190] sm:$0xff]  ;;  %v4940_v47 = vld [vmem:[%s10139_s1 + $0x1f8] sm:$0xff] }
  0x49   :  { %7008 = vmatpush3.bf16.msra.mxu1 %v7005_v9  ;;  %5991 = vmatprep.mubr.f32.mxu1 %v8112_v13  ;;  %v791_v53 = vld [vmem:[%s10138_s0 + $0x1] sm:$0xff]  ;;  %v8227_v59 = vld [vmem:[%s10138_s0 + $0x11] sm:$0xff]  ;;  %v7037_v63 = vpack.c.bf16 %v4928_v58, %v4927_v55 }
  0x4a   :  { %7010 = vmatprep.subr.bf16.mxu1 %v7009_v14  ;;  %v8232_v60 = vld [vmem:[%s10138_s0 + $0x21] sm:$0xff]  ;;  %v8245_v3 = vld [vmem:[%s10138_s0 + $0x31] sm:$0xff] }
  0x4b   :  { %v4929_v0 = vld [vmem:[%s10139_s1 + $0x1a0] sm:$0xff]  ;;  %v4931_v6 = vld [vmem:[%s10139_s1 + $0x1b0] sm:$0xff]  ;;  %v4932_v9 = vld [vmem:[%s10139_s1 + $0x1b8] sm:$0xff] }
  0x4c   :  { %5992 = vmatmul.mubr.f32.gmra.mrb[4].mxu1 %v8125_v17  ;;  %v8250_v4 = vld [vmem:[%s10138_s0 + $0x41] sm:$0xff]  ;;  %v7041_v5 = vpack.c.bf16 %v4930_v1, %v4929_v0  ;;  %v8263_v10 = vld [vmem:[%s10138_s0 + $0x51] sm:$0xff] }
  0x4d   :  { %7012 = vmatpush3.bf16.msra.mxu1 %v7009_v14  ;;  %5994 = vmatprep.mubr.f32.mxu1 %v8130_v18  ;;  %v8268_v11 = vld [vmem:[%s10138_s0 + $0x61] sm:$0xff]  ;;  %v7045_v14 = vpack.c.bf16 %v4932_v9, %v4931_v6  ;;  %v799_v20 = vld [vmem:[%s10138_s0 + $0x91] sm:$0xff] }
  0x4e   :  { %7014 = vmatprep.subr.bf16.mxu1 %v7013_v19  ;;  %v4933_v15 = vld [vmem:[%s10139_s1 + $0x1c0] sm:$0xff]  ;;  %v8301_v26 = vld [vmem:[%s10138_s0 + $0xb1] sm:$0xff]  ;;  %v4958_v58 = vld [vmem:[%s10139_s1 + $0x208] sm:$0xff] }
  0x4f   :  { %v7049_v21 = vpack.c.bf16 %v4934_v16, %v4933_v15  ;;  %v8296_v25 = vld [vmem:[%s10138_s0 + $0xa1] sm:$0xff]  ;;  %10187 = vst [vmem:[#allocation10_spill] sm:$0xff] %v8301_v26  ;;  %v8319_v39 = vld [vmem:[%s10138_s0 + $0xd1] sm:$0xff] }
  0x50   :  { %5995 = vmatmul.mubr.f32.gmra.mrb[6].mxu1 %v8143_v22  ;;  %10186 = vst [vmem:[#allocation9_spill] sm:$0xff] %v8296_v25  ;;  %v4937_v32 = vld [vmem:[%s10139_s1 + $0x1e0] sm:$0xff]  ;;  %10189 = vst [vmem:[#allocation12_spill] sm:$0xff] %v8319_v39  ;;  %v4960_v6 = vld [vmem:[%s10139_s1 + $0x218] sm:$0xff] }
  0x51   :  { %7016 = vmatpush3.bf16.msra.mxu1 %v7013_v19  ;;  %5997 = vmatprep.mubr.f32.mxu1 %v4869_v23  ;;  %v8281_v19 = vld [vmem:[%s10138_s0 + $0x71] sm:$0xff]  ;;  %v7057_v42 = vpack.c.bf16 %v4938_v33, %v4937_v32  ;;  %v8332_v48 = vld [vmem:[%s10138_s0 + $0xe1] sm:$0xff] }
  0x52   :  { %7018 = vmatprep.subr.bf16.mxu1 %v7017_v24  ;;  %10185 = vst [vmem:[#allocation8_spill] sm:$0xff] %v8281_v19  ;;  %v4935_v23 = vld [vmem:[%s10139_s1 + $0x1d0] sm:$0xff]  ;;  %10190 = vst [vmem:[#allocation13_spill] sm:$0xff] %v8332_v48  ;;  %v4957_v55 = vld [vmem:[%s10139_s1 + $0x200] sm:$0xff] }
  0x53   :  { %v4909_v0 = vld [vmem:[%s10138_s0 + $0x240] sm:$0xff]  ;;  %v7065_v1 = vpack.c.bf16 %v4958_v58, %v4957_v55  ;;  %v4910_v9 = vld [vmem:[%s10138_s0 + $0x250] sm:$0xff]  ;;  %v4964_v32 = vld [vmem:[%s10139_s1 + $0x238] sm:$0xff] }
  0x54   :  { %5998 = vmatmul.mubr.f32.gmra.mrb[8].mxu1 %v8158_v27  ;;  %v4961_v16 = vld [vmem:[%s10139_s1 + $0x220] sm:$0xff]  ;;  %v4914_v33 = vld [vmem:[%s10138_s0 + $0x290] sm:$0xff] }
  0x55   :  { %7020 = vmatpush3.bf16.msra.mxu1 %v7017_v24  ;;  %6000 = vmatprep.mubr.f32.mxu1 %v8163_v28  ;;  %v4936_v24 = vld [vmem:[%s10139_s1 + $0x1d8] sm:$0xff]  ;;  %v4916_v55 = vld [vmem:[%s10138_s0 + $0x2b0] sm:$0xff] }
  0x56   :  { %7022 = vmatprep.subr.bf16.mxu1 %v7021_v29  ;;  %v4917_v58 = vld [vmem:[%s10138_s0 + $0x2d0] sm:$0xff] }
  0x58   :  { %6001 = vmatmul.mubr.f32.gmra.mrb[10].mxu1 %v8176_v34 }
  0x59   :  { %7024 = vmatpush3.bf16.msra.mxu1 %v7021_v29  ;;  %6003 = vmatprep.mubr.f32.mxu1 %v8181_v37  ;;  %v7053_v29 = vpack.c.bf16 %v4936_v24, %v4935_v23  ;;  %v4913_v23 = vld [vmem:[%s10138_s0 + $0x280] sm:$0xff] }
  0x5a   :  { %7026 = vmatprep.subr.bf16.mxu1 %v7025_v38 }
  0x5c   :  { %6004 = vmatmul.mubr.f32.gmra.mrb[12].mxu1 %v8194_v43 }
  0x5d   :  { %7028 = vmatpush3.bf16.msra.mxu1 %v7025_v38  ;;  %6006 = vmatprep.mubr.f32.mxu1 %v8199_v44  ;;  %v8314_v38 = vld [vmem:[%s10138_s0 + $0xc1] sm:$0xff] }
  0x5e   :  { %7030 = vmatprep.subr.bf16.mxu1 %v7029_v46  ;;  %10188 = vst [vmem:[#allocation11_spill] sm:$0xff] %v8314_v38 }
  0x60   :  { %6007 = vmatmul.mubr.f32.gmra.mrb[14].mxu1 %v8212_v49 }
  0x61   :  { %7032 = vmatpush3.bf16.msra.mxu1 %v7029_v46  ;;  %6041 = vmatprep.mubr.f32.mxu1 %v791_v53  ;;  %v4939_v46 = vld [vmem:[%s10139_s1 + $0x1f0] sm:$0xff] }
  0x62   :  { %7034 = vmatprep.subr.bf16.mxu1 %v7033_v54  ;;  %v8337_v53 = vld [vmem:[%s10138_s0 + $0xf1] sm:$0xff] }
  0x63   :  { %10191 = vst [vmem:[#allocation14_spill] sm:$0xff] %v8337_v53 }
  0x64   :  { %6042 = vmatmul.mubr.f32.vlgmr.msra.gmra.mrb[0].mxu1 %v8227_v59 }
  0x65   :  { %7036 = vmatpush3.bf16.msra.mxu1 %v7033_v54  ;;  %6044 = vmatprep.mubr.f32.mxu1 %v8232_v60  ;;  %v7061_v54 = vpack.c.bf16 %v4940_v47, %v4939_v46  ;;  %v4965_v47 = vld [vmem:[%s10139_s1 + $0x240] sm:$0xff] }
  0x66   :  { %7038 = vmatprep.subr.bf16.mxu1 %v7037_v63 }
  0x68   :  { %6045 = vmatmul.mubr.f32.gmra.mrb[2].mxu1 %v8245_v3 }
  0x69   :  { %7040 = vmatpush3.bf16.msra.mxu1 %v7037_v63  ;;  %6047 = vmatprep.mubr.f32.mxu1 %v8250_v4  ;;  %v8350_v63 = vld [vmem:[%s10138_s0 + $0x101] sm:$0xff] }
  0x6a   :  { %7042 = vmatprep.subr.bf16.mxu1 %v7041_v5  ;;  %10192 = vst [vmem:[#allocation15_spill] sm:$0xff] %v8350_v63 }
  0x6c   :  { %6048 = vmatmul.mubr.f32.gmra.mrb[4].mxu1 %v8263_v10 }
  0x6d   :  { %7044 = vmatpush3.bf16.msra.mxu1 %v7041_v5  ;;  %6050 = vmatprep.mubr.f32.mxu1 %v8268_v11  ;;  %v4959_v5 = vld [vmem:[%s10139_s1 + $0x210] sm:$0xff] }
  0x6e   :  { %7046 = vmatprep.subr.bf16.mxu1 %v7045_v14  ;;  %v7069_v15 = vpack.c.bf16 %v4960_v6, %v4959_v5  ;;  %v4968_v5 = vld [vmem:[%s10139_s1 + $0x258] sm:$0xff]  ;;  %v4918_v6 = vld [vmem:[%s10138_s0 + $0x2e0] sm:$0xff] }
  0x70   :  { %6051 = vmatmul.mubr.f32.gmra.mrb[6].mxu1 %v8281_v19 }
  0x71   :  { %7048 = vmatpush3.bf16.msra.mxu1 %v7045_v14  ;;  %6053 = vmatprep.mubr.f32.mxu1 %v799_v20  ;;  %v4911_v14 = vld [vmem:[%s10138_s0 + $0x260] sm:$0xff]  ;;  %v4962_v20 = vld [vmem:[%s10139_s1 + $0x228] sm:$0xff] }
  0x72   :  { %7050 = vmatprep.subr.bf16.mxu1 %v7049_v21  ;;  %v7073_v24 = vpack.c.bf16 %v4962_v20, %v4961_v16  ;;  %v4970_v16 = vld [vmem:[%s10139_s1 + $0x268] sm:$0xff]  ;;  %v4920_v20 = vld [vmem:[%s10138_s0 + $0x300] sm:$0xff] }
  0x74   :  { %6054 = vmatmul.mubr.f32.gmra.mrb[8].mxu1 %v8296_v25  ;;  %v5026_v25 = vld [vmem:[%s10139_s1 + $0x328] sm:$0xff] }
  0x75   :  { %7052 = vmatpush3.bf16.msra.mxu1 %v7049_v21  ;;  %6056 = vmatprep.mubr.f32.mxu1 %v8301_v26  ;;  %v4912_v21 = vld [vmem:[%s10138_s0 + $0x270] sm:$0xff] }
  0x76   :  { %7054 = vmatprep.subr.bf16.mxu1 %v7053_v29 }
  0x78   :  { %6057 = vmatmul.mubr.f32.gmra.mrb[10].mxu1 %v8314_v38  ;;  %v4975_v38 = vld [vmem:[%s10138_s0 + $0x261] sm:$0xff] }
  0x79   :  { %7056 = vmatpush3.bf16.msra.mxu1 %v7053_v29  ;;  %6059 = vmatprep.mubr.f32.mxu1 %v8319_v39  ;;  %v4963_v29 = vld [vmem:[%s10139_s1 + $0x230] sm:$0xff]  ;;  %v56_v39 = vld [vmem:[%s10145_s7 + $0x18] sm:$0xff] }
  0x7a   :  { %7058 = vmatprep.subr.bf16.mxu1 %v7057_v42  ;;  %v7077_v46 = vpack.c.bf16 %v4964_v32, %v4963_v29  ;;  %v4972_v29 = vld [vmem:[%s10139_s1 + $0x278] sm:$0xff]  ;;  %v4922_v32 = vld [vmem:[%s10138_s0 + $0x320] sm:$0xff] }
  0x7c   :  { %6060 = vmatmul.mubr.f32.gmra.mrb[12].mxu1 %v8332_v48 }
  0x7d   :  { %7060 = vmatpush3.bf16.msra.mxu1 %v7057_v42  ;;  %6062 = vmatprep.mubr.f32.mxu1 %v8337_v53  ;;  %v4915_v42 = vld [vmem:[%s10138_s0 + $0x2a0] sm:$0xff]  ;;  %v54_v53 = vld [vmem:[%s10145_s7 + $0x8] sm:$0xff] }
  0x7e   :  { %7062 = vmatprep.subr.bf16.mxu1 %v7061_v54 }
  0x80   :  { %6063 = vmatmul.mubr.f32.gmra.mrb[14].mxu1 %v8350_v63  ;;  %v53_v63 = vld [vmem:[%s10145_s7] sm:$0xff] }
  0x81   :  { %7064 = vmatpush3.bf16.msra.mxu1 %v7061_v54  ;;  %6097 = vmatprep.mubr.f32.mxu1 %v4909_v0  ;;  %v4966_v54 = vld [vmem:[%s10139_s1 + $0x248] sm:$0xff]  ;;  %v6905_v48 = vpack.c.bf16 %v54_v53, %v53_v63  ;;  %v57_v53 = vld [vmem:[%s10145_s7 + $0x20] sm:$0xff] }
  0x82   :  { %7066 = vmatprep.subr.bf16.mxu1 %v7065_v1  ;;  %v7081_v0 = vpack.c.bf16 %v4966_v54, %v4965_v47  ;;  %v4990_v47 = vld [vmem:[%s10139_s1 + $0x288] sm:$0xff]  ;;  %v4924_v54 = vld [vmem:[%s10138_s0 + $0x340] sm:$0xff] }
  0x83   :  { %6906 = vmatprep.subr.bf16.mxu0 %v6905_v48  ;;  %v58_v63 = vld [vmem:[%s10145_s7 + $0x28] sm:$0xff] }
  0x84   :  { %6098 = vmatmul.mubr.f32.vlgmr.msra.gmra.mrb[0].mxu1 %v4910_v9  ;;  %v4919_v9 = vld [vmem:[%s10138_s0 + $0x2f0] sm:$0xff]  ;;  %6908 = vmatpush3.bf16.msra.mxu0 %v6905_v48  ;;  %v6913_v19 = vpack.c.bf16 %v58_v63, %v57_v53  ;;  %v5029_v53 = vld [vmem:[%s10139_s1 + $0x340] sm:$0xff] }
  0x85   :  { %7068 = vmatpush3.bf16.msra.mxu1 %v7065_v1  ;;  %6100 = vmatprep.mubr.f32.mxu1 %v4911_v14  ;;  %v4967_v1 = vld [vmem:[%s10139_s1 + $0x250] sm:$0xff] }
  0x86   :  { %7070 = vmatprep.subr.bf16.mxu1 %v7069_v15  ;;  %v7085_v14 = vpack.c.bf16 %v4968_v5, %v4967_v1  ;;  %v8459_v1 = vld [vmem:[%s10138_s0 + $0x370] sm:$0xff]  ;;  %v8464_v5 = vld [vmem:[%s10138_s0 + $0x380] sm:$0xff] }
  0x87   :  { %v59_v48 = vld [vmem:[%s10145_s7 + $0x30] sm:$0xff] }
  0x88   :  { %6101 = vmatmul.mubr.f32.gmra.mrb[2].mxu1 %v4912_v21  ;;  %v4921_v21 = vld [vmem:[%s10138_s0 + $0x310] sm:$0xff] }
  0x89   :  { %7072 = vmatpush3.bf16.msra.mxu1 %v7069_v15  ;;  %6103 = vmatprep.mubr.f32.mxu1 %v4913_v23  ;;  %v4969_v15 = vld [vmem:[%s10139_s1 + $0x260] sm:$0xff] }
  0x8a   :  { %7074 = vmatprep.subr.bf16.mxu1 %v7073_v24  ;;  %v7089_v23 = vpack.c.bf16 %v4970_v16, %v4969_v15  ;;  %v8482_v15 = vld [vmem:[%s10138_s0 + $0x3a0] sm:$0xff] }
  0x8c   :  { %6104 = vmatmul.mubr.f32.gmra.mrb[4].mxu1 %v4914_v33  ;;  %v4923_v33 = vld [vmem:[%s10138_s0 + $0x330] sm:$0xff] }
  0x8d   :  { %7076 = vmatpush3.bf16.msra.mxu1 %v7073_v24  ;;  %6106 = vmatprep.mubr.f32.mxu1 %v4915_v42  ;;  %v4971_v24 = vld [vmem:[%s10139_s1 + $0x270] sm:$0xff] }
  0x8e   :  { %7078 = vmatprep.subr.bf16.mxu1 %v7077_v46  ;;  %v7093_v42 = vpack.c.bf16 %v4972_v29, %v4971_v24  ;;  %v8500_v24 = vld [vmem:[%s10138_s0 + $0x3c0] sm:$0xff] }
  0x90   :  { %6107 = vmatmul.mubr.f32.gmra.mrb[6].mxu1 %v4916_v55 }
  0x91   :  { %7080 = vmatpush3.bf16.msra.mxu1 %v7077_v46  ;;  %6109 = vmatprep.mubr.f32.mxu1 %v4917_v58  ;;  %v4989_v46 = vld [vmem:[%s10139_s1 + $0x280] sm:$0xff]  ;;  %v4991_v58 = vld [vmem:[%s10139_s1 + $0x290] sm:$0xff] }
  0x92   :  { %7082 = vmatprep.subr.bf16.mxu1 %v7081_v0  ;;  %v7097_v55 = vpack.c.bf16 %v4990_v47, %v4989_v46  ;;  %v8518_v46 = vld [vmem:[%s10138_s0 + $0x3f0] sm:$0xff] }
  0x94   :  { %6110 = vmatmul.mubr.f32.gmra.mrb[8].mxu1 %v4918_v6 }
  0x95   :  { %7084 = vmatpush3.bf16.msra.mxu1 %v7081_v0  ;;  %6112 = vmatprep.mubr.f32.mxu1 %v4919_v9  ;;  %v4992_v0 = vld [vmem:[%s10139_s1 + $0x298] sm:$0xff]  ;;  %v4993_v9 = vld [vmem:[%s10139_s1 + $0x2a0] sm:$0xff] }
  0x96   :  { %7086 = vmatprep.subr.bf16.mxu1 %v7085_v14  ;;  %v7101_v6 = vpack.c.bf16 %v4992_v0, %v4991_v58  ;;  %v8531_v58 = vld [vmem:[%s10138_s0 + $0x400] sm:$0xff]  ;;  %v8536_v0 = vld [vmem:[%s10138_s0 + $0x410] sm:$0xff] }
  0x98   :  { %6113 = vmatmul.mubr.f32.gmra.mrb[10].mxu1 %v4920_v20  ;;  %v4995_v20 = vld [vmem:[%s10139_s1 + $0x2b0] sm:$0xff] }
  0x99   :  { %7088 = vmatpush3.bf16.msra.mxu1 %v7085_v14  ;;  %6115 = vmatprep.mubr.f32.mxu1 %v4921_v21  ;;  %v8477_v14 = vld [vmem:[%s10138_s0 + $0x390] sm:$0xff]  ;;  %v4996_v21 = vld [vmem:[%s10139_s1 + $0x2b8] sm:$0xff] }
  0x9a   :  { %7090 = vmatprep.subr.bf16.mxu1 %v7089_v23  ;;  %v7109_v29 = vpack.c.bf16 %v4996_v21, %v4995_v20  ;;  %v8554_v20 = vld [vmem:[%s10138_s0 + $0x430] sm:$0xff] }
  0x9c   :  { %6116 = vmatmul.mubr.f32.gmra.mrb[12].mxu1 %v4922_v32  ;;  %v4997_v32 = vld [vmem:[%s10139_s1 + $0x2c0] sm:$0xff] }
  0x9d   :  { %7092 = vmatpush3.bf16.msra.mxu1 %v7089_v23  ;;  %6118 = vmatprep.mubr.f32.mxu1 %v4923_v33  ;;  %v8495_v23 = vld [vmem:[%s10138_s0 + $0x3b0] sm:$0xff]  ;;  %v4998_v33 = vld [vmem:[%s10139_s1 + $0x2c8] sm:$0xff] }
  0x9e   :  { %7094 = vmatprep.subr.bf16.mxu1 %v7093_v42  ;;  %v7113_v47 = vpack.c.bf16 %v4998_v33, %v4997_v32  ;;  %v5004_v32 = vld [vmem:[%s10139_s1 + $0x2f8] sm:$0xff]  ;;  %v8567_v33 = vld [vmem:[%s10138_s0 + $0x440] sm:$0xff] }
  0xa0   :  { %6119 = vmatmul.mubr.f32.gmra.mrb[14].mxu1 %v4924_v54  ;;  %v4999_v54 = vld [vmem:[%s10139_s1 + $0x2d0] sm:$0xff] }
  0xa1   :  { %7096 = vmatpush3.bf16.msra.mxu1 %v7093_v42  ;;  %6153 = vmatprep.mubr.f32.mxu1 %v8019_v51  ;;  %v4994_v51 = vld [vmem:[%s10139_s1 + $0x2a8] sm:$0xff]  ;;  %v8513_v42 = vld [vmem:[%s10138_s0 + $0x3d0] sm:$0xff] }
  0xa2   :  { %7098 = vmatprep.subr.bf16.mxu1 %v7097_v55  ;;  %v7105_v16 = vpack.c.bf16 %v4994_v51, %v4993_v9  ;;  %v5001_v9 = vld [vmem:[%s10139_s1 + $0x2e0] sm:$0xff]  ;;  %v5002_v51 = vld [vmem:[%s10139_s1 + $0x2e8] sm:$0xff] }
  0xa3   :  { %v7121_v21 = vpack.c.bf16 %v5002_v51, %v5001_v9  ;;  %v8585_v9 = vld [vmem:[%s10138_s0 + $0x460] sm:$0xff] }
  0xa4   :  { %6154 = vmatmul.mubr.f32.vlgmr.msra.gmra.mrb[0].mxu1 %v8459_v1  ;;  %v4973_v51 = vld [vmem:[%s10138_s0 + $0x241] sm:$0xff] }
  0xa5   :  { %7100 = vmatpush3.bf16.msra.mxu1 %v7097_v55  ;;  %6156 = vmatprep.mubr.f32.mxu1 %v8464_v5  ;;  %v5000_v55 = vld [vmem:[%s10139_s1 + $0x2d8] sm:$0xff] }
  0xa6   :  { %7102 = vmatprep.subr.bf16.mxu1 %v7101_v6 }
  0xa8   :  { %6157 = vmatmul.mubr.f32.gmra.mrb[2].mxu1 %v8477_v14 }
  0xa9   :  { %7104 = vmatpush3.bf16.msra.mxu1 %v7101_v6  ;;  %6159 = vmatprep.mubr.f32.mxu1 %v8482_v15  ;;  %v7117_v6 = vpack.c.bf16 %v5000_v55, %v4999_v54  ;;  %v5021_v55 = vld [vmem:[%s10139_s1 + $0x300] sm:$0xff] }
  0xaa   :  { %7106 = vmatprep.subr.bf16.mxu1 %v7105_v16 }
  0xac   :  { %6160 = vmatmul.mubr.f32.gmra.mrb[4].mxu1 %v8495_v23 }
  0xad   :  { %7108 = vmatpush3.bf16.msra.mxu1 %v7105_v16  ;;  %6162 = vmatprep.mubr.f32.mxu1 %v8500_v24  ;;  %v8549_v16 = vld [vmem:[%s10138_s0 + $0x420] sm:$0xff] }
  0xae   :  { %7110 = vmatprep.subr.bf16.mxu1 %v7109_v29 }
  0xb0   :  { %6163 = vmatmul.mubr.f32.gmra.mrb[6].mxu1 %v8513_v42 }
  0xb1   :  { %7112 = vmatpush3.bf16.msra.mxu1 %v7109_v29  ;;  %6165 = vmatprep.mubr.f32.mxu1 %v8518_v46  ;;  %v5003_v29 = vld [vmem:[%s10139_s1 + $0x2f0] sm:$0xff] }
  0xb2   :  { %7114 = vmatprep.subr.bf16.mxu1 %v7113_v47  ;;  %v7125_v54 = vpack.c.bf16 %v5004_v32, %v5003_v29  ;;  %v5023_v32 = vld [vmem:[%s10139_s1 + $0x310] sm:$0xff] }
  0xb4   :  { %6166 = vmatmul.mubr.f32.gmra.mrb[8].mxu1 %v8531_v58 }
  0xb5   :  { %7116 = vmatpush3.bf16.msra.mxu1 %v7113_v47  ;;  %6168 = vmatprep.mubr.f32.mxu1 %v8536_v0  ;;  %v8572_v47 = vld [vmem:[%s10138_s0 + $0x450] sm:$0xff] }
  0xb6   :  { %7118 = vmatprep.subr.bf16.mxu1 %v7117_v6 }
  0xb8   :  { %6169 = vmatmul.mubr.f32.gmra.mrb[10].mxu1 %v8549_v16 }
  0xb9   :  { %7120 = vmatpush3.bf16.msra.mxu1 %v7117_v6  ;;  %6171 = vmatprep.mubr.f32.mxu1 %v8554_v20  ;;  %v5022_v6 = vld [vmem:[%s10139_s1 + $0x308] sm:$0xff] }
  0xba   :  { %7122 = vmatprep.subr.bf16.mxu1 %v7121_v21  ;;  %v7129_v29 = vpack.c.bf16 %v5022_v6, %v5021_v55  ;;  %v55_v55 = vld [vmem:[%s10145_s7 + $0x10] sm:$0xff] }
  0xbb   :  { %v4974_v6 = vld [vmem:[%s10138_s0 + $0x251] sm:$0xff] }
  0xbc   :  { %6172 = vmatmul.mubr.f32.gmra.mrb[12].mxu1 %v8567_v33 }
  0xbd   :  { %7124 = vmatpush3.bf16.msra.mxu1 %v7121_v21  ;;  %6174 = vmatprep.mubr.f32.mxu1 %v8572_v47  ;;  %v5024_v21 = vld [vmem:[%s10139_s1 + $0x318] sm:$0xff] }
  0xbe   :  { %7126 = vmatprep.subr.bf16.mxu1 %v7125_v54  ;;  %v7133_v26 = vpack.c.bf16 %v5024_v21, %v5023_v32  ;;  %v4977_v32 = vld [vmem:[%s10138_s0 + $0x281] sm:$0xff] }
  0xc0   :  { %6175 = vmatmul.mubr.f32.gmra.mrb[14].mxu1 %v8585_v9 }
  0xc1   :  { %7128 = vmatpush3.bf16.msra.mxu1 %v7125_v54  ;;  %6209 = vmatprep.mubr.f32.mxu1 %v4973_v51  ;;  %v5025_v54 = vld [vmem:[%s10139_s1 + $0x320] sm:$0xff]  ;;  %v6909_v51 = vpack.c.bf16 %v56_v39, %v55_v55  ;;  %v4976_v39 = vld [vmem:[%s10138_s0 + $0x271] sm:$0xff] }
  0xc2   :  { %7130 = vmatprep.subr.bf16.mxu1 %v7129_v29  ;;  %v7137_v21 = vpack.c.bf16 %v5026_v25, %v5025_v54  ;;  %v5027_v55 = vld [vmem:[%s10139_s1 + $0x330] sm:$0xff] }
  0xc3   :  { %6910 = vmatprep.subr.bf16.mxu0 %v6909_v51  ;;  %v4978_v25 = vld [vmem:[%s10138_s0 + $0x291] sm:$0xff] }
  0xc4   :  { %6210 = vmatmul.mubr.f32.vlgmr.msra.gmra.mrb[0].mxu1 %v4974_v6  ;;  %6912 = vmatpush3.bf16.msra.mxu0 %v6909_v51  ;;  %v4979_v6 = vld [vmem:[%s10138_s0 + $0x2a1] sm:$0xff] }
  0xc5   :  { %7132 = vmatpush3.bf16.msra.mxu1 %v7129_v29  ;;  %6212 = vmatprep.mubr.f32.mxu1 %v4975_v38  ;;  %v5028_v38 = vld [vmem:[%s10139_s1 + $0x338] sm:$0xff]  ;;  %v61_v51 = vld [vmem:[%s10145_s7 + $0x40] sm:$0xff] }
  0xc6   :  { %7134 = vmatprep.subr.bf16.mxu1 %v7133_v26  ;;  %v60_v29 = vld [vmem:[%s10145_s7 + $0x38] sm:$0xff]  ;;  %v7141_v54 = vpack.c.bf16 %v5028_v38, %v5027_v55  ;;  %6914 = vmatprep.subr.bf16.mxu0 %v6913_v19 }
  0xc7   :  { %v6917_v63 = vpack.c.bf16 %v60_v29, %v59_v48  ;;  %v4981_v55 = vld [vmem:[%s10138_s0 + $0x2d1] sm:$0xff] }
  0xc8   :  { %6213 = vmatmul.mubr.f32.gmra.mrb[2].mxu1 %v4976_v39  ;;  %v62_v39 = vld [vmem:[%s10145_s7 + $0x48] sm:$0xff]  ;;  %6916 = vmatpush3.bf16.msra.mxu0 %v6913_v19  ;;  %v5031_v48 = vld [vmem:[%s10139_s1 + $0x350] sm:$0xff]  ;;  %v5032_v19 = vld [vmem:[%s10139_s1 + $0x358] sm:$0xff] }
  0xc9   :  { %7136 = vmatpush3.bf16.msra.mxu1 %v7133_v26  ;;  %6215 = vmatprep.mubr.f32.mxu1 %v4977_v32  ;;  %v5030_v26 = vld [vmem:[%s10139_s1 + $0x348] sm:$0xff]  ;;  %v4980_v32 = vld [vmem:[%s10138_s0 + $0x2b1] sm:$0xff]  ;;  %v6921_v29 = vpack.c.bf16 %v62_v39, %v61_v51  ;;  %v5033_v51 = vld [vmem:[%s10139_s1 + $0x360] sm:$0xff] }
  0xca   :  { %7138 = vmatprep.subr.bf16.mxu1 %v7137_v21  ;;  %v7145_v38 = vpack.c.bf16 %v5030_v26, %v5029_v53  ;;  %6918 = vmatprep.subr.bf16.mxu0 %v6917_v63  ;;  %v4983_v53 = vld [vmem:[%s10138_s0 + $0x2f1] sm:$0xff]  ;;  %v7149_v26 = vpack.c.bf16 %v5032_v19, %v5031_v48 }
  0xcb   :  { %v4985_v48 = vld [vmem:[%s10138_s0 + $0x311] sm:$0xff] }
  0xcc   :  { %6216 = vmatmul.mubr.f32.gmra.mrb[4].mxu1 %v4978_v25  ;;  %v64_v25 = vld [vmem:[%s10145_s7 + $0x58] sm:$0xff]  ;;  %6920 = vmatpush3.bf16.msra.mxu0 %v6917_v63  ;;  %v65_v63 = vld [vmem:[%s10145_s7 + $0x60] sm:$0xff] }
  0xcd   :  { %7140 = vmatpush3.bf16.msra.mxu1 %v7137_v21  ;;  %6218 = vmatprep.mubr.f32.mxu1 %v4979_v6  ;;  %v63_v21 = vld [vmem:[%s10145_s7 + $0x50] sm:$0xff]  ;;  %v4982_v6 = vld [vmem:[%s10138_s0 + $0x2e1] sm:$0xff] }
  0xce   :  { %7142 = vmatprep.subr.bf16.mxu1 %v7141_v54  ;;  %6922 = vmatprep.subr.bf16.mxu0 %v6921_v29  ;;  %v6925_v39 = vpack.c.bf16 %v64_v25, %v63_v21  ;;  %v5035_v21 = vld [vmem:[%s10139_s1 + $0x370] sm:$0xff] }
  0xd0   :  { %6219 = vmatmul.mubr.f32.gmra.mrb[6].mxu1 %v4980_v32  ;;  %v66_v32 = vld [vmem:[%s10145_s7 + $0x68] sm:$0xff]  ;;  %6924 = vmatpush3.bf16.msra.mxu0 %v6921_v29  ;;  %v67_v29 = vld [vmem:[%s10145_s7 + $0x70] sm:$0xff] }
  0xd1   :  { %7144 = vmatpush3.bf16.msra.mxu1 %v7141_v54  ;;  %6221 = vmatprep.mubr.f32.mxu1 %v4981_v55  ;;  %v5034_v54 = vld [vmem:[%s10139_s1 + $0x368] sm:$0xff]  ;;  %v6929_v25 = vpack.c.bf16 %v66_v32, %v65_v63  ;;  %v5053_v32 = vld [vmem:[%s10139_s1 + $0x380] sm:$0xff] }
  0xd2   :  { %7146 = vmatprep.subr.bf16.mxu1 %v7145_v38  ;;  %v4984_v55 = vld [vmem:[%s10138_s0 + $0x301] sm:$0xff]  ;;  %v7153_v19 = vpack.c.bf16 %v5034_v54, %v5033_v51  ;;  %6926 = vmatprep.subr.bf16.mxu0 %v6925_v39  ;;  %v4987_v51 = vld [vmem:[%s10138_s0 + $0x331] sm:$0xff] }
  0xd4   :  { %6222 = vmatmul.mubr.f32.gmra.mrb[8].mxu1 %v4982_v6  ;;  %v68_v6 = vld [vmem:[%s10145_s7 + $0x78] sm:$0xff]  ;;  %6928 = vmatpush3.bf16.msra.mxu0 %v6925_v39  ;;  %v4988_v39 = vld [vmem:[%s10138_s0 + $0x341] sm:$0xff] }
  0xd5   :  { %7148 = vmatpush3.bf16.msra.mxu1 %v7145_v38  ;;  %6224 = vmatprep.mubr.f32.mxu1 %v4983_v53  ;;  %v5036_v38 = vld [vmem:[%s10139_s1 + $0x378] sm:$0xff]  ;;  %v4986_v53 = vld [vmem:[%s10138_s0 + $0x321] sm:$0xff]  ;;  %v6933_v63 = vpack.c.bf16 %v68_v6, %v67_v29  ;;  %v5059_v29 = vld [vmem:[%s10139_s1 + $0x3b0] sm:$0xff] }
  0xd6   :  { %7150 = vmatprep.subr.bf16.mxu1 %v7149_v26  ;;  %v7157_v54 = vpack.c.bf16 %v5036_v38, %v5035_v21  ;;  %6930 = vmatprep.subr.bf16.mxu0 %v6929_v25  ;;  %v5056_v21 = vld [vmem:[%s10139_s1 + $0x398] sm:$0xff]  ;;  %v5058_v38 = vld [vmem:[%s10139_s1 + $0x3a8] sm:$0xff] }
  0xd7   :  { %v5060_v6 = vld [vmem:[%s10139_s1 + $0x3b8] sm:$0xff] }
  0xd8   :  { %6225 = vmatmul.mubr.f32.gmra.mrb[10].mxu1 %v4984_v55  ;;  %6932 = vmatpush3.bf16.msra.mxu0 %v6929_v25  ;;  %v5057_v25 = vld [vmem:[%s10139_s1 + $0x3a0] sm:$0xff] }
  0xd9   :  { %7152 = vmatpush3.bf16.msra.mxu1 %v7149_v26  ;;  %6227 = vmatprep.mubr.f32.mxu1 %v4985_v48  ;;  %v5054_v26 = vld [vmem:[%s10139_s1 + $0x388] sm:$0xff]  ;;  %v5055_v48 = vld [vmem:[%s10139_s1 + $0x390] sm:$0xff] }
  0xda   :  { %7154 = vmatprep.subr.bf16.mxu1 %v7153_v19  ;;  %v7161_v55 = vpack.c.bf16 %v5054_v26, %v5053_v32  ;;  %6934 = vmatprep.subr.bf16.mxu0 %v6933_v63  ;;  %v2622_v32 = vld [vmem:[%s10142_s4 + $0x8] sm:$0xff] }
  0xdc   :  { %6228 = vmatmul.mubr.f32.gmra.mrb[12].mxu1 %v4986_v53  ;;  %6936 = vmatpush3.bf16.msra.mxu0 %v6933_v63  ;;  %v5098_v53 = vld [vmem:[%s10139_s1 + $0x468] sm:$0xff]  ;;  %v2621_v63 = vld [vmem:[%s10142_s4] sm:$0xff] }
  0xdd   :  { %7156 = vmatpush3.bf16.msra.mxu1 %v7153_v19  ;;  %6230 = vmatprep.mubr.f32.mxu1 %v4987_v51  ;;  %v7165_v19 = vpack.c.bf16 %v5056_v21, %v5055_v48  ;;  %v7225_v26 = vpack.c.bf16 %v2622_v32, %v2621_v63  ;;  %v2623_v21 = vld [vmem:[%s10142_s4 + $0x10] sm:$0xff] }
  0xde   :  { %7158 = vmatprep.subr.bf16.mxu1 %v7157_v54 }
  0xdf   :  { %5874 = vmatmul.mubr.f32.vlgmr.msra.gmra.mrb[0].mxu0 %v8459_v1  ;;  %v5062_v1 = vld [vmem:[%s10139_s1 + $0x3c8] sm:$0xff]  ;;  %7226 = vmatprep.subr.bf16.mxu0 %v7225_v26 }
  0xe0   :  { %6231 = vmatmul.mubr.f32.gmra.mrb[14].mxu1 %v4988_v39  ;;  %5876 = vmatprep.mubr.f32.mxu0 %v8464_v5  ;;  %v5063_v5 = vld [vmem:[%s10139_s1 + $0x3d0] sm:$0xff]  ;;  %v5215_v39 = vld [vmem:[%s10142_s4 + $0x400] sm:$0xff] }
  0xe1   :  { %7160 = vmatpush3.bf16.msra.mxu1 %v7157_v54  ;;  %6265 = vmatprep.mubr.f32.mxu1 %v7945_v30  ;;  %v7169_v30 = vpack.c.bf16 %v5058_v38, %v5057_v25  ;;  %v5100_v54 = vld [vmem:[%s10139_s1 + $0x478] sm:$0xff]  ;;  %v5217_v38 = vld [vmem:[%s10142_s4 + $0x410] sm:$0xff] }
  0xe2   :  { %7162 = vmatprep.subr.bf16.mxu1 %v7161_v55  ;;  %7228 = vmatpush3.bf16.msra.mxu0 %v7225_v26 }
  0xe3   :  { %5877 = vmatmul.mubr.f32.gmra.mrb[2].mxu0 %v8477_v14  ;;  %v5064_v14 = vld [vmem:[%s10139_s1 + $0x3d8] sm:$0xff] }
  0xe4   :  { %6266 = vmatmul.mubr.f32.vlgmr.msra.gmra.mrb[0].mxu1 %v7950_v31  ;;  %5879 = vmatprep.mubr.f32.mxu0 %v8482_v15  ;;  %v7173_v31 = vpack.c.bf16 %v5060_v6, %v5059_v29  ;;  %v5066_v15 = vld [vmem:[%s10139_s1 + $0x3e8] sm:$0xff]  ;;  %v2625_v6 = vld [vmem:[%s10142_s4 + $0x20] sm:$0xff] }
  0xe5   :  { %7164 = vmatpush3.bf16.msra.mxu1 %v7161_v55  ;;  %6268 = vmatprep.mubr.f32.mxu1 %v7963_v35  ;;  %v5061_v35 = vld [vmem:[%s10139_s1 + $0x3c0] sm:$0xff]  ;;  %v5216_v55 = vld [vmem:[%s10142_s4 + $0x408] sm:$0xff] }
  0xe6   :  { %7166 = vmatprep.subr.bf16.mxu1 %v7165_v19  ;;  %v8909_v48 = vpack.c.bf16 %v5216_v55, %v5215_v39 }
  0xe7   :  { %5880 = vmatmul.mubr.f32.gmra.mrb[4].mxu0 %v8495_v23  ;;  %v5067_v23 = vld [vmem:[%s10139_s1 + $0x3f0] sm:$0xff] }
  0xe8   :  { %6269 = vmatmul.mubr.f32.gmra.mrb[2].mxu1 %v7968_v36  ;;  %5882 = vmatprep.mubr.f32.mxu0 %v8500_v24  ;;  %v5012_v36 = vld [vmem:[%s10138_s0 + $0x80] sm:$0xff]  ;;  %v5068_v24 = vld [vmem:[%s10139_s1 + $0x3f8] sm:$0xff] }
  0xe9   :  { %7168 = vmatpush3.bf16.msra.mxu1 %v7165_v19  ;;  %6271 = vmatprep.mubr.f32.mxu1 %v7981_v40  ;;  %v7177_v40 = vpack.c.bf16 %v5062_v1, %v5061_v35  ;;  %v2624_v19 = vld [vmem:[%s10142_s4 + $0x18] sm:$0xff]  ;;  %v5219_v1 = vld [vmem:[%s10142_s4 + $0x420] sm:$0xff] }
  0xea   :  { %7170 = vmatprep.subr.bf16.mxu1 %v7169_v30  ;;  %v7229_v25 = vpack.c.bf16 %v2624_v19, %v2623_v21 }
  0xeb   :  { %5883 = vmatmul.mubr.f32.gmra.mrb[6].mxu0 %v8513_v42  ;;  %v5086_v42 = vld [vmem:[%s10139_s1 + $0x408] sm:$0xff] }
  0xec   :  { %6272 = vmatmul.mubr.f32.gmra.mrb[4].mxu1 %v7986_v41  ;;  %5885 = vmatprep.mubr.f32.mxu0 %v8518_v46  ;;  %v7181_v41 = vpack.c.bf16 %v5064_v14, %v5063_v5  ;;  %v5087_v46 = vld [vmem:[%s10139_s1 + $0x410] sm:$0xff]  ;;  %v2628_v14 = vld [vmem:[%s10142_s4 + $0x38] sm:$0xff] }
  0xed   :  { %7172 = vmatpush3.bf16.msra.mxu1 %v7169_v30  ;;  %6274 = vmatprep.mubr.f32.mxu1 %v7999_v45  ;;  %v5065_v45 = vld [vmem:[%s10139_s1 + $0x3e0] sm:$0xff]  ;;  %v5218_v30 = vld [vmem:[%s10142_s4 + $0x418] sm:$0xff]  ;;  %v2627_v5 = vld [vmem:[%s10142_s4 + $0x30] sm:$0xff] }
  0xee   :  { %7174 = vmatprep.subr.bf16.mxu1 %v7173_v31  ;;  %v8925_v29 = vpack.c.bf16 %v5218_v30, %v5217_v38  ;;  %7230 = vmatprep.subr.bf16.mxu0 %v7229_v25 }
  0xef   :  { %5886 = vmatmul.mubr.f32.gmra.mrb[8].mxu0 %v8531_v58  ;;  %v5088_v58 = vld [vmem:[%s10139_s1 + $0x418] sm:$0xff] }
  0xf0   :  { %6275 = vmatmul.mubr.f32.gmra.mrb[6].mxu1 %v5012_v36  ;;  %5888 = vmatprep.mubr.f32.mxu0 %v8536_v0  ;;  %v5090_v0 = vld [vmem:[%s10139_s1 + $0x428] sm:$0xff] }
  0xf1   :  { %7176 = vmatpush3.bf16.msra.mxu1 %v7173_v31  ;;  %6277 = vmatprep.mubr.f32.mxu1 %v8014_v50  ;;  %v7185_v50 = vpack.c.bf16 %v5066_v15, %v5065_v45  ;;  %v2626_v31 = vld [vmem:[%s10142_s4 + $0x28] sm:$0xff]  ;;  %v5221_v45 = vld [vmem:[%s10142_s4 + $0x430] sm:$0xff]  ;;  %v5222_v15 = vld [vmem:[%s10142_s4 + $0x438] sm:$0xff] }
  0xf2   :  { %7178 = vmatprep.subr.bf16.mxu1 %v7177_v40  ;;  %7232 = vmatpush3.bf16.msra.mxu0 %v7229_v25  ;;  %v7233_v35 = vpack.c.bf16 %v2626_v31, %v2625_v6  ;;  %v5220_v36 = vld [vmem:[%s10142_s4 + $0x428] sm:$0xff] }
  0xf3   :  { %5889 = vmatmul.mubr.f32.gmra.mrb[10].mxu0 %v8549_v16 }
  0xf4   :  { %6278 = vmatmul.mubr.f32.gmra.mrb[8].mxu1 %v8024_v52  ;;  %5891 = vmatprep.mubr.f32.mxu0 %v8554_v20  ;;  %v7189_v52 = vpack.c.bf16 %v5068_v24, %v5067_v23  ;;  %v5092_v20 = vld [vmem:[%s10139_s1 + $0x438] sm:$0xff]  ;;  %v2629_v23 = vld [vmem:[%s10142_s4 + $0x40] sm:$0xff]  ;;  %v2630_v24 = vld [vmem:[%s10142_s4 + $0x48] sm:$0xff] }
  0xf5   :  { %7180 = vmatpush3.bf16.msra.mxu1 %v7177_v40  ;;  %6280 = vmatprep.mubr.f32.mxu1 %v8038_v56  ;;  %v5085_v56 = vld [vmem:[%s10139_s1 + $0x400] sm:$0xff]  ;;  %v8941_v40 = vpack.c.bf16 %v5220_v36, %v5219_v1 }
  0xf6   :  { %7182 = vmatprep.subr.bf16.mxu1 %v7181_v41  ;;  %7234 = vmatprep.subr.bf16.mxu0 %v7233_v35 }
  0xf7   :  { %5892 = vmatmul.mubr.f32.gmra.mrb[12].mxu0 %v8567_v33  ;;  %v5094_v33 = vld [vmem:[%s10139_s1 + $0x448] sm:$0xff] }
  0xf8   :  { %6281 = vmatmul.mubr.f32.gmra.mrb[10].mxu1 %v8043_v57  ;;  %5894 = vmatprep.mubr.f32.mxu0 %v8572_v47  ;;  %v5020_v57 = vld [vmem:[%s10138_s0 + $0x110] sm:$0xff] }
  0xf9   :  { %7184 = vmatpush3.bf16.msra.mxu1 %v7181_v41  ;;  %6283 = vmatprep.mubr.f32.mxu1 %v8056_v61  ;;  %v7193_v61 = vpack.c.bf16 %v5086_v42, %v5085_v56  ;;  %v5095_v47 = vld [vmem:[%s10139_s1 + $0x450] sm:$0xff]  ;;  %v7237_v41 = vpack.c.bf16 %v2628_v14, %v2627_v5  ;;  %v5223_v56 = vld [vmem:[%s10142_s4 + $0x440] sm:$0xff]  ;;  %v5224_v42 = vld [vmem:[%s10142_s4 + $0x448] sm:$0xff] }
  0xfa   :  { %7186 = vmatprep.subr.bf16.mxu1 %v7185_v50  ;;  %7236 = vmatpush3.bf16.msra.mxu0 %v7233_v35 }
  0xfb   :  { %5895 = vmatmul.mubr.f32.gmra.mrb[14].mxu0 %v8585_v9  ;;  %v5096_v9 = vld [vmem:[%s10139_s1 + $0x458] sm:$0xff]  ;;  %7238 = vmatprep.subr.bf16.mxu0 %v7237_v41 }
  0xfc   :  { %6284 = vmatmul.mubr.f32.gmra.mrb[12].mxu1 %v8061_v62  ;;  %v7197_v62 = vpack.c.bf16 %v5088_v58, %v5087_v46  ;;  %v2632_v46 = vld [vmem:[%s10142_s4 + $0x58] sm:$0xff] }
  0xfd   :  { %7188 = vmatpush3.bf16.msra.mxu1 %v7185_v50  ;;  %6286 = vmatprep.mubr.f32.mxu1 %v8074_v2  ;;  %v5089_v2 = vld [vmem:[%s10139_s1 + $0x420] sm:$0xff]  ;;  %v8957_v50 = vpack.c.bf16 %v5222_v15, %v5221_v45 }
  0xfe   :  { %7190 = vmatprep.subr.bf16.mxu1 %v7189_v52  ;;  %v7201_v16 = vpack.c.bf16 %v5090_v0, %v5089_v2  ;;  %7240 = vmatpush3.bf16.msra.mxu0 %v7237_v41  ;;  %v5226_v2 = vld [vmem:[%s10142_s4 + $0x458] sm:$0xff] }
 0x100   :  { %6287 = vmatmul.mubr.f32.gmra.mrb[14].mxu1 %v5020_v57  ;;  %v8973_v57 = vpack.c.bf16 %v5224_v42, %v5223_v56 }
 0x101   :  { %7192 = vmatpush3.bf16.msra.mxu1 %v7189_v52  ;;  %6321 = vmatprep.mubr.f32.mxu1 %v8089_v7  ;;  %v5091_v7 = vld [vmem:[%s10139_s1 + $0x430] sm:$0xff]  ;;  %v7241_v52 = vpack.c.bf16 %v2630_v24, %v2629_v23 }
 0x102   :  { %7194 = vmatprep.subr.bf16.mxu1 %v7193_v61 }
 0x103   :  { %7242 = vmatprep.subr.bf16.mxu0 %v7241_v52 }
 0x104   :  { %6322 = vmatmul.mubr.f32.vlgmr.msra.gmra.mrb[0].mxu1 %v8094_v8  ;;  %v7205_v8 = vpack.c.bf16 %v5092_v20, %v5091_v7  ;;  %7244 = vmatpush3.bf16.msra.mxu0 %v7241_v52  ;;  %v2634_v7 = vld [vmem:[%s10142_s4 + $0x68] sm:$0xff] }
 0x105   :  { %7196 = vmatpush3.bf16.msra.mxu1 %v7193_v61  ;;  %6324 = vmatprep.mubr.f32.mxu1 %v8107_v12  ;;  %v5093_v12 = vld [vmem:[%s10139_s1 + $0x440] sm:$0xff]  ;;  %v2631_v61 = vld [vmem:[%s10142_s4 + $0x50] sm:$0xff] }
 0x106   :  { %7198 = vmatprep.subr.bf16.mxu1 %v7197_v62  ;;  %v7245_v58 = vpack.c.bf16 %v2632_v46, %v2631_v61 }
 0x108   :  { %6325 = vmatmul.mubr.f32.gmra.mrb[2].mxu1 %v8112_v13  ;;  %v5044_v13 = vld [vmem:[%s10138_s0 + $0x1a0] sm:$0xff]  ;;  %7246 = vmatprep.subr.bf16.mxu0 %v7245_v58 }
 0x109   :  { %7200 = vmatpush3.bf16.msra.mxu1 %v7197_v62  ;;  %6327 = vmatprep.mubr.f32.mxu1 %v8125_v17  ;;  %v7209_v17 = vpack.c.bf16 %v5094_v33, %v5093_v12  ;;  %v5225_v62 = vld [vmem:[%s10142_s4 + $0x450] sm:$0xff]  ;;  %v5228_v12 = vld [vmem:[%s10142_s4 + $0x468] sm:$0xff]  ;;  %v7820_v33 = vmov 0.0  }
 0x10a   :  { %7202 = vmatprep.subr.bf16.mxu1 %v7201_v16  ;;  %v8989_v0 = vpack.c.bf16 %v5226_v2, %v5225_v62  ;;  %7248 = vmatpush3.bf16.msra.mxu0 %v7245_v58  ;;  %2570 = vst [vmem:[#allocation3 + $0xb0] sm:$0xff] %v7820_v33  ;;  %2571 = vst [vmem:[#allocation3 + $0xb8] sm:$0x3] %v7820_v33 }
 0x10b   :  { %2572 = vst [vmem:[#allocation3 + $0xc0] sm:$0xff] %v7820_v33  ;;  %2573 = vst [vmem:[#allocation3 + $0xc8] sm:$0x3] %v7820_v33  ;;  %6433 = vmatprep.mubr.f32.mxu0 %v7820_v33 }
 0x10c   :  { %6328 = vmatmul.mubr.f32.gmra.mrb[4].mxu1 %v8130_v18  ;;  %v7213_v18 = vpack.c.bf16 %v5096_v9, %v5095_v47  ;;  %2574 = vst [vmem:[#allocation3 + $0xd0] sm:$0xff] %v7820_v33  ;;  %2575 = vst [vmem:[#allocation3 + $0xd8] sm:$0x3] %v7820_v33  ;;  %v2636_v47 = vld [vmem:[%s10142_s4 + $0x78] sm:$0xff]  ;;  %v5229_v9 = vld [vmem:[%s10142_s4 + $0x470] sm:$0xff] }
 0x10d   :  { %7204 = vmatpush3.bf16.msra.mxu1 %v7201_v16  ;;  %6330 = vmatprep.mubr.f32.mxu1 %v8143_v22  ;;  %v5097_v22 = vld [vmem:[%s10139_s1 + $0x460] sm:$0xff]  ;;  %2576 = vst [vmem:[#allocation3 + $0xe0] sm:$0xff] %v7820_v33  ;;  %2577 = vst [vmem:[#allocation3 + $0xe8] sm:$0x3] %v7820_v33 }
 0x10e   :  { %7206 = vmatprep.subr.bf16.mxu1 %v7205_v8  ;;  %v7217_v51 = vpack.c.bf16 %v5098_v53, %v5097_v22  ;;  %v2633_v16 = vld [vmem:[%s10142_s4 + $0x60] sm:$0xff]  ;;  %2578 = vst [vmem:[#allocation3 + $0xf0] sm:$0xff] %v7820_v33  ;;  %2579 = vst [vmem:[#allocation3 + $0xf8] sm:$0x3] %v7820_v33  ;;  %v5230_v22 = vld [vmem:[%s10142_s4 + $0x478] sm:$0xff] }
 0x10f   :  { %v7249_v20 = vpack.c.bf16 %v2634_v7, %v2633_v16  ;;  %2580 = vst [vmem:[#allocation3 + $0x100] sm:$0xff] %v7820_v33  ;;  %2581 = vst [vmem:[#allocation3 + $0x108] sm:$0x3] %v7820_v33  ;;  %v9062_v53 = vpack.c.bf16 %v5230_v22, %v5229_v9 }
 0x110   :  { %6331 = vmatmul.mubr.f32.gmra.mrb[6].mxu1 %v5044_v13  ;;  %2582 = vst [vmem:[#allocation3 + $0x110] sm:$0xff] %v7820_v33  ;;  %2583 = vst [vmem:[#allocation3 + $0x118] sm:$0x3] %v7820_v33 }
 0x111   :  { %7208 = vmatpush3.bf16.msra.mxu1 %v7205_v8  ;;  %6333 = vmatprep.mubr.f32.mxu1 %v8158_v27  ;;  %v5099_v27 = vld [vmem:[%s10139_s1 + $0x470] sm:$0xff]  ;;  %v5227_v8 = vld [vmem:[%s10142_s4 + $0x460] sm:$0xff]  ;;  %2584 = vst [vmem:[#allocation3 + $0x120] sm:$0xff] %v7820_v33  ;;  %2585 = vst [vmem:[#allocation3 + $0x128] sm:$0x3] %v7820_v33 }
 0x112   :  { %7210 = vmatprep.subr.bf16.mxu1 %v7209_v17  ;;  %2548 = vst [vmem:[#allocation3] sm:$0xff] %v7820_v33  ;;  %2549 = vst [vmem:[#allocation3 + $0x8] sm:$0x3] %v7820_v33  ;;  %v9045_v13 = vpack.c.bf16 %v5228_v12, %v5227_v8  ;;  %7250 = vmatprep.subr.bf16.mxu0 %v7249_v20 }
 0x113   :  { %2550 = vst [vmem:[#allocation3 + $0x10] sm:$0xff] %v7820_v33  ;;  %2551 = vst [vmem:[#allocation3 + $0x18] sm:$0x3] %v7820_v33  ;;  %7252 = vmatpush3.bf16.msra.mxu0 %v7249_v20 }
 0x114   :  { %6334 = vmatmul.mubr.f32.gmra.mrb[8].mxu1 %v8163_v28  ;;  %v7221_v28 = vpack.c.bf16 %v5100_v54, %v5099_v27  ;;  %2552 = vst [vmem:[#allocation3 + $0x20] sm:$0xff] %v7820_v33  ;;  %2553 = vst [vmem:[#allocation3 + $0x28] sm:$0x3] %v7820_v33 }
 0x115   :  { %7212 = vmatpush3.bf16.msra.mxu1 %v7209_v17  ;;  %6336 = vmatprep.mubr.f32.mxu1 %v8176_v34  ;;  %v5052_v34 = vld [vmem:[%s10138_s0 + $0x230] sm:$0xff]  ;;  %2554 = vst [vmem:[#allocation3 + $0x30] sm:$0xff] %v7820_v33  ;;  %2555 = vst [vmem:[#allocation3 + $0x38] sm:$0x3] %v7820_v33 }
 0x116   :  { %7214 = vmatprep.subr.bf16.mxu1 %v7213_v18  ;;  %2556 = vst [vmem:[#allocation3 + $0x40] sm:$0xff] %v7820_v33  ;;  %2557 = vst [vmem:[#allocation3 + $0x48] sm:$0x3] %v7820_v33  ;;  %v2635_v17 = vld [vmem:[%s10142_s4 + $0x70] sm:$0xff] }
 0x117   :  { %2558 = vst [vmem:[#allocation3 + $0x50] sm:$0xff] %v7820_v33  ;;  %2559 = vst [vmem:[#allocation3 + $0x58] sm:$0x3] %v7820_v33 }
 0x118   :  { %6337 = vmatmul.mubr.f32.gmra.mrb[10].mxu1 %v8181_v37  ;;  %v10193_v37 = vld [vmem:[#allocation8_spill] sm:$0xff]  ;;  %2560 = vst [vmem:[#allocation3 + $0x60] sm:$0xff] %v7820_v33  ;;  %2561 = vst [vmem:[#allocation3 + $0x68] sm:$0x3] %v7820_v33 }
 0x119   :  { %7216 = vmatpush3.bf16.msra.mxu1 %v7213_v18  ;;  %6339 = vmatprep.mubr.f32.mxu1 %v8194_v43  ;;  %v5076_v43 = vld [vmem:[%s10138_s0 + $0x81] sm:$0xff]  ;;  %10201 = vst [vmem:[#allocation8_spill] sm:$0xff] %v8909_v48  ;;  %2562 = vst [vmem:[#allocation3 + $0x70] sm:$0xff] %v7820_v33  ;;  %v7253_v18 = vpack.c.bf16 %v2636_v47, %v2635_v17 }
 0x11a   :  { %7218 = vmatprep.subr.bf16.mxu1 %v7217_v51  ;;  %2563 = vst [vmem:[#allocation3 + $0x78] sm:$0x3] %v7820_v33  ;;  %2564 = vst [vmem:[#allocation3 + $0x80] sm:$0xff] %v7820_v33 }
 0x11b   :  { %2565 = vst [vmem:[#allocation3 + $0x88] sm:$0x3] %v7820_v33  ;;  %2566 = vst [vmem:[#allocation3 + $0x90] sm:$0xff] %v7820_v33  ;;  %7254 = vmatprep.subr.bf16.mxu0 %v7253_v18 }
 0x11c   :  { %6340 = vmatmul.mubr.f32.gmra.mrb[12].mxu1 %v8199_v44  ;;  %v10194_v44 = vld [vmem:[#allocation9_spill] sm:$0xff]  ;;  %2567 = vst [vmem:[#allocation3 + $0x98] sm:$0x3] %v7820_v33  ;;  %2568 = vst [vmem:[#allocation3 + $0xa0] sm:$0xff] %v7820_v33  ;;  %7256 = vmatpush3.bf16.msra.mxu0 %v7253_v18 }
 0x11d   :  { %7220 = vmatpush3.bf16.msra.mxu1 %v7217_v51  ;;  %6342 = vmatprep.mubr.f32.mxu1 %v8212_v49  ;;  %v10195_v49 = vld [vmem:[#allocation10_spill] sm:$0xff]  ;;  %10202 = vst [vmem:[#allocation9_spill] sm:$0xff] %v8925_v29  ;;  %2569 = vst [vmem:[#allocation3 + $0xa8] sm:$0x3] %v7820_v33 }
 0x11e   :  { %7222 = vmatprep.subr.bf16.mxu1 %v7221_v28  ;;  %10203 = vst [vmem:[#allocation10_spill] sm:$0xff] %v8941_v40  ;;  %2586 = vst [vmem:[#allocation3 + $0x130] sm:$0xff] %v7820_v33 }
 0x11f   :  { %2587 = vst [vmem:[#allocation3 + $0x138] sm:$0x3] %v7820_v33 }
 0x120   :  { %6343 = vmatmul.mubr.f32.gmra.mrb[14].mxu1 %v5052_v34  ;;  %v5104_v34 = vld [vmem:[%s10142_s4 + $0x88] sm:$0xff] }
 0x121   :  { %7224 = vmatpush3.bf16.msra.mxu1 %v7221_v28  ;;  %6377 = vmatprep.mubr.f32.mxu1 %v8227_v59  ;;  %v10196_v59 = vld [vmem:[#allocation11_spill] sm:$0xff]  ;;  %v5103_v28 = vld [vmem:[%s10142_s4 + $0x80] sm:$0xff] }
 0x122   :  { %7513 = vmatprep.subr.bf16.mxu1 %v8909_v48  ;;  %10204 = vst [vmem:[#allocation11_spill] sm:$0xff] %v8957_v50 }
 0x124   :  { %6378 = vmatmul.mubr.f32.vlgmr.msra.gmra.mrb[0].mxu1 %v8232_v60  ;;  %v10197_v60 = vld [vmem:[#allocation12_spill] sm:$0xff] }
 0x125   :  { %6380 = vmatprep.mubr.f32.mxu1 %v8245_v3  ;;  %v10198_v3 = vld [vmem:[#allocation13_spill] sm:$0xff]  ;;  %7521 = vmatpush3.bf16.msra.mxu1 %v8909_v48  ;;  %10205 = vst [vmem:[#allocation12_spill] sm:$0xff] %v8973_v57 }
 0x126   :  { %7514 = vmatprep.subr.bf16.mxu1 %v8925_v29  ;;  %10206 = vst [vmem:[#allocation13_spill] sm:$0xff] %v8989_v0 }
 0x128   :  { %6381 = vmatmul.mubr.f32.gmra.mrb[2].mxu1 %v8250_v4  ;;  %v10199_v4 = vld [vmem:[#allocation14_spill] sm:$0xff] }
 0x129   :  { %6383 = vmatprep.mubr.f32.mxu1 %v8263_v10  ;;  %v10200_v10 = vld [vmem:[#allocation15_spill] sm:$0xff]  ;;  %7522 = vmatpush3.bf16.msra.mxu1 %v8925_v29  ;;  %10207 = vst [vmem:[#allocation14_spill] sm:$0xff] %v9045_v13 }
 0x12a   :  { %7515 = vmatprep.subr.bf16.mxu1 %v8941_v40  ;;  %10208 = vst [vmem:[#allocation15_spill] sm:$0xff] %v9062_v53 }
 0x12c   :  { %6384 = vmatmul.mubr.f32.gmra.mrb[4].mxu1 %v8268_v11  ;;  %v5084_v11 = vld [vmem:[%s10138_s0 + $0x111] sm:$0xff] }
 0x12d   :  { %6386 = vmatprep.mubr.f32.mxu1 %v10193_v37  ;;  %7523 = vmatpush3.bf16.msra.mxu1 %v8941_v40  ;;  %v9072_v37 = vpack.c.bf16 %v5104_v34, %v5103_v28 }
 0x12e   :  { %7516 = vmatprep.subr.bf16.mxu1 %v8957_v50 }
 0x12f   :  { %7258 = vmatprep.subr.bf16.mxu0 %v9072_v37 }
 0x130   :  { %6387 = vmatmul.mubr.f32.gmra.mrb[6].mxu1 %v5076_v43 }
 0x131   :  { %6389 = vmatprep.mubr.f32.mxu1 %v10194_v44  ;;  %7524 = vmatpush3.bf16.msra.mxu1 %v8957_v50  ;;  %v5119_v50 = vld [vmem:[%s10142_s4 + $0x100] sm:$0xff] }
 0x132   :  { %7517 = vmatprep.subr.bf16.mxu1 %v8973_v57 }
 0x134   :  { %6390 = vmatmul.mubr.f32.gmra.mrb[8].mxu1 %v10195_v49 }
 0x135   :  { %6392 = vmatprep.mubr.f32.mxu1 %v10196_v59  ;;  %7525 = vmatpush3.bf16.msra.mxu1 %v8973_v57 }
 0x136   :  { %7518 = vmatprep.subr.bf16.mxu1 %v8989_v0 }
 0x138   :  { %6393 = vmatmul.mubr.f32.gmra.mrb[10].mxu1 %v10197_v60 }
 0x139   :  { %6395 = vmatprep.mubr.f32.mxu1 %v10198_v3  ;;  %7526 = vmatpush3.bf16.msra.mxu1 %v8989_v0  ;;  %v5117_v0 = vld [vmem:[%s10142_s4 + $0xf0] sm:$0xff] }
 0x13a   :  { %7519 = vmatprep.subr.bf16.mxu1 %v9045_v13 }
 0x13c   :  { %6396 = vmatmul.mubr.f32.gmra.mrb[12].mxu1 %v10199_v4 }
 0x13d   :  { %6398 = vmatprep.mubr.f32.mxu1 %v10200_v10  ;;  %7527 = vmatpush3.bf16.msra.mxu1 %v9045_v13 }
 0x13e   :  { %7520 = vmatprep.subr.bf16.mxu1 %v9062_v53 }
 0x140   :  { %6399 = vmatmul.mubr.f32.gmra.mrb[14].mxu1 %v5084_v11 }
 0x141   :  { %7528 = vmatpush3.bf16.msra.mxu1 %v9062_v53 }
 0x1f7   :  { %v6379_v51 = vpop.f32.mrb[0].mxu1 }
 0x1f8   :  { %v2249_v27 = vpop.f32.mrb[1].mxu1 }
 0x1f9   :  { %v2392_v54 = vadd.f32 %v6379_v51, %v2249_v27 }
 0x1fb   :  { %v6382_v43 = vpop.f32.mrb[2].mxu1 }
 0x1fc   :  { %v2259_v44 = vpop.f32.mrb[3].mxu1 }
 0x1fd   :  { %v2393_v49 = vadd.f32 %v2392_v54, %v2259_v44 }
 0x1ff   :  { %v6385_v59 = vpop.f32.mrb[4].mxu1  ;;  %v2394_v60 = vadd.f32 %v6382_v43, %v2393_v49 }
 0x200   :  { %v2269_v3 = vpop.f32.mrb[5].mxu1 }
 0x201   :  { %v2395_v4 = vadd.f32 %v2394_v60, %v2269_v3 }
 0x203   :  { %v6388_v10 = vpop.f32.mrb[6].mxu1  ;;  %v2396_v11 = vadd.f32 %v6385_v59, %v2395_v4 }
 0x204   :  { %v2279_v63 = vpop.f32.mrb[7].mxu1 }
 0x205   :  { %v2397_v32 = vadd.f32 %v2396_v11, %v2279_v63 }
 0x207   :  { %v6391_v26 = vpop.f32.mrb[8].mxu1  ;;  %v2398_v39 = vadd.f32 %v6388_v10, %v2397_v32 }
 0x208   :  { %v2289_v55 = vpop.f32.mrb[9].mxu1 }
 0x209   :  { %v2399_v21 = vadd.f32 %v2398_v39, %v2289_v55 }
 0x20b   :  { %v6394_v19 = vpop.f32.mrb[10].mxu1  ;;  %v2400_v25 = vadd.f32 %v6391_v26, %v2399_v21 }
 0x20c   :  { %v2299_v38 = vpop.f32.mrb[11].mxu1 }
 0x20d   :  { %v2401_v30 = vadd.f32 %v2400_v25, %v2299_v38 }
 0x20f   :  { %v6397_v6 = vpop.f32.mrb[12].mxu1  ;;  %v2402_v31 = vadd.f32 %v6394_v19, %v2401_v30 }
 0x210   :  { %v2309_v35 = vpop.f32.mrb[13].mxu1 }
 0x211   :  { %v2403_v1 = vadd.f32 %v2402_v31, %v2309_v35 }
 0x213   :  { %v6400_v36 = vpop.f32.mrb[14].mxu1  ;;  %v2404_v5 = vadd.f32 %v6397_v6, %v2403_v1 }
 0x214   :  { %v2319_v14 = vpop.f32.mrb[15].mxu1 }
 0x215   :  { %v2405_v41 = vadd.f32 %v2404_v5, %v2319_v14 }
 0x217   :  { %v2406_v45 = vadd.f32 %v6400_v36, %v2405_v41 }
 0x219   :  { %v2407_v15 = vrot.slane %v2406_v45, 4 }
 0x21b   :  { %v2408_v23 = vadd.f32 %v2407_v15, %v2406_v45  ;;  %v9139_v45 = vpop.f32.mrb[0].mxu0 }
 0x21c   :  { %v9141_v15 = vpop.f32.mrb[1].mxu0 }
 0x21d   :  { %v2409_v24 = vrot.slane %v2408_v23, 2 }
 0x21f   :  { %v2410_v52 = vadd.f32 %v2409_v24, %v2408_v23  ;;  %v214_v24 = vadd.f32 %v9139_v45, %v9141_v15 }
 0x221   :  { %v2411_v56 = vrot.slane %v2410_v52, 1 }
 0x223   :  { %v2412_v42 = vadd.f32 %v2411_v56, %v2410_v52  ;;  %v9145_v52 = vpop.f32.mrb[2].mxu0 }
 0x224   :  { %v9147_v56 = vpop.f32.mrb[3].mxu0 }
 0x225   :  { %v2413_v61 = vmul.f32 0.0078125, %v2412_v42 }
 0x227   :  { %v9075_v46 = vsub.f32 %v2249_v27, %v2413_v61  ;;  %v9077_v58 = vsub.f32 %v6379_v51, %v2413_v61  ;;  %v9079_v62 = vsub.f32 %v2259_v44, %v2413_v61  ;;  %v9081_v2 = vsub.f32 %v6382_v43, %v2413_v61 }
 0x228   :  { %v9083_v16 = vsub.f32 %v2269_v3, %v2413_v61  ;;  %v9085_v7 = vsub.f32 %v6385_v59, %v2413_v61  ;;  %v9087_v20 = vsub.f32 %v2279_v63, %v2413_v61  ;;  %v9089_v8 = vsub.f32 %v6388_v10, %v2413_v61 }
 0x229   :  { %v9091_v12 = vsub.f32 %v2289_v55, %v2413_v61  ;;  %v9093_v17 = vsub.f32 %v6391_v26, %v2413_v61  ;;  %v9095_v47 = vsub.f32 %v2299_v38, %v2413_v61  ;;  %v9097_v9 = vsub.f32 %v6394_v19, %v2413_v61 }
 0x22a   :  { %v9099_v18 = vsub.f32 %v2309_v35, %v2413_v61  ;;  %v9101_v22 = vsub.f32 %v6397_v6, %v2413_v61  ;;  %v9103_v51 = vsub.f32 %v2319_v14, %v2413_v61  ;;  %v9105_v27 = vsub.f32 %v6400_v36, %v2413_v61 }
 0x22b   :  { %v2430_v54 = vmul.f32 %v9075_v46, %v9075_v46  ;;  %v2431_v28 = vmul.f32 %v9077_v58, %v9077_v58  ;;  %v2432_v34 = vmul.f32 %v9079_v62, %v9079_v62  ;;  %v2433_v44 = vmul.f32 %v9081_v2, %v9081_v2 }
 0x22c   :  { %v2434_v59 = vmul.f32 %v9083_v16, %v9083_v16  ;;  %v2435_v3 = vmul.f32 %v9085_v7, %v9085_v7  ;;  %v2436_v10 = vmul.f32 %v9087_v20, %v9087_v20  ;;  %v2437_v63 = vmul.f32 %v9089_v8, %v9089_v8 }
 0x22d   :  { %v2446_v43 = vadd.f32 %v2431_v28, %v2430_v54  ;;  %v2438_v26 = vmul.f32 %v9091_v12, %v9091_v12  ;;  %v2439_v55 = vmul.f32 %v9093_v17, %v9093_v17  ;;  %v2440_v19 = vmul.f32 %v9095_v47, %v9095_v47  ;;  %v9150_v54 = vpop.f32.mrb[4].mxu0 }
 0x22e   :  { %v2441_v38 = vmul.f32 %v9097_v9, %v9097_v9  ;;  %v2442_v6 = vmul.f32 %v9099_v18, %v9099_v18  ;;  %v2443_v35 = vmul.f32 %v9101_v22, %v9101_v22  ;;  %v2444_v36 = vmul.f32 %v9103_v51, %v9103_v51 }
 0x22f   :  { %v2447_v49 = vadd.f32 %v2446_v43, %v2432_v34  ;;  %v2445_v14 = vmul.f32 %v9105_v27, %v9105_v27  ;;  %v215_v61 = vadd.f32 %v214_v24, %v9147_v56  ;;  %v9152_v34 = vpop.f32.mrb[5].mxu0 }
 0x231   :  { %v2448_v60 = vadd.f32 %v2447_v49, %v2433_v44  ;;  %v216_v43 = vadd.f32 %v9145_v52, %v215_v61  ;;  %v9155_v49 = vpop.f32.mrb[6].mxu0 }
 0x233   :  { %v2449_v4 = vadd.f32 %v2448_v60, %v2434_v59  ;;  %v217_v59 = vadd.f32 %v216_v43, %v9152_v34 }
 0x235   :  { %v2450_v11 = vadd.f32 %v2449_v4, %v2435_v3  ;;  %v9158_v3 = vpop.f32.mrb[7].mxu0  ;;  %v218_v4 = vadd.f32 %v9150_v54, %v217_v59 }
 0x237   :  { %v2451_v32 = vadd.f32 %v2450_v11, %v2436_v10  ;;  %v9161_v11 = vpop.f32.mrb[8].mxu0 }
 0x239   :  { %v2452_v39 = vadd.f32 %v2451_v32, %v2437_v63  ;;  %v219_v63 = vadd.f32 %v218_v4, %v9158_v3 }
 0x23b   :  { %v2453_v21 = vadd.f32 %v2452_v39, %v2438_v26  ;;  %v9164_v26 = vpop.f32.mrb[9].mxu0  ;;  %v220_v39 = vadd.f32 %v9155_v49, %v219_v63 }
 0x23d   :  { %v2454_v25 = vadd.f32 %v2453_v21, %v2439_v55  ;;  %v9167_v21 = vpop.f32.mrb[10].mxu0 }
 0x23f   :  { %v2455_v30 = vadd.f32 %v2454_v25, %v2440_v19  ;;  %v221_v19 = vadd.f32 %v220_v39, %v9164_v26 }
 0x241   :  { %v2456_v31 = vadd.f32 %v2455_v30, %v2441_v38  ;;  %v9170_v38 = vpop.f32.mrb[11].mxu0  ;;  %v222_v30 = vadd.f32 %v9161_v11, %v221_v19  ;;  %v5102_v19 = vld [vmem:[%s10141_s3] ss:$0 sm:$0xff] }
 0x243   :  { %v2457_v1 = vadd.f32 %v2456_v31, %v2442_v6  ;;  %v9173_v6 = vpop.f32.mrb[12].mxu0  ;;  %v223_v31 = vadd.f32 %v222_v30, %v9170_v38 }
 0x245   :  { %v2458_v5 = vadd.f32 %v2457_v1, %v2443_v35  ;;  %v5101_v35 = vld [vmem:[%s10140_s2] ss:$0 sm:$0xff]  ;;  %v9179_v1 = vpop.f32.mrb[13].mxu0 }
 0x246   :  { %v2477_v24 = vmul.f32 %v5101_v35, %v9079_v62  ;;  %v2479_v61 = vmul.f32 %v5101_v35, %v9083_v16  ;;  %v2481_v59 = vmul.f32 %v5101_v35, %v9087_v20  ;;  %v2485_v62 = vmul.f32 %v5101_v35, %v9095_v47 }
 0x247   :  { %v2459_v41 = vadd.f32 %v2458_v5, %v2444_v36  ;;  %v224_v36 = vadd.f32 %v9167_v21, %v223_v31  ;;  %v9182_v5 = vpop.f32.mrb[14].mxu0  ;;  %v2489_v20 = vmul.f32 %v5101_v35, %v9103_v51 }
 0x249   :  { %v2460_v23 = vadd.f32 %v2459_v41, %v2445_v14  ;;  %v225_v14 = vadd.f32 %v224_v36, %v9179_v1  ;;  %v2475_v41 = vmul.f32 %v5101_v35, %v9075_v46  ;;  %v2483_v46 = vmul.f32 %v5101_v35, %v9091_v12 }
 0x24b   :  { %v2461_v42 = vrot.slane %v2460_v23, 4  ;;  %v226_v43 = vadd.f32 %v9173_v6, %v225_v14 }
 0x24d   :  { %v2462_v28 = vadd.f32 %v2461_v42, %v2460_v23  ;;  %v2476_v23 = vmul.f32 %v5101_v35, %v9077_v58  ;;  %v2478_v42 = vmul.f32 %v5101_v35, %v9081_v2  ;;  %v2484_v58 = vmul.f32 %v5101_v35, %v9093_v17 }
 0x24e   :  { %v2486_v2 = vmul.f32 %v5101_v35, %v9097_v9 }
 0x24f   :  { %v2463_v44 = vrot.slane %v2462_v28, 2 }
 0x251   :  { %v2464_v60 = vadd.f32 %v2463_v44, %v2462_v28  ;;  %v9190_v28 = vpop.f32.mrb[15].mxu0  ;;  %v2480_v44 = vmul.f32 %v5101_v35, %v9085_v7  ;;  %v2488_v7 = vmul.f32 %v5101_v35, %v9101_v22 }
 0x252   :  { %v9201_v16 = vadd.f32 %v226_v43, %v9190_v28 }
 0x253   :  { %v2465_v10 = vrot.slane %v2464_v60, 1 }
 0x255   :  { %v2466_v32 = vadd.f32 %v2465_v10, %v2464_v60  ;;  %v2482_v60 = vmul.f32 %v5101_v35, %v9089_v8  ;;  %v2487_v10 = vmul.f32 %v5101_v35, %v9099_v18  ;;  %v2490_v8 = vmul.f32 %v5101_v35, %v9105_v27 }
 0x257   :  { %v2467_v55 = vmul.f32 0.0078125, %v2466_v32 }
 0x259   :  { %v2491_v25 = vadd.f32 1e-05, %v2467_v55 }
 0x25b   :  { %7789 = vrsqrt.f32 %v2491_v25 }
 0x265   :  { %v7790_v4 = vpop.eup %7789 }
 0x266   :  { %v2493_v63 = vmul.f32 %v7790_v4, %v2475_v41  ;;  %v2494_v12 = vmul.f32 %v7790_v4, %v2476_v23  ;;  %v2495_v32 = vmul.f32 %v7790_v4, %v2477_v24  ;;  %v2496_v17 = vmul.f32 %v7790_v4, %v2478_v42 }
 0x267   :  { %v2497_v39 = vmul.f32 %v7790_v4, %v2479_v61  ;;  %v2498_v47 = vmul.f32 %v7790_v4, %v2480_v44  ;;  %v2499_v55 = vmul.f32 %v7790_v4, %v2481_v59  ;;  %v2500_v9 = vmul.f32 %v7790_v4, %v2482_v60 }
 0x268   :  { %v2501_v25 = vmul.f32 %v7790_v4, %v2483_v46  ;;  %v2502_v18 = vmul.f32 %v7790_v4, %v2484_v58  ;;  %v2503_v30 = vmul.f32 %v7790_v4, %v2485_v62  ;;  %v2504_v22 = vmul.f32 %v7790_v4, %v2486_v2 }
 0x269   :  { %v2505_v31 = vmul.f32 %v7790_v4, %v2487_v10  ;;  %v2506_v51 = vmul.f32 %v7790_v4, %v2488_v7  ;;  %v2507_v36 = vmul.f32 %v7790_v4, %v2489_v20  ;;  %v2508_v27 = vmul.f32 %v7790_v4, %v2490_v8 }
 0x26a   :  { %v2516_v35 = vadd.f32 %v5102_v19, %v2493_v63  ;;  %v2519_v14 = vadd.f32 %v5102_v19, %v2496_v17  ;;  %v9210_v41 = vadd.f32 %v5102_v19, %v2497_v39  ;;  %v9212_v23 = vadd.f32 %v5102_v19, %v2498_v47 }
 0x26b   :  { %v9214_v24 = vadd.f32 %v5102_v19, %v2499_v55  ;;  %v2523_v42 = vadd.f32 %v5102_v19, %v2500_v9  ;;  %v9216_v61 = vadd.f32 %v5102_v19, %v2501_v25  ;;  %v9218_v43 = vadd.f32 %v5102_v19, %v2502_v18 }
 0x26c   :  { %v9220_v44 = vadd.f32 %v5102_v19, %v2503_v30  ;;  %v9222_v59 = vadd.f32 %v5102_v19, %v2504_v22  ;;  %v9224_v60 = vadd.f32 %v5102_v19, %v2505_v31  ;;  %v9226_v46 = vadd.f32 %v5102_v19, %v2506_v51 }
 0x26d   :  { %v9228_v58 = vadd.f32 %v5102_v19, %v2507_v36  ;;  %v2531_v62 = vadd.f32 %v5102_v19, %v2508_v27  ;;  %v10166_v2 = vmax.f32 %v9210_v41, 0.0  ;;  %v10165_v4 = vmax.f32 %v9212_v23, 0.0 }
 0x26e   :  { %v10164_v10 = vmax.f32 %v9214_v24, 0.0  ;;  %v2539_v7 = vmax.f32 %v2523_v42, 0.0  ;;  %v10163_v20 = vmax.f32 %v9216_v61, 0.0  ;;  %v10162_v8 = vmax.f32 %v9218_v43, 0.0 }
 0x26f   :  { %v10161_v63 = vmax.f32 %v9220_v44, 0.0  ;;  %v10160_v17 = vmax.f32 %v9222_v59, 0.0  ;;  %v10159_v39 = vmax.f32 %v9224_v60, 0.0  ;;  %v10158_v47 = vmax.f32 %v9226_v46, 0.0  ;;  %2593 = vst [vmem:[#allocation3 + $0x51] sm:$0xff] %v10166_v2  ;;  %2594 = vst [vmem:[#allocation3 + $0x61] sm:$0xff] %v10165_v4 }
 0x270   :  { %v10157_v55 = vmax.f32 %v9228_v58, 0.0  ;;  %v2547_v9 = vmax.f32 %v2531_v62, 0.0  ;;  %2597 = vst [vmem:[#allocation3 + $0xb1] sm:$0xff] %v10163_v20  ;;  %2598 = vst [vmem:[#allocation3 + $0xc1] sm:$0xff] %v10162_v8  ;;  %v9250_v25 = vmax.f32 %v2516_v35, 0.0  ;;  %v2517_v18 = vadd.f32 %v5102_v19, %v2494_v12  ;;  %v5107_v62 = vld [vmem:[%s10142_s4 + $0xa0] sm:$0xff] }
 0x271   :  { %2595 = vst [vmem:[#allocation3 + $0x71] sm:$0xff] %v10164_v10  ;;  %2596 = vst [vmem:[#allocation3 + $0x81] sm:$0xff] %v2539_v7  ;;  %v2518_v30 = vadd.f32 %v5102_v19, %v2495_v32  ;;  %v9260_v22 = vmax.f32 %v2519_v14, 0.0  ;;  %v228_v31 = vadd.f32 %v9182_v5, %v9201_v16  ;;  %v5105_v16 = vld [vmem:[%s10142_s4 + $0x90] sm:$0xff]  ;;  %v5106_v32 = vld [vmem:[%s10142_s4 + $0x98] sm:$0xff] }
 0x272   :  { %2599 = vst [vmem:[#allocation3 + $0xd1] sm:$0xff] %v10161_v63  ;;  %2600 = vst [vmem:[#allocation3 + $0xe1] sm:$0xff] %v10160_v17  ;;  %v9267_v12 = vmax.f32 %v2517_v18, 0.0  ;;  %v7261_v42 = vpack.c.bf16 %v5106_v32, %v5105_v16  ;;  %v5108_v18 = vld [vmem:[%s10142_s4 + $0xa8] sm:$0xff] }
 0x273   :  { %2601 = vst [vmem:[#allocation3 + $0xf1] sm:$0xff] %v10159_v39  ;;  %2602 = vst [vmem:[#allocation3 + $0x101] sm:$0xff] %v10158_v47  ;;  %v9269_v51 = vmax.f32 %v2518_v30, 0.0  ;;  %v229_v36 = vrot.slane %v228_v31, 4  ;;  %v5112_v39 = vld [vmem:[%s10142_s4 + $0xc8] sm:$0xff] }
 0x274   :  { %10209 = vst [vmem:[#allocation16_spill] sm:$0xff] %v9260_v22  ;;  %2603 = vst [vmem:[#allocation3 + $0x111] sm:$0xff] %v10157_v55  ;;  %v7265_v55 = vpack.c.bf16 %v5108_v18, %v5107_v62 }
 0x275   :  { %2604 = vst [vmem:[#allocation3 + $0x121] sm:$0xff] %v2547_v9  ;;  %2589 = vst [vmem:[#allocation3 + $0x11] sm:$0xff] %v9250_v25  ;;  %v230_v19 = vadd.f32 %v229_v36, %v228_v31  ;;  %v5109_v36 = vld [vmem:[%s10142_s4 + $0xb0] sm:$0xff] }
 0x276   :  { %2592 = vst [vmem:[#allocation3 + $0x41] sm:$0xff] %v9260_v22  ;;  %2590 = vst [vmem:[#allocation3 + $0x21] sm:$0xff] %v9267_v12  ;;  %v9328_v10 = vld [vmem:[#allocation3 + $0x50] sm:$0xff] }
 0x277   :  { %2591 = vst [vmem:[#allocation3 + $0x31] sm:$0xff] %v9269_v51  ;;  %v9280_v27 = vld [vmem:[#allocation3 + $0xc2] sm:$0xff]  ;;  %v231_v35 = vrot.slane %v230_v19, 2 }
 0x278   :  { %6893 = vmatprep.mubr.f32.mxu1 %v9280_v27 }
 0x279   :  { %v9283_v14 = vld [vmem:[#allocation3 + $0xd2] sm:$0xff]  ;;  %v9291_v9 = vld [vmem:[#allocation3 + $0xe2] sm:$0xff]  ;;  %v232_v30 = vadd.f32 %v231_v35, %v230_v19 }
 0x27a   :  { %6894 = vmatmul.mubr.f32.vlgmr.msra.gmra.mrb[16].mxu1 %v9283_v14  ;;  %v9305_v32 = vld [vmem:[#allocation3 + $0xf2] sm:$0xff]  ;;  %v5111_v35 = vld [vmem:[%s10142_s4 + $0xc0] sm:$0xff] }
 0x27b   :  { %6896 = vmatprep.mubr.f32.mxu1 %v9291_v9  ;;  %v233_v16 = vrot.slane %v232_v30, 1  ;;  %v5110_v19 = vld [vmem:[%s10142_s4 + $0xb8] sm:$0xff]  ;;  %v9316_v47 = vld [vmem:[#allocation3 + $0x102] sm:$0xff]  ;;  %v7273_v20 = vpack.c.bf16 %v5112_v39, %v5111_v35  ;;  %v9399_v35 = vld [vmem:[#allocation3 + $0xb0] sm:$0xff] }
 0x27c   :  { %v9288_v7 = vld [vmem:[#allocation3 + $0x10] sm:$0xff]  ;;  %v7269_v8 = vpack.c.bf16 %v5110_v19, %v5109_v36  ;;  %v9344_v39 = vld [vmem:[#allocation3 + $0x60] sm:$0xff] }
 0x27d   :  { %6434 = vmatmul.mubr.f32.vlgmr.msra.gmra.mrb[16].mxu0 %v9288_v7  ;;  %v9298_v31 = vld [vmem:[#allocation3 + $0x20] sm:$0xff]  ;;  %v234_v17 = vadd.f32 %v233_v16, %v232_v30  ;;  %v9326_v63 = vld [vmem:[#allocation3 + $0x112] sm:$0xff] }
 0x27e   :  { %7260 = vmatpush3.bf16.msra.mxu0 %v9072_v37  ;;  %6436 = vmatprep.mubr.f32.mxu0 %v9298_v31  ;;  %v9313_v37 = vld [vmem:[#allocation3 + $0x30] sm:$0xff]  ;;  %v9322_v62 = vld [vmem:[#allocation3 + $0x40] sm:$0xff] }
 0x27f   :  { %7262 = vmatprep.subr.bf16.mxu0 %v7261_v42  ;;  %6897 = vmatmul.mubr.f32.gmra.mrb[18].mxu1 %v9305_v32  ;;  %v236_v18 = vmul.f32 0.0078125, %v234_v17  ;;  %v4395_v30 = vld [vmem:[#allocation3 + $0x122] sm:$0xff]  ;;  %v9415_v13 = vld [vmem:[#allocation3 + $0xd0] sm:$0xff] }
 0x280   :  { %6899 = vmatprep.mubr.f32.mxu1 %v9316_v47  ;;  %v9426_v57 = vld [vmem:[#allocation3 + $0xe0] sm:$0xff]  ;;  %v9447_v29 = vld [vmem:[#allocation3 + $0x110] sm:$0xff] }
 0x281   :  { %6437 = vmatmul.mubr.f32.gmra.mrb[18].mxu0 %v9313_v37  ;;  %v9332_v16 = vsub.f32 %v9141_v15, %v236_v18  ;;  %v9335_v4 = vsub.f32 %v9139_v45, %v236_v18  ;;  %v9338_v2 = vsub.f32 %v9147_v56, %v236_v18  ;;  %v9341_v17 = vsub.f32 %v9145_v52, %v236_v18  ;;  %v9442_v40 = vld [vmem:[#allocation3 + $0x100] sm:$0xff] }
 0x282   :  { %6439 = vmatprep.mubr.f32.mxu0 %v9322_v62  ;;  %7264 = vmatpush3.bf16.msra.mxu0 %v7261_v42  ;;  %v9347_v42 = vsub.f32 %v9152_v34, %v236_v18  ;;  %v9350_v15 = vsub.f32 %v9150_v54, %v236_v18  ;;  %v9353_v45 = vsub.f32 %v9158_v3, %v236_v18 }
 0x283   :  { %7266 = vmatprep.subr.bf16.mxu0 %v7265_v55  ;;  %6900 = vmatmul.mubr.f32.gmra.mrb[20].mxu1 %v9326_v63  ;;  %v9357_v52 = vsub.f32 %v9155_v49, %v236_v18  ;;  %v9360_v56 = vsub.f32 %v9164_v26, %v236_v18  ;;  %v9363_v36 = vsub.f32 %v9161_v11, %v236_v18  ;;  %v9377_v49 = vld [vmem:[#allocation3 + $0x70] sm:$0xff]  ;;  %v5114_v26 = vld [vmem:[%s10142_s4 + $0xd8] sm:$0xff] }
 0x284   :  { %6902 = vmatprep.mubr.f32.mxu1 %v4395_v30  ;;  %v9366_v34 = vsub.f32 %v9170_v38, %v236_v18  ;;  %v9369_v54 = vsub.f32 %v9167_v21, %v236_v18  ;;  %v9372_v3 = vsub.f32 %v9179_v1, %v236_v18  ;;  %v5113_v11 = vld [vmem:[%s10142_s4 + $0xd0] sm:$0xff]  ;;  %v9386_v38 = vsub.f32 %v9190_v28, %v236_v18 }
 0x285   :  { %6440 = vmatmul.mubr.f32.gmra.mrb[20].mxu0 %v9328_v10  ;;  %v9389_v21 = vsub.f32 %v9182_v5, %v236_v18  ;;  %v254_v1 = vmul.f32 %v9335_v4, %v9335_v4  ;;  %v255_v19 = vmul.f32 %v9338_v2, %v9338_v2  ;;  %v7277_v28 = vpack.c.bf16 %v5114_v26, %v5113_v11  ;;  %v5115_v5 = vld [vmem:[%s10142_s4 + $0xe0] sm:$0xff] }
 0x286   :  { %6442 = vmatprep.mubr.f32.mxu0 %v9344_v39  ;;  %7268 = vmatpush3.bf16.msra.mxu0 %v7265_v55  ;;  %v9375_v55 = vsub.f32 %v9173_v6, %v236_v18  ;;  %v253_v6 = vmul.f32 %v9332_v16, %v9332_v16  ;;  %v5116_v18 = vld [vmem:[%s10142_s4 + $0xe8] sm:$0xff]  ;;  %v257_v11 = vmul.f32 %v9347_v42, %v9347_v42 }
 0x287   :  { %7270 = vmatprep.subr.bf16.mxu0 %v7269_v8  ;;  %v7281_v53 = vpack.c.bf16 %v5116_v18, %v5115_v5  ;;  %10210 = vst [vmem:[#allocation17_spill] sm:$0xff] %v9442_v40 }
 0x288   :  { %v269_v30 = vadd.f32 %v254_v1, %v253_v6  ;;  %v5118_v6 = vld [vmem:[%s10142_s4 + $0xf8] sm:$0xff]  ;;  %v258_v1 = vmul.f32 %v9350_v15, %v9350_v15 }
 0x289   :  { %6443 = vmatmul.mubr.f32.gmra.mrb[22].mxu0 %v9377_v49  ;;  %v7285_v18 = vpack.c.bf16 %v5118_v6, %v5117_v0  ;;  %v261_v0 = vmul.f32 %v9360_v56, %v9360_v56  ;;  %v2798_v6 = vld [vmem:[#allocation3 + $0x1] sm:$0xff] }
 0x28a   :  { %7272 = vmatpush3.bf16.msra.mxu0 %v7269_v8  ;;  %6445 = vmatprep.mubr.f32.mxu0 %v7820_v33  ;;  %v256_v8 = vmul.f32 %v9341_v17, %v9341_v17  ;;  %v9410_v33 = vld [vmem:[#allocation3 + $0xc0] sm:$0xff]  ;;  %v270_v26 = vadd.f32 %v269_v30, %v255_v19  ;;  %v259_v19 = vmul.f32 %v9353_v45, %v9353_v45  ;;  %v9431_v30 = vld [vmem:[#allocation3 + $0xf0] sm:$0xff] }
 0x28b   :  { %7274 = vmatprep.subr.bf16.mxu0 %v7273_v20 }
 0x28d   :  { %6446 = vmatmul.mubr.f32.gmra.mrb[24].mxu0 %v9399_v35 }
 0x28e   :  { %6448 = vmatprep.mubr.f32.mxu0 %v9410_v33  ;;  %7276 = vmatpush3.bf16.msra.mxu0 %v7273_v20  ;;  %v271_v20 = vadd.f32 %v270_v26, %v256_v8  ;;  %v5120_v8 = vld [vmem:[%s10142_s4 + $0x108] sm:$0xff]  ;;  %v260_v26 = vmul.f32 %v9357_v52, %v9357_v52 }
 0x28f   :  { %7278 = vmatprep.subr.bf16.mxu0 %v7277_v28 }
 0x290   :  { %v272_v5 = vadd.f32 %v271_v20, %v257_v11  ;;  %v7289_v20 = vpack.c.bf16 %v5120_v8, %v5119_v50  ;;  %v263_v50 = vmul.f32 %v9366_v34, %v9366_v34 }
 0x291   :  { %6449 = vmatmul.mubr.f32.gmra.mrb[26].mxu0 %v9415_v13 }
 0x292   :  { %6451 = vmatprep.mubr.f32.mxu0 %v9426_v57  ;;  %7280 = vmatpush3.bf16.msra.mxu0 %v7277_v28  ;;  %v273_v28 = vadd.f32 %v272_v5, %v258_v1  ;;  %v5121_v1 = vld [vmem:[%s10142_s4 + $0x110] sm:$0xff]  ;;  %v5122_v5 = vld [vmem:[%s10142_s4 + $0x118] sm:$0xff] }
 0x293   :  { %7282 = vmatprep.subr.bf16.mxu0 %v7281_v53  ;;  %v7293_v8 = vpack.c.bf16 %v5122_v5, %v5121_v1  ;;  %v5126_v1 = vld [vmem:[%s10142_s4 + $0x138] sm:$0xff]  ;;  %v266_v5 = vmul.f32 %v9375_v55, %v9375_v55 }
 0x294   :  { %v274_v11 = vadd.f32 %v273_v28, %v259_v19  ;;  %v5123_v28 = vld [vmem:[%s10142_s4 + $0x120] sm:$0xff] }
 0x295   :  { %6452 = vmatmul.mubr.f32.gmra.mrb[28].mxu0 %v9431_v30 }
 0x296   :  { %6454 = vmatprep.mubr.f32.mxu0 %v9442_v40  ;;  %7284 = vmatpush3.bf16.msra.mxu0 %v7281_v53  ;;  %v262_v53 = vmul.f32 %v9363_v36, %v9363_v36  ;;  %v275_v48 = vadd.f32 %v274_v11, %v260_v26  ;;  %v5124_v40 = vld [vmem:[%s10142_s4 + $0x128] sm:$0xff]  ;;  %v264_v26 = vmul.f32 %v9369_v54, %v9369_v54 }
 0x297   :  { %7286 = vmatprep.subr.bf16.mxu0 %v7285_v18 }
 0x298   :  { %v276_v19 = vadd.f32 %v275_v48, %v261_v0  ;;  %v265_v48 = vmul.f32 %v9372_v3, %v9372_v3  ;;  %v7297_v0 = vpack.c.bf16 %v5124_v40, %v5123_v28  ;;  %v267_v40 = vmul.f32 %v9386_v38, %v9386_v38  ;;  %v5128_v28 = vld [vmem:[%s10142_s4 + $0x148] sm:$0xff] }
 0x299   :  { %6455 = vmatmul.mubr.f32.gmra.mrb[30].mxu0 %v9447_v29 }
 0x29a   :  { %7288 = vmatpush3.bf16.msra.mxu0 %v7285_v18  ;;  %6489 = vmatprep.mubr.f32.mxu0 %v2798_v6  ;;  %v277_v11 = vadd.f32 %v276_v19, %v262_v53  ;;  %v5125_v6 = vld [vmem:[%s10142_s4 + $0x130] sm:$0xff]  ;;  %v5127_v19 = vld [vmem:[%s10142_s4 + $0x140] sm:$0xff] }
 0x29b   :  { %7290 = vmatprep.subr.bf16.mxu0 %v7289_v20 }
 0x29c   :  { %v278_v18 = vadd.f32 %v277_v11, %v263_v50  ;;  %v7301_v50 = vpack.c.bf16 %v5126_v1, %v5125_v6  ;;  %v2806_v6 = vld [vmem:[#allocation3 + $0xa1] sm:$0xff]  ;;  %v7305_v1 = vpack.c.bf16 %v5128_v28, %v5127_v19  ;;  %v10214_v28 = vmax.f32 %v9216_v61, 0.0 }
 0x29d   :  { %6490 = vmatmul.mubr.f32.vlgmr.msra.gmra.mrb[16].mxu0 %v9250_v25  ;;  %v10217_v61 = vmax.f32 %v9222_v59, 0.0 }
 0x29e   :  { %6492 = vmatprep.mubr.f32.mxu0 %v9267_v12  ;;  %7292 = vmatpush3.bf16.msra.mxu0 %v7289_v20  ;;  %v279_v53 = vadd.f32 %v278_v18, %v264_v26  ;;  %v268_v26 = vmul.f32 %v9389_v21, %v9389_v21  ;;  %v10212_v18 = vmax.f32 %v9212_v23, 0.0 }
 0x29f   :  { %7294 = vmatprep.subr.bf16.mxu0 %v7293_v8 }
 0x2a0   :  { %v280_v20 = vadd.f32 %v279_v53, %v265_v48  ;;  %v5129_v53 = vld [vmem:[%s10142_s4 + $0x150] sm:$0xff] }
 0x2a1   :  { %6493 = vmatmul.mubr.f32.gmra.mrb[18].mxu0 %v9269_v51 }
 0x2a2   :  { %6495 = vmatprep.mubr.f32.mxu0 %v9260_v22  ;;  %7296 = vmatpush3.bf16.msra.mxu0 %v7293_v8  ;;  %v281_v11 = vadd.f32 %v280_v20, %v266_v5  ;;  %v10211_v8 = vmax.f32 %v9210_v41, 0.0  ;;  %v5130_v22 = vld [vmem:[%s10142_s4 + $0x158] sm:$0xff]  ;;  %v10213_v41 = vmax.f32 %v9214_v24, 0.0  ;;  %v5132_v20 = vld [vmem:[%s10142_s4 + $0x168] sm:$0xff]  ;;  %v10215_v24 = vmax.f32 %v9218_v43, 0.0 }
 0x2a3   :  { %7298 = vmatprep.subr.bf16.mxu0 %v7297_v0 }
 0x2a4   :  { %v282_v48 = vadd.f32 %v281_v11, %v267_v40  ;;  %v5131_v40 = vld [vmem:[%s10142_s4 + $0x160] sm:$0xff]  ;;  %v5134_v11 = vld [vmem:[%s10142_s4 + $0x178] sm:$0xff] }
 0x2a5   :  { %6496 = vmatmul.mubr.f32.gmra.mrb[20].mxu0 %v10211_v8 }
 0x2a6   :  { %6498 = vmatprep.mubr.f32.mxu0 %v10212_v18  ;;  %7300 = vmatpush3.bf16.msra.mxu0 %v7297_v0  ;;  %v283_v5 = vadd.f32 %v282_v48, %v268_v26  ;;  %v7309_v0 = vpack.c.bf16 %v5130_v22, %v5129_v53  ;;  %v7313_v26 = vpack.c.bf16 %v5132_v20, %v5131_v40  ;;  %v5133_v22 = vld [vmem:[%s10142_s4 + $0x170] sm:$0xff]  ;;  %v10216_v18 = vmax.f32 %v9220_v44, 0.0  ;;  %v5138_v40 = vld [vmem:[%s10142_s4 + $0x198] sm:$0xff] }
 0x2a7   :  { %7302 = vmatprep.subr.bf16.mxu0 %v7301_v50  ;;  %v7317_v48 = vpack.c.bf16 %v5134_v11, %v5133_v22  ;;  %v10219_v44 = vmax.f32 %v9226_v46, 0.0  ;;  %v9557_v22 = vld [vmem:[#allocation3 + $0x32] sm:$0xff] }
 0x2a8   :  { %v284_v23 = vrot.slane %v283_v5, 4  ;;  %v5142_v11 = vld [vmem:[%s10142_s4 + $0x1b8] sm:$0xff] }
 0x2a9   :  { %6499 = vmatmul.mubr.f32.gmra.mrb[22].mxu0 %v10213_v41  ;;  %v3024_v41 = vld [vmem:[#allocation3 + $0x2] sm:$0xff] }
 0x2aa   :  { %7304 = vmatpush3.bf16.msra.mxu0 %v7301_v50  ;;  %6501 = vmatprep.mubr.f32.mxu0 %v2806_v6  ;;  %v285_v19 = vadd.f32 %v284_v23, %v283_v5  ;;  %v5135_v6 = vld [vmem:[%s10142_s4 + $0x180] sm:$0xff]  ;;  %v10218_v5 = vmax.f32 %v9224_v60, 0.0  ;;  %v10220_v60 = vmax.f32 %v9228_v58, 0.0 }
 0x2ab   :  { %7306 = vmatprep.subr.bf16.mxu0 %v7305_v1 }
 0x2ac   :  { %v286_v50 = vrot.slane %v285_v19, 2 }
 0x2ad   :  { %6502 = vmatmul.mubr.f32.gmra.mrb[24].mxu0 %v10214_v28  ;;  %v5139_v28 = vld [vmem:[%s10142_s4 + $0x1a0] sm:$0xff] }
 0x2ae   :  { %6504 = vmatprep.mubr.f32.mxu0 %v10215_v24  ;;  %7308 = vmatpush3.bf16.msra.mxu0 %v7305_v1  ;;  %v287_v8 = vadd.f32 %v286_v50, %v285_v19  ;;  %v5136_v1 = vld [vmem:[%s10142_s4 + $0x188] sm:$0xff]  ;;  %v9542_v19 = vld [vmem:[#allocation3 + $0x12] sm:$0xff] }
 0x2af   :  { %7310 = vmatprep.subr.bf16.mxu0 %v7309_v0  ;;  %v7321_v23 = vpack.c.bf16 %v5136_v1, %v5135_v6  ;;  %v5140_v24 = vld [vmem:[%s10142_s4 + $0x1a8] sm:$0xff] }
 0x2b0   :  { %v288_v43 = vrot.slane %v287_v8, 1  ;;  %v9551_v50 = vld [vmem:[#allocation3 + $0x22] sm:$0xff]  ;;  %v7329_v58 = vpack.c.bf16 %v5140_v24, %v5139_v28  ;;  %v5145_v28 = vld [vmem:[%s10142_s4 + $0x1d0] sm:$0xff]  ;;  %v5146_v24 = vld [vmem:[%s10142_s4 + $0x1d8] sm:$0xff] }
 0x2b1   :  { %6505 = vmatmul.mubr.f32.gmra.mrb[26].mxu0 %v10216_v18  ;;  %v9568_v18 = vld [vmem:[#allocation3 + $0x42] sm:$0xff] }
 0x2b2   :  { %6507 = vmatprep.mubr.f32.mxu0 %v10217_v61  ;;  %7312 = vmatpush3.bf16.msra.mxu0 %v7309_v0  ;;  %v289_v53 = vadd.f32 %v288_v43, %v287_v8  ;;  %v5137_v0 = vld [vmem:[%s10142_s4 + $0x190] sm:$0xff]  ;;  %v9565_v8 = vld [vmem:[%s10146_s8] ss:$0 sm:$0xff] }
 0x2b3   :  { %7314 = vmatprep.subr.bf16.mxu0 %v7313_v26  ;;  %v7325_v46 = vpack.c.bf16 %v5138_v40, %v5137_v0  ;;  %v307_v61 = vmul.f32 %v9565_v8, %v9363_v36  ;;  %v308_v43 = vmul.f32 %v9565_v8, %v9366_v34  ;;  %v310_v6 = vmul.f32 %v9565_v8, %v9372_v3  ;;  %v5143_v3 = vld [vmem:[%s10142_s4 + $0x1c0] sm:$0xff] }
 0x2b4   :  { %v290_v59 = vmul.f32 0.0078125, %v289_v53  ;;  %v311_v1 = vmul.f32 %v9565_v8, %v9375_v55  ;;  %v312_v53 = vmul.f32 %v9565_v8, %v9386_v38  ;;  %v313_v36 = vmul.f32 %v9565_v8, %v9389_v21  ;;  %v5144_v55 = vld [vmem:[%s10142_s4 + $0x1c8] sm:$0xff] }
 0x2b5   :  { %6508 = vmatmul.mubr.f32.gmra.mrb[28].mxu0 %v10218_v5  ;;  %v9596_v38 = vld [vmem:[#allocation3 + $0x62] sm:$0xff] }
 0x2b6   :  { %6510 = vmatprep.mubr.f32.mxu0 %v10219_v44  ;;  %7316 = vmatpush3.bf16.msra.mxu0 %v7313_v26  ;;  %v314_v20 = vadd.f32 1e-05, %v290_v59  ;;  %v5141_v26 = vld [vmem:[%s10142_s4 + $0x1b0] sm:$0xff] }
 0x2b7   :  { %7318 = vmatprep.subr.bf16.mxu0 %v7317_v48  ;;  %v7333_v34 = vpack.c.bf16 %v5142_v11, %v5141_v26  ;;  %v9629_v26 = vld [vmem:[#allocation3 + $0xb2] sm:$0xff]  ;;  %v5147_v11 = vld [vmem:[%s10142_s4 + $0x1e0] sm:$0xff] }
 0x2b8   :  { %7791 = vrsqrt.f32 %v314_v20  ;;  %v3032_v20 = vld [vmem:[#allocation3 + $0xa2] sm:$0xff] }
 0x2b9   :  { %6511 = vmatmul.mubr.f32.gmra.mrb[30].mxu0 %v10220_v60  ;;  %v7337_v60 = vpack.c.bf16 %v5144_v55, %v5143_v3 }
 0x2ba   :  { %7320 = vmatpush3.bf16.msra.mxu0 %v7317_v48  ;;  %6545 = vmatprep.mubr.f32.mxu0 %v3024_v41  ;;  %v309_v48 = vmul.f32 %v9565_v8, %v9369_v54  ;;  %v9587_v54 = vld [vmem:[#allocation3 + $0x52] sm:$0xff] }
 0x2bb   :  { %7322 = vmatprep.subr.bf16.mxu0 %v7321_v23 }
 0x2bd   :  { %6546 = vmatmul.mubr.f32.vlgmr.msra.gmra.mrb[16].mxu0 %v9542_v19 }
 0x2be   :  { %6548 = vmatprep.mubr.f32.mxu0 %v9551_v50  ;;  %7324 = vmatpush3.bf16.msra.mxu0 %v7321_v23 }
 0x2bf   :  { %7326 = vmatprep.subr.bf16.mxu0 %v7325_v46 }
 0x2c1   :  { %6549 = vmatmul.mubr.f32.gmra.mrb[18].mxu0 %v9557_v22 }
 0x2c2   :  { %6551 = vmatprep.mubr.f32.mxu0 %v9568_v18  ;;  %7328 = vmatpush3.bf16.msra.mxu0 %v7325_v46  ;;  %v9585_v5 = vpop.eup %7791  ;;  %v9620_v46 = vld [vmem:[#allocation3 + $0x72] sm:$0xff] }
 0x2c3   :  { %7330 = vmatprep.subr.bf16.mxu0 %v7329_v58  ;;  %v9599_v21 = vmul.f32 %v9585_v5, %v307_v61  ;;  %v9602_v44 = vmul.f32 %v9585_v5, %v308_v43  ;;  %v9605_v59 = vmul.f32 %v9585_v5, %v309_v48  ;;  %v9608_v41 = vmul.f32 %v9585_v5, %v310_v6  ;;  %v5148_v61 = vld [vmem:[%s10142_s4 + $0x1e8] sm:$0xff] }
 0x2c4   :  { %v9612_v23 = vmul.f32 %v9585_v5, %v311_v1  ;;  %v9615_v0 = vmul.f32 %v9585_v5, %v312_v53  ;;  %v9618_v40 = vmul.f32 %v9585_v5, %v313_v36  ;;  %v298_v43 = vmul.f32 %v9565_v8, %v9332_v16  ;;  %v5149_v36 = vld [vmem:[%s10142_s4 + $0x1f0] sm:$0xff]  ;;  %v5150_v16 = vld [vmem:[%s10142_s4 + $0x1f8] sm:$0xff] }
 0x2c5   :  { %6552 = vmatmul.mubr.f32.gmra.mrb[20].mxu0 %v9587_v54  ;;  %v299_v48 = vmul.f32 %v9565_v8, %v9335_v4  ;;  %v7345_v6 = vpack.c.bf16 %v5148_v61, %v5147_v11  ;;  %v300_v4 = vmul.f32 %v9565_v8, %v9338_v2  ;;  %v5152_v2 = vld [vmem:[%s10142_s4 + $0x208] sm:$0xff] }
 0x2c6   :  { %6554 = vmatprep.mubr.f32.mxu0 %v9596_v38  ;;  %7332 = vmatpush3.bf16.msra.mxu0 %v7329_v58  ;;  %v7341_v58 = vpack.c.bf16 %v5146_v24, %v5145_v28  ;;  %v9644_v1 = vmul.f32 %v9585_v5, %v298_v43  ;;  %v9732_v43 = vld [vmem:[#allocation3 + $0x80] sm:$0xff] }
 0x2c7   :  { %7334 = vmatprep.subr.bf16.mxu0 %v7333_v34  ;;  %v9647_v53 = vmul.f32 %v9585_v5, %v299_v48  ;;  %v9662_v3 = vmul.f32 %v9585_v5, %v300_v4  ;;  %v5162_v48 = vld [vmem:[%s10142_s4 + $0x258] sm:$0xff]  ;;  %v5168_v4 = vld [vmem:[%s10142_s4 + $0x288] sm:$0xff] }
 0x2c9   :  { %6555 = vmatmul.mubr.f32.gmra.mrb[22].mxu0 %v9620_v46 }
 0x2ca   :  { %7336 = vmatpush3.bf16.msra.mxu0 %v7333_v34  ;;  %6557 = vmatprep.mubr.f32.mxu0 %v3032_v20  ;;  %v7349_v34 = vpack.c.bf16 %v5150_v16, %v5149_v36  ;;  %v5166_v16 = vld [vmem:[%s10142_s4 + $0x278] sm:$0xff] }
 0x2cb   :  { %7338 = vmatprep.subr.bf16.mxu0 %v7337_v60 }
 0x2cd   :  { %6558 = vmatmul.mubr.f32.gmra.mrb[24].mxu0 %v9629_v26 }
 0x2ce   :  { %6560 = vmatprep.mubr.f32.mxu0 %v9280_v27  ;;  %7340 = vmatpush3.bf16.msra.mxu0 %v7337_v60  ;;  %v301_v27 = vmul.f32 %v9565_v8, %v9341_v17  ;;  %v303_v17 = vmul.f32 %v9565_v8, %v9350_v15  ;;  %v305_v15 = vmul.f32 %v9565_v8, %v9357_v52 }
 0x2cf   :  { %7342 = vmatprep.subr.bf16.mxu0 %v7341_v58 }
 0x2d0   :  { %v9665_v55 = vmul.f32 %v9585_v5, %v301_v27  ;;  %v9683_v28 = vmul.f32 %v9585_v5, %v303_v17  ;;  %v9703_v61 = vmul.f32 %v9585_v5, %v305_v15  ;;  %v10221_v27 = vld [vmem:[#allocation17_spill] sm:$0xff]  ;;  %v5175_v15 = vld [vmem:[%s10142_s4 + $0x2c0] sm:$0xff] }
 0x2d1   :  { %6561 = vmatmul.mubr.f32.gmra.mrb[26].mxu0 %v9283_v14  ;;  %v5151_v14 = vld [vmem:[%s10142_s4 + $0x200] sm:$0xff]  ;;  %v5172_v17 = vld [vmem:[%s10142_s4 + $0x2a8] sm:$0xff] }
 0x2d2   :  { %6563 = vmatprep.mubr.f32.mxu0 %v9291_v9  ;;  %7344 = vmatpush3.bf16.msra.mxu0 %v7341_v58  ;;  %v302_v9 = vmul.f32 %v9565_v8, %v9347_v42  ;;  %v7353_v20 = vpack.c.bf16 %v5152_v2, %v5151_v14  ;;  %v5154_v42 = vld [vmem:[%s10142_s4 + $0x218] sm:$0xff]  ;;  %v306_v58 = vmul.f32 %v9565_v8, %v9360_v56  ;;  %v5157_v56 = vld [vmem:[%s10142_s4 + $0x230] sm:$0xff] }
 0x2d3   :  { %7346 = vmatprep.subr.bf16.mxu0 %v7345_v6  ;;  %v5170_v14 = vld [vmem:[%s10142_s4 + $0x298] sm:$0xff] }
 0x2d4   :  { %v9680_v60 = vmul.f32 %v9585_v5, %v302_v9  ;;  %v9714_v52 = vmul.f32 %v9585_v5, %v306_v58  ;;  %v4396_v2 = vld [vmem:[#allocation3 + $0x132] sm:$0xff]  ;;  %v5171_v9 = vld [vmem:[%s10142_s4 + $0x2a0] sm:$0xff] }
 0x2d5   :  { %6564 = vmatmul.mubr.f32.gmra.mrb[28].mxu0 %v9305_v32  ;;  %v5153_v32 = vld [vmem:[%s10142_s4 + $0x210] sm:$0xff]  ;;  %6903 = vmatmul.mubr.f32.gmra.mrb[22].mxu1 %v4396_v2 }
 0x2d6   :  { %6566 = vmatprep.mubr.f32.mxu0 %v9316_v47  ;;  %7348 = vmatpush3.bf16.msra.mxu0 %v7345_v6  ;;  %v304_v47 = vmul.f32 %v9565_v8, %v9353_v45  ;;  %v7357_v24 = vpack.c.bf16 %v5154_v42, %v5153_v32  ;;  %v5156_v45 = vld [vmem:[%s10142_s4 + $0x228] sm:$0xff]  ;;  %v5158_v8 = vld [vmem:[%s10142_s4 + $0x238] sm:$0xff]  ;;  %v10222_v42 = vld [vmem:[#allocation16_spill] sm:$0xff] }
 0x2d7   :  { %7350 = vmatprep.subr.bf16.mxu0 %v7349_v34  ;;  %v5164_v6 = vld [vmem:[%s10142_s4 + $0x268] sm:$0xff]  ;;  %v5174_v32 = vld [vmem:[%s10142_s4 + $0x2b8] sm:$0xff] }
 0x2d8   :  { %v9700_v11 = vmul.f32 %v9585_v5, %v304_v47  ;;  %v5160_v5 = vld [vmem:[%s10142_s4 + $0x248] sm:$0xff]  ;;  %v9791_v47 = vld [vmem:[#allocation3 + $0x51] sm:$0xff] }
 0x2d9   :  { %6567 = vmatmul.mubr.f32.gmra.mrb[30].mxu0 %v9326_v63  ;;  %v5155_v63 = vld [vmem:[%s10142_s4 + $0x220] sm:$0xff]  ;;  %v9803_v58 = vld [vmem:[#allocation3 + $0x71] sm:$0xff] }
 0x2da   :  { %7352 = vmatpush3.bf16.msra.mxu0 %v7349_v34  ;;  %6601 = vmatprep.mubr.f32.mxu0 %v9288_v7  ;;  %v7361_v7 = vpack.c.bf16 %v5156_v45, %v5155_v63  ;;  %v9766_v34 = vld [vmem:[#allocation3 + $0x120] sm:$0xff] }
 0x2db   :  { %7354 = vmatprep.subr.bf16.mxu0 %v7353_v20  ;;  %v9806_v45 = vld [vmem:[#allocation3 + $0x81] sm:$0xff] }
 0x2dd   :  { %6602 = vmatmul.mubr.f32.vlgmr.msra.gmra.mrb[16].mxu0 %v9298_v31  ;;  %v7365_v31 = vpack.c.bf16 %v5158_v8, %v5157_v56  ;;  %v5178_v56 = vld [vmem:[%s10142_s4 + $0x2d8] sm:$0xff] }
 0x2de   :  { %6604 = vmatprep.mubr.f32.mxu0 %v9313_v37  ;;  %7356 = vmatpush3.bf16.msra.mxu0 %v7353_v20  ;;  %v5159_v37 = vld [vmem:[%s10142_s4 + $0x240] sm:$0xff]  ;;  %v7393_v20 = vpack.c.bf16 %v5172_v17, %v5171_v9  ;;  %v3484_v8 = vld [vmem:[#allocation3 + $0xb1] sm:$0xff]  ;;  %v5188_v9 = vld [vmem:[%s10142_s4 + $0x328] sm:$0xff] }
 0x2df   :  { %7358 = vmatprep.subr.bf16.mxu0 %v7357_v24 }
 0x2e1   :  { %6605 = vmatmul.mubr.f32.gmra.mrb[18].mxu0 %v9322_v62  ;;  %v7369_v62 = vpack.c.bf16 %v5160_v5, %v5159_v37  ;;  %v9815_v37 = vld [vmem:[#allocation3 + $0xc1] sm:$0xff] }
 0x2e2   :  { %6607 = vmatprep.mubr.f32.mxu0 %v9328_v10  ;;  %7360 = vmatpush3.bf16.msra.mxu0 %v7357_v24  ;;  %v5161_v10 = vld [vmem:[%s10142_s4 + $0x250] sm:$0xff]  ;;  %v5176_v24 = vld [vmem:[%s10142_s4 + $0x2c8] sm:$0xff]  ;;  %v5179_v5 = vld [vmem:[%s10142_s4 + $0x2e0] sm:$0xff] }
 0x2e3   :  { %7362 = vmatprep.subr.bf16.mxu0 %v7361_v7  ;;  %v7401_v63 = vpack.c.bf16 %v5176_v24, %v5175_v15  ;;  %v5196_v15 = vld [vmem:[%s10142_s4 + $0x368] sm:$0xff]  ;;  %v3712_v24 = vld [vmem:[#allocation3 + $0xd2] sm:$0xff] }
 0x2e5   :  { %6608 = vmatmul.mubr.f32.gmra.mrb[20].mxu0 %v9344_v39  ;;  %v7373_v39 = vpack.c.bf16 %v5162_v48, %v5161_v10  ;;  %v9824_v10 = vld [vmem:[#allocation3 + $0xd1] sm:$0xff] }
 0x2e6   :  { %6610 = vmatprep.mubr.f32.mxu0 %v9377_v49  ;;  %7364 = vmatpush3.bf16.msra.mxu0 %v7361_v7  ;;  %v5163_v49 = vld [vmem:[%s10142_s4 + $0x260] sm:$0xff]  ;;  %v5177_v7 = vld [vmem:[%s10142_s4 + $0x2d0] sm:$0xff] }
 0x2e7   :  { %7366 = vmatprep.subr.bf16.mxu0 %v7365_v31  ;;  %v7377_v36 = vpack.c.bf16 %v5164_v6, %v5163_v49  ;;  %v5181_v49 = vld [vmem:[%s10142_s4 + $0x2f0] sm:$0xff]  ;;  %v5182_v6 = vld [vmem:[%s10142_s4 + $0x2f8] sm:$0xff] }
 0x2e9   :  { %6611 = vmatmul.mubr.f32.gmra.mrb[22].mxu0 %v9732_v43 }
 0x2ea   :  { %6613 = vmatprep.mubr.f32.mxu0 %v9399_v35  ;;  %7368 = vmatpush3.bf16.msra.mxu0 %v7365_v31  ;;  %v5165_v35 = vld [vmem:[%s10142_s4 + $0x270] sm:$0xff]  ;;  %v7405_v31 = vpack.c.bf16 %v5178_v56, %v5177_v7  ;;  %v3713_v7 = vld [vmem:[#allocation3 + $0xe2] sm:$0xff]  ;;  %v5198_v56 = vld [vmem:[%s10142_s4 + $0x378] sm:$0xff] }
 0x2eb   :  { %7370 = vmatprep.subr.bf16.mxu0 %v7369_v62 }
 0x2ed   :  { %6614 = vmatmul.mubr.f32.gmra.mrb[24].mxu0 %v9410_v33  ;;  %v7381_v33 = vpack.c.bf16 %v5166_v16, %v5165_v35  ;;  %v7413_v35 = vpack.c.bf16 %v5182_v6, %v5181_v49  ;;  %v9839_v16 = vld [vmem:[#allocation3 + $0x101] sm:$0xff]  ;;  %v3716_v49 = vld [vmem:[#allocation3 + $0x112] sm:$0xff] }
 0x2ee   :  { %6616 = vmatprep.mubr.f32.mxu0 %v9415_v13  ;;  %7372 = vmatpush3.bf16.msra.mxu0 %v7369_v62  ;;  %v5167_v13 = vld [vmem:[%s10142_s4 + $0x280] sm:$0xff]  ;;  %v5180_v62 = vld [vmem:[%s10142_s4 + $0x2e8] sm:$0xff] }
 0x2ef   :  { %7374 = vmatprep.subr.bf16.mxu0 %v7373_v39  ;;  %v7409_v48 = vpack.c.bf16 %v5180_v62, %v5179_v5  ;;  %v3715_v5 = vld [vmem:[#allocation3 + $0x102] sm:$0xff] }
 0x2f0   :  { %v5199_v62 = vld [vmem:[%s10142_s4 + $0x380] sm:$0xff] }
 0x2f1   :  { %6617 = vmatmul.mubr.f32.gmra.mrb[26].mxu0 %v9426_v57  ;;  %v7385_v57 = vpack.c.bf16 %v5168_v4, %v5167_v13  ;;  %v5184_v13 = vld [vmem:[%s10142_s4 + $0x308] sm:$0xff]  ;;  %v9848_v4 = vld [vmem:[#allocation3 + $0x111] sm:$0xff] }
 0x2f2   :  { %6619 = vmatprep.mubr.f32.mxu0 %v9431_v30  ;;  %7376 = vmatpush3.bf16.msra.mxu0 %v7373_v39  ;;  %v5169_v30 = vld [vmem:[%s10142_s4 + $0x290] sm:$0xff]  ;;  %v9827_v39 = vld [vmem:[#allocation3 + $0xe1] sm:$0xff] }
 0x2f3   :  { %7378 = vmatprep.subr.bf16.mxu0 %v7377_v36 }
 0x2f5   :  { %6620 = vmatmul.mubr.f32.gmra.mrb[28].mxu0 %v10221_v27 }
 0x2f6   :  { %6622 = vmatprep.mubr.f32.mxu0 %v9447_v29  ;;  %7380 = vmatpush3.bf16.msra.mxu0 %v7377_v36  ;;  %v7389_v29 = vpack.c.bf16 %v5170_v14, %v5169_v30  ;;  %v9836_v36 = vld [vmem:[#allocation3 + $0xf1] sm:$0xff] }
 0x2f7   :  { %7382 = vmatprep.subr.bf16.mxu0 %v7381_v33  ;;  %v5185_v30 = vld [vmem:[%s10142_s4 + $0x310] sm:$0xff]  ;;  %v5186_v14 = vld [vmem:[%s10142_s4 + $0x318] sm:$0xff] }
 0x2f8   :  { %v7421_v2 = vpack.c.bf16 %v5186_v14, %v5185_v30  ;;  %v3930_v14 = vld [vmem:[#allocation3 + $0x30] sm:$0xff] }
 0x2f9   :  { %6623 = vmatmul.mubr.f32.gmra.mrb[30].mxu0 %v9766_v34 }
 0x2fa   :  { %7384 = vmatpush3.bf16.msra.mxu0 %v7381_v33  ;;  %6657 = vmatprep.mubr.f32.mxu0 %v9250_v25  ;;  %v5173_v25 = vld [vmem:[%s10142_s4 + $0x2b0] sm:$0xff]  ;;  %v5183_v33 = vld [vmem:[%s10142_s4 + $0x300] sm:$0xff] }
 0x2fb   :  { %7386 = vmatprep.subr.bf16.mxu0 %v7385_v57  ;;  %v7417_v27 = vpack.c.bf16 %v5184_v13, %v5183_v33  ;;  %v5201_v33 = vld [vmem:[%s10142_s4 + $0x390] sm:$0xff]  ;;  %v5202_v13 = vld [vmem:[%s10142_s4 + $0x398] sm:$0xff] }
 0x2fc   :  { %v7453_v30 = vpack.c.bf16 %v5202_v13, %v5201_v33  ;;  %v3942_v13 = vld [vmem:[#allocation3 + $0x110] sm:$0xff] }
 0x2fd   :  { %6658 = vmatmul.mubr.f32.vlgmr.msra.gmra.mrb[16].mxu0 %v9267_v12  ;;  %v7397_v12 = vpack.c.bf16 %v5174_v32, %v5173_v25  ;;  %v5192_v25 = vld [vmem:[%s10142_s4 + $0x348] sm:$0xff] }
 0x2fe   :  { %6660 = vmatprep.mubr.f32.mxu0 %v9269_v51  ;;  %7388 = vmatpush3.bf16.msra.mxu0 %v7385_v57  ;;  %v9794_v51 = vld [vmem:[#allocation3 + $0x61] sm:$0xff] }
 0x2ff   :  { %7390 = vmatprep.subr.bf16.mxu0 %v7389_v29  ;;  %v9851_v57 = vld [vmem:[#allocation3 + $0x121] sm:$0xff] }
 0x300   :  { %v9885_v32 = vld [vmem:[#allocation3 + $0x82] sm:$0xff] }
 0x301   :  { %6661 = vmatmul.mubr.f32.gmra.mrb[18].mxu0 %v10222_v42  ;;  %v5194_v42 = vld [vmem:[%s10142_s4 + $0x358] sm:$0xff] }
 0x302   :  { %6663 = vmatprep.mubr.f32.mxu0 %v9791_v47  ;;  %7392 = vmatpush3.bf16.msra.mxu0 %v7389_v29  ;;  %v5187_v29 = vld [vmem:[%s10142_s4 + $0x320] sm:$0xff] }
 0x303   :  { %7394 = vmatprep.subr.bf16.mxu0 %v7393_v20  ;;  %v7425_v17 = vpack.c.bf16 %v5188_v9, %v5187_v29  ;;  %v5204_v29 = vld [vmem:[%s10142_s4 + $0x3a8] sm:$0xff]  ;;  %v3931_v9 = vld [vmem:[#allocation3 + $0x40] sm:$0xff] }
 0x305   :  { %6664 = vmatmul.mubr.f32.gmra.mrb[20].mxu0 %v9794_v51 }
 0x306   :  { %6666 = vmatprep.mubr.f32.mxu0 %v9803_v58  ;;  %7396 = vmatpush3.bf16.msra.mxu0 %v7393_v20  ;;  %v5190_v20 = vld [vmem:[%s10142_s4 + $0x338] sm:$0xff] }
 0x307   :  { %7398 = vmatprep.subr.bf16.mxu0 %v7397_v12 }
 0x309   :  { %6667 = vmatmul.mubr.f32.gmra.mrb[22].mxu0 %v9806_v45 }
 0x30a   :  { %6669 = vmatprep.mubr.f32.mxu0 %v3484_v8  ;;  %7400 = vmatpush3.bf16.msra.mxu0 %v7397_v12  ;;  %v5195_v12 = vld [vmem:[%s10142_s4 + $0x360] sm:$0xff]  ;;  %v3714_v8 = vld [vmem:[#allocation3 + $0xf2] sm:$0xff] }
 0x30b   :  { %7402 = vmatprep.subr.bf16.mxu0 %v7401_v63 }
 0x30d   :  { %6670 = vmatmul.mubr.f32.gmra.mrb[24].mxu0 %v9815_v37 }
 0x30e   :  { %6672 = vmatprep.mubr.f32.mxu0 %v9824_v10  ;;  %7404 = vmatpush3.bf16.msra.mxu0 %v7401_v63  ;;  %v7441_v63 = vpack.c.bf16 %v5196_v15, %v5195_v12  ;;  %v5210_v12 = vld [vmem:[%s10142_s4 + $0x3d8] sm:$0xff]  ;;  %v7795_v15 = vld [vmem:[#allocation3] sm:$0xff] }
 0x30f   :  { %7406 = vmatprep.subr.bf16.mxu0 %v7405_v31 }
 0x311   :  { %6673 = vmatmul.mubr.f32.gmra.mrb[26].mxu0 %v9827_v39 }
 0x312   :  { %6675 = vmatprep.mubr.f32.mxu0 %v9836_v36  ;;  %7408 = vmatpush3.bf16.msra.mxu0 %v7405_v31 }
 0x313   :  { %7410 = vmatprep.subr.bf16.mxu0 %v7409_v48 }
 0x315   :  { %6676 = vmatmul.mubr.f32.gmra.mrb[28].mxu0 %v9839_v16 }
 0x316   :  { %6678 = vmatprep.mubr.f32.mxu0 %v9848_v4  ;;  %7412 = vmatpush3.bf16.msra.mxu0 %v7409_v48  ;;  %v5200_v48 = vld [vmem:[%s10142_s4 + $0x388] sm:$0xff] }
 0x317   :  { %7414 = vmatprep.subr.bf16.mxu0 %v7413_v35  ;;  %v7449_v6 = vpack.c.bf16 %v5200_v48, %v5199_v62  ;;  %v5213_v48 = vld [vmem:[%s10142_s4 + $0x3f0] sm:$0xff] }
 0x319   :  { %6679 = vmatmul.mubr.f32.gmra.mrb[30].mxu0 %v9851_v57 }
 0x31a   :  { %7416 = vmatpush3.bf16.msra.mxu0 %v7413_v35  ;;  %6713 = vmatprep.mubr.f32.mxu0 %v9542_v19  ;;  %v5189_v19 = vld [vmem:[%s10142_s4 + $0x330] sm:$0xff]  ;;  %v3717_v35 = vld [vmem:[#allocation3 + $0x122] sm:$0xff] }
 0x31b   :  { %7418 = vmatprep.subr.bf16.mxu0 %v7417_v27 }
 0x31d   :  { %6714 = vmatmul.mubr.f32.vlgmr.msra.gmra.mrb[16].mxu0 %v9551_v50  ;;  %v7429_v50 = vpack.c.bf16 %v5190_v20, %v5189_v19  ;;  %v3932_v19 = vld [vmem:[#allocation3 + $0x50] sm:$0xff] }
 0x31e   :  { %6716 = vmatprep.mubr.f32.mxu0 %v9557_v22  ;;  %7420 = vmatpush3.bf16.msra.mxu0 %v7417_v27  ;;  %v5191_v22 = vld [vmem:[%s10142_s4 + $0x340] sm:$0xff]  ;;  %v5205_v20 = vld [vmem:[%s10142_s4 + $0x3b0] sm:$0xff] }
 0x31f   :  { %7422 = vmatprep.subr.bf16.mxu0 %v7421_v2  ;;  %v3929_v27 = vld [vmem:[#allocation3 + $0x20] sm:$0xff] }
 0x321   :  { %6717 = vmatmul.mubr.f32.gmra.mrb[18].mxu0 %v9568_v18  ;;  %v7433_v18 = vpack.c.bf16 %v5192_v25, %v5191_v22  ;;  %v3933_v22 = vld [vmem:[#allocation3 + $0x60] sm:$0xff] }
 0x322   :  { %6719 = vmatprep.mubr.f32.mxu0 %v9587_v54  ;;  %7424 = vmatpush3.bf16.msra.mxu0 %v7421_v2  ;;  %v5193_v54 = vld [vmem:[%s10142_s4 + $0x350] sm:$0xff]  ;;  %v5203_v2 = vld [vmem:[%s10142_s4 + $0x3a0] sm:$0xff] }
 0x323   :  { %7426 = vmatprep.subr.bf16.mxu0 %v7425_v17 }
 0x325   :  { %6720 = vmatmul.mubr.f32.gmra.mrb[20].mxu0 %v9596_v38  ;;  %v7437_v38 = vpack.c.bf16 %v5194_v42, %v5193_v54  ;;  %v5207_v54 = vld [vmem:[%s10142_s4 + $0x3c0] sm:$0xff]  ;;  %v5208_v42 = vld [vmem:[%s10142_s4 + $0x3c8] sm:$0xff] }
 0x326   :  { %6722 = vmatprep.mubr.f32.mxu0 %v9620_v46  ;;  %7428 = vmatpush3.bf16.msra.mxu0 %v7425_v17  ;;  %v3711_v46 = vld [vmem:[#allocation3 + $0xc2] sm:$0xff]  ;;  %v7457_v17 = vpack.c.bf16 %v5204_v29, %v5203_v2 }
 0x327   :  { %7430 = vmatprep.subr.bf16.mxu0 %v7429_v50  ;;  %v4155_v2 = vld [vmem:[#allocation3 + $0x21] sm:$0xff] }
 0x328   :  { %v10223_v29 = vld [vmem:[#allocation8_spill] sm:$0xff] }
 0x329   :  { %6723 = vmatmul.mubr.f32.gmra.mrb[22].mxu0 %v9885_v32 }
 0x32a   :  { %6725 = vmatprep.mubr.f32.mxu0 %v9629_v26  ;;  %7432 = vmatpush3.bf16.msra.mxu0 %v7429_v50  ;;  %v5197_v26 = vld [vmem:[%s10142_s4 + $0x370] sm:$0xff]  ;;  %v5206_v50 = vld [vmem:[%s10142_s4 + $0x3b8] sm:$0xff] }
 0x32b   :  { %7434 = vmatprep.subr.bf16.mxu0 %v7433_v18  ;;  %v7445_v31 = vpack.c.bf16 %v5198_v56, %v5197_v26  ;;  %v7461_v25 = vpack.c.bf16 %v5206_v50, %v5205_v20  ;;  %v5212_v26 = vld [vmem:[%s10142_s4 + $0x3e8] sm:$0xff]  ;;  %v3939_v56 = vld [vmem:[#allocation3 + $0xe0] sm:$0xff]  ;;  %v4162_v20 = vld [vmem:[#allocation3 + $0x91] sm:$0xff] }
 0x32c   :  { %v10226_v50 = vld [vmem:[#allocation11_spill] sm:$0xff] }
 0x32d   :  { %6726 = vmatmul.mubr.f32.gmra.mrb[24].mxu0 %v3711_v46  ;;  %v5209_v46 = vld [vmem:[%s10142_s4 + $0x3d0] sm:$0xff] }
 0x32e   :  { %6728 = vmatprep.mubr.f32.mxu0 %v3712_v24  ;;  %7436 = vmatpush3.bf16.msra.mxu0 %v7433_v18  ;;  %v3934_v18 = vld [vmem:[#allocation3 + $0x70] sm:$0xff]  ;;  %v3937_v24 = vld [vmem:[#allocation3 + $0xc0] sm:$0xff] }
 0x32f   :  { %7438 = vmatprep.subr.bf16.mxu0 %v7437_v38 }
 0x331   :  { %6729 = vmatmul.mubr.f32.gmra.mrb[26].mxu0 %v3713_v7  ;;  %v3938_v7 = vld [vmem:[#allocation3 + $0xd0] sm:$0xff] }
 0x332   :  { %6731 = vmatprep.mubr.f32.mxu0 %v3714_v8  ;;  %7440 = vmatpush3.bf16.msra.mxu0 %v7437_v38  ;;  %v7465_v38 = vpack.c.bf16 %v5208_v42, %v5207_v54 }
 0x333   :  { %7442 = vmatprep.subr.bf16.mxu0 %v7441_v63 }
 0x335   :  { %6732 = vmatmul.mubr.f32.gmra.mrb[28].mxu0 %v3715_v5  ;;  %v3940_v5 = vld [vmem:[#allocation3 + $0xf0] sm:$0xff] }
 0x336   :  { %6734 = vmatprep.mubr.f32.mxu0 %v3716_v49  ;;  %7444 = vmatpush3.bf16.msra.mxu0 %v7441_v63  ;;  %v7469_v63 = vpack.c.bf16 %v5210_v12, %v5209_v46  ;;  %v5214_v49 = vld [vmem:[%s10142_s4 + $0x3f8] sm:$0xff] }
 0x337   :  { %7446 = vmatprep.subr.bf16.mxu0 %v7445_v31  ;;  %v7477_v33 = vpack.c.bf16 %v5214_v49, %v5213_v48 }
 0x339   :  { %6735 = vmatmul.mubr.f32.gmra.mrb[30].mxu0 %v3717_v35 }
 0x33a   :  { %7448 = vmatpush3.bf16.msra.mxu0 %v7445_v31  ;;  %6769 = vmatprep.mubr.f32.mxu0 %v3929_v27 }
 0x33b   :  { %7450 = vmatprep.subr.bf16.mxu0 %v7449_v6 }
 0x33d   :  { %6770 = vmatmul.mubr.f32.vlgmr.msra.gmra.mrb[16].mxu0 %v3930_v14 }
 0x33e   :  { %6772 = vmatprep.mubr.f32.mxu0 %v3931_v9  ;;  %7452 = vmatpush3.bf16.msra.mxu0 %v7449_v6  ;;  %v3941_v6 = vld [vmem:[#allocation3 + $0x100] sm:$0xff]  ;;  %v4156_v9 = vld [vmem:[#allocation3 + $0x31] sm:$0xff] }
 0x33f   :  { %7454 = vmatprep.subr.bf16.mxu0 %v7453_v30 }
 0x341   :  { %6773 = vmatmul.mubr.f32.gmra.mrb[18].mxu0 %v3932_v19  ;;  %v10224_v19 = vld [vmem:[#allocation9_spill] sm:$0xff] }
 0x342   :  { %6775 = vmatprep.mubr.f32.mxu0 %v3933_v22  ;;  %7456 = vmatpush3.bf16.msra.mxu0 %v7453_v30  ;;  %v4385_v22 = vld [vmem:[#allocation3 + $0x62] sm:$0xff] }
 0x343   :  { %7458 = vmatprep.subr.bf16.mxu0 %v7457_v17 }
 0x345   :  { %6776 = vmatmul.mubr.f32.gmra.mrb[20].mxu0 %v3934_v18 }
 0x346   :  { %6778 = vmatprep.mubr.f32.mxu0 %v9732_v43  ;;  %7460 = vmatpush3.bf16.msra.mxu0 %v7457_v17  ;;  %v5211_v43 = vld [vmem:[%s10142_s4 + $0x3e0] sm:$0xff] }
 0x347   :  { %7462 = vmatprep.subr.bf16.mxu0 %v7461_v25  ;;  %v7473_v31 = vpack.c.bf16 %v5212_v26, %v5211_v43  ;;  %v4157_v17 = vld [vmem:[#allocation3 + $0x41] sm:$0xff] }
 0x349   :  { %6779 = vmatmul.mubr.f32.gmra.mrb[22].mxu0 %v7795_v15 }
 0x34a   :  { %6781 = vmatprep.mubr.f32.mxu0 %v3937_v24  ;;  %7464 = vmatpush3.bf16.msra.mxu0 %v7461_v25 }
 0x34b   :  { %7466 = vmatprep.subr.bf16.mxu0 %v7465_v38 }
 0x34d   :  { %6782 = vmatmul.mubr.f32.gmra.mrb[24].mxu0 %v3938_v7  ;;  %v9950_v8 = vpop.f32.mrb[16].mxu1 }
 0x34e   :  { %6784 = vmatprep.mubr.f32.mxu0 %v3939_v56  ;;  %7468 = vmatpush3.bf16.msra.mxu0 %v7465_v38  ;;  %v9952_v62 = vpop.f32.mrb[17].mxu1 }
 0x34f   :  { %7470 = vmatprep.subr.bf16.mxu0 %v7469_v63 }
 0x351   :  { %6785 = vmatmul.mubr.f32.gmra.mrb[26].mxu0 %v3940_v5 }
 0x352   :  { %6787 = vmatprep.mubr.f32.mxu0 %v3941_v6  ;;  %7472 = vmatpush3.bf16.msra.mxu0 %v7469_v63  ;;  %v9960_v35 = vpop.f32.mrb[18].mxu1 }
 0x353   :  { %7474 = vmatprep.subr.bf16.mxu0 %v7473_v31  ;;  %v9962_v27 = vpop.f32.mrb[19].mxu1 }
 0x355   :  { %6788 = vmatmul.mubr.f32.gmra.mrb[28].mxu0 %v3942_v13 }
 0x356   :  { %6790 = vmatprep.mubr.f32.mxu0 %v9766_v34  ;;  %7476 = vmatpush3.bf16.msra.mxu0 %v7473_v31  ;;  %v9965_v30 = vpop.f32.mrb[20].mxu1  ;;  %v10225_v34 = vld [vmem:[#allocation10_spill] sm:$0xff] }
 0x357   :  { %7478 = vmatprep.subr.bf16.mxu0 %v7477_v33  ;;  %v9967_v14 = vpop.f32.mrb[21].mxu1 }
 0x359   :  { %6791 = vmatmul.mubr.f32.gmra.mrb[30].mxu0 %v7795_v15 }
 0x35a   :  { %7480 = vmatpush3.bf16.msra.mxu0 %v7477_v33  ;;  %6825 = vmatprep.mubr.f32.mxu0 %v4155_v2 }
 0x35b   :  { %7482 = vmatprep.subr.bf16.mxu0 %v10223_v29 }
 0x35d   :  { %6826 = vmatmul.mubr.f32.vlgmr.msra.gmra.mrb[16].mxu0 %v4156_v9 }
 0x35e   :  { %6828 = vmatprep.mubr.f32.mxu0 %v4157_v17  ;;  %7484 = vmatpush3.bf16.msra.mxu0 %v10223_v29 }
 0x35f   :  { %7486 = vmatprep.subr.bf16.mxu0 %v10224_v19 }
 0x361   :  { %6829 = vmatmul.mubr.f32.gmra.mrb[18].mxu0 %v9791_v47  ;;  %v10227_v47 = vld [vmem:[#allocation12_spill] sm:$0xff] }
 0x362   :  { %6831 = vmatprep.mubr.f32.mxu0 %v9794_v51  ;;  %7488 = vmatpush3.bf16.msra.mxu0 %v10224_v19  ;;  %v10228_v51 = vld [vmem:[#allocation13_spill] sm:$0xff] }
 0x363   :  { %7490 = vmatprep.subr.bf16.mxu0 %v10225_v34 }
 0x365   :  { %6832 = vmatmul.mubr.f32.gmra.mrb[20].mxu0 %v9803_v58  ;;  %v10229_v58 = vld [vmem:[#allocation14_spill] sm:$0xff] }
 0x366   :  { %6834 = vmatprep.mubr.f32.mxu0 %v9806_v45  ;;  %7492 = vmatpush3.bf16.msra.mxu0 %v10225_v34  ;;  %v4170_v45 = vld [vmem:[#allocation3 + $0x131] sm:$0xff] }
 0x367   :  { %7494 = vmatprep.subr.bf16.mxu0 %v10226_v50 }
 0x369   :  { %6835 = vmatmul.mubr.f32.gmra.mrb[22].mxu0 %v4162_v20 }
 0x36a   :  { %6837 = vmatprep.mubr.f32.mxu0 %v9815_v37  ;;  %7496 = vmatpush3.bf16.msra.mxu0 %v10226_v50  ;;  %v10230_v37 = vld [vmem:[#allocation15_spill] sm:$0xff] }
 0x36b   :  { %7498 = vmatprep.subr.bf16.mxu0 %v10227_v47 }
 0x36d   :  { %6838 = vmatmul.mubr.f32.gmra.mrb[24].mxu0 %v9824_v10  ;;  %v4381_v10 = vld [vmem:[#allocation3 + $0x22] sm:$0xff] }
 0x36e   :  { %6840 = vmatprep.mubr.f32.mxu0 %v9827_v39  ;;  %7500 = vmatpush3.bf16.msra.mxu0 %v10227_v47  ;;  %v4382_v39 = vld [vmem:[#allocation3 + $0x32] sm:$0xff] }
 0x36f   :  { %7502 = vmatprep.subr.bf16.mxu0 %v10228_v51 }
 0x371   :  { %6841 = vmatmul.mubr.f32.gmra.mrb[26].mxu0 %v9836_v36  ;;  %v4383_v36 = vld [vmem:[#allocation3 + $0x42] sm:$0xff] }
 0x372   :  { %6843 = vmatprep.mubr.f32.mxu0 %v9839_v16  ;;  %7504 = vmatpush3.bf16.msra.mxu0 %v10228_v51  ;;  %v4384_v16 = vld [vmem:[#allocation3 + $0x52] sm:$0xff] }
 0x373   :  { %7506 = vmatprep.subr.bf16.mxu0 %v10229_v58 }
 0x375   :  { %6844 = vmatmul.mubr.f32.gmra.mrb[28].mxu0 %v9848_v4  ;;  %v4386_v4 = vld [vmem:[#allocation3 + $0x72] sm:$0xff] }
 0x376   :  { %6846 = vmatprep.mubr.f32.mxu0 %v9851_v57  ;;  %7508 = vmatpush3.bf16.msra.mxu0 %v10229_v58  ;;  %v4388_v57 = vld [vmem:[#allocation3 + $0x92] sm:$0xff] }
 0x377   :  { %7510 = vmatprep.subr.bf16.mxu0 %v10230_v37 }
 0x379   :  { %6847 = vmatmul.mubr.f32.gmra.mrb[30].mxu0 %v4170_v45 }
 0x37a   :  { %7512 = vmatpush3.bf16.msra.mxu0 %v10230_v37  ;;  %6881 = vmatprep.mubr.f32.mxu0 %v4381_v10 }
 0x37d   :  { %6882 = vmatmul.mubr.f32.vlgmr.msra.gmra.mrb[16].mxu0 %v4382_v39 }
 0x37e   :  { %6884 = vmatprep.mubr.f32.mxu0 %v4383_v36 }
 0x381   :  { %6885 = vmatmul.mubr.f32.gmra.mrb[18].mxu0 %v4384_v16 }
 0x382   :  { %6887 = vmatprep.mubr.f32.mxu0 %v4385_v22 }
 0x385   :  { %6888 = vmatmul.mubr.f32.gmra.mrb[20].mxu0 %v4386_v4 }
 0x386   :  { %6890 = vmatprep.mubr.f32.mxu0 %v9885_v32 }
 0x389   :  { %6891 = vmatmul.mubr.f32.gmra.mrb[22].mxu0 %v4388_v57 }
 0x3a8   :  { %v6904_v25 = vpop.f32.mrb[22].mxu1 }
 0x3a9   :  { %v4550_v18 = vpop.f32.mrb[23].mxu1 }
 0x440   :  { %v6839_v54 = vpop.f32.mrb[24].mxu0 }
 0x441   :  { %v7529_v42 = vadd.f32 %v9950_v8, %v6839_v54  ;;  %v4294_v38 = vpop.f32.mrb[25].mxu0 }
 0x442   :  { %v7530_v46 = vadd.f32 %v9952_v62, %v4294_v38 }
 0x444   :  { %v6842_v12 = vpop.f32.mrb[26].mxu0 }
 0x445   :  { %v7531_v15 = vadd.f32 %v9960_v35, %v6842_v12  ;;  %v4304_v24 = vpop.f32.mrb[27].mxu0 }
 0x446   :  { %v7532_v63 = vadd.f32 %v9962_v27, %v4304_v24 }
 0x448   :  { %v6845_v7 = vpop.f32.mrb[28].mxu0 }
 0x449   :  { %v7533_v43 = vadd.f32 %v9965_v30, %v6845_v7  ;;  %v4314_v32 = vpop.f32.mrb[29].mxu0 }
 0x44a   :  { %v7534_v26 = vadd.f32 %v9967_v14, %v4314_v32 }
 0x44c   :  { %v6848_v56 = vpop.f32.mrb[30].mxu0 }
 0x44d   :  { %v7535_v31 = vadd.f32 %v6904_v25, %v6848_v56  ;;  %v4324_v5 = vpop.f32.mrb[31].mxu0 }
 0x44e   :  { %v7536_v48 = vadd.f32 %v4550_v18, %v4324_v5 }
 0x450   :  { %v6883_v8 = vpop.f32.mrb[16].mxu0 }
 0x451   :  { %v4480_v49 = vpop.f32.mrb[17].mxu0 }
 0x452   :  { %v4623_v6 = vadd.f32 %v6883_v8, %v4480_v49 }
 0x454   :  { %v6886_v62 = vpop.f32.mrb[18].mxu0 }
 0x455   :  { %v4490_v33 = vpop.f32.mrb[19].mxu0 }
 0x456   :  { %v4624_v13 = vadd.f32 %v4623_v6, %v4490_v33 }
 0x458   :  { %v6889_v35 = vpop.f32.mrb[20].mxu0  ;;  %v4625_v2 = vadd.f32 %v6886_v62, %v4624_v13 }
 0x459   :  { %v4500_v29 = vpop.f32.mrb[21].mxu0 }
 0x45a   :  { %v4626_v27 = vadd.f32 %v4625_v2, %v4500_v29 }
 0x45c   :  { %v6892_v9 = vpop.f32.mrb[22].mxu0  ;;  %v4627_v17 = vadd.f32 %v6889_v35, %v4626_v27 }
 0x45d   :  { %v4510_v30 = vpop.f32.mrb[23].mxu0 }
 0x45e   :  { %v4628_v19 = vadd.f32 %v4627_v17, %v4510_v30 }
 0x460   :  { %v4629_v34 = vadd.f32 %v6892_v9, %v4628_v19 }
 0x462   :  { %v4630_v14 = vadd.f32 %v7530_v46, %v4629_v34 }
 0x464   :  { %v4631_v20 = vadd.f32 %v7529_v42, %v4630_v14 }
 0x466   :  { %v4632_v50 = vadd.f32 %v7532_v63, %v4631_v20 }
 0x468   :  { %v4633_v47 = vadd.f32 %v7531_v15, %v4632_v50 }
 0x46a   :  { %v4634_v51 = vadd.f32 %v7534_v26, %v4633_v47 }
 0x46c   :  { %v4635_v58 = vadd.f32 %v7533_v43, %v4634_v51 }
 0x46e   :  { %v4636_v45 = vadd.f32 %v7536_v48, %v4635_v58 }
 0x470   :  { %v4637_v37 = vadd.f32 %v7535_v31, %v4636_v45 }
 0x472   :  { %v4638_v10 = vrot.slane %v4637_v37, 4 }
 0x474   :  { %v4639_v39 = vadd.f32 %v4638_v10, %v4637_v37 }
 0x476   :  { %v4640_v36 = vrot.slane %v4639_v39, 2 }
 0x478   :  { %v4641_v16 = vadd.f32 %v4640_v36, %v4639_v39 }
 0x47a   :  { %v4642_v22 = vrot.slane %v4641_v16, 1 }
 0x47c   :  { %v4643_v4 = vadd.f32 %v4642_v22, %v4641_v16 }
 0x47e   :  { %v4644_v57 = vmul.f32 0.0078125, %v4643_v4 }
 0x480   :  { %v10003_v25 = vsub.f32 %v4480_v49, %v4644_v57  ;;  %v10005_v18 = vsub.f32 %v6883_v8, %v4644_v57  ;;  %v10007_v54 = vsub.f32 %v4490_v33, %v4644_v57  ;;  %v10009_v38 = vsub.f32 %v6886_v62, %v4644_v57 }
 0x481   :  { %v10011_v12 = vsub.f32 %v4500_v29, %v4644_v57  ;;  %v10013_v24 = vsub.f32 %v6889_v35, %v4644_v57  ;;  %v10015_v7 = vsub.f32 %v4510_v30, %v4644_v57  ;;  %v10017_v32 = vsub.f32 %v6892_v9, %v4644_v57 }
 0x482   :  { %v10019_v56 = vsub.f32 %v7530_v46, %v4644_v57  ;;  %v10021_v5 = vsub.f32 %v7529_v42, %v4644_v57  ;;  %v10023_v49 = vsub.f32 %v7532_v63, %v4644_v57  ;;  %v10025_v8 = vsub.f32 %v7531_v15, %v4644_v57 }
 0x483   :  { %v10027_v6 = vsub.f32 %v7534_v26, %v4644_v57  ;;  %v10029_v62 = vsub.f32 %v7533_v43, %v4644_v57  ;;  %v10031_v33 = vsub.f32 %v7536_v48, %v4644_v57  ;;  %v10033_v13 = vsub.f32 %v7535_v31, %v4644_v57 }
 0x484   :  { %v4661_v35 = vmul.f32 %v10003_v25, %v10003_v25  ;;  %v4662_v46 = vmul.f32 %v10005_v18, %v10005_v18  ;;  %v4663_v42 = vmul.f32 %v10007_v54, %v10007_v54  ;;  %v4664_v15 = vmul.f32 %v10009_v38, %v10009_v38 }
 0x485   :  { %v4665_v43 = vmul.f32 %v10011_v12, %v10011_v12  ;;  %v4666_v31 = vmul.f32 %v10013_v24, %v10013_v24  ;;  %v4667_v29 = vmul.f32 %v10015_v7, %v10015_v7  ;;  %v4668_v9 = vmul.f32 %v10017_v32, %v10017_v32 }
 0x486   :  { %v4677_v63 = vadd.f32 %v4662_v46, %v4661_v35  ;;  %v4669_v30 = vmul.f32 %v10019_v56, %v10019_v56  ;;  %v4670_v34 = vmul.f32 %v10021_v5, %v10021_v5  ;;  %v4671_v20 = vmul.f32 %v10023_v49, %v10023_v49 }
 0x487   :  { %v4672_v47 = vmul.f32 %v10025_v8, %v10025_v8  ;;  %v4673_v58 = vmul.f32 %v10027_v6, %v10027_v6  ;;  %v4674_v37 = vmul.f32 %v10029_v62, %v10029_v62  ;;  %v4675_v39 = vmul.f32 %v10031_v33, %v10031_v33 }
 0x488   :  { %v4678_v26 = vadd.f32 %v4677_v63, %v4663_v42  ;;  %v4676_v16 = vmul.f32 %v10033_v13, %v10033_v13 }
 0x48a   :  { %v4679_v48 = vadd.f32 %v4678_v26, %v4664_v15 }
 0x48c   :  { %v4680_v2 = vadd.f32 %v4679_v48, %v4665_v43  ;;  %v4860_v48 = vld [vmem:[%s10147_s9] ss:$0 sm:$0xff] }
 0x48e   :  { %v4681_v27 = vadd.f32 %v4680_v2, %v4666_v31  ;;  %v10071_v31 = vadd.f32 %v4860_v48, %v9602_v44  ;;  %v10074_v2 = vadd.f32 %v4860_v48, %v9605_v59  ;;  %v340_v44 = vadd.f32 %v4860_v48, %v9647_v53  ;;  %v5231_v59 = vld [vmem:[%s10143_s5] ss:$0 sm:$0xff] }
 0x48f   :  { %v348_v53 = vadd.f32 %v4860_v48, %v9599_v21  ;;  %v4715_v21 = vmul.f32 %v5231_v59, %v10021_v5 }
 0x490   :  { %v4682_v17 = vadd.f32 %v4681_v27, %v4667_v29  ;;  %v10077_v29 = vadd.f32 %v4860_v48, %v9608_v41  ;;  %v10080_v27 = vadd.f32 %v4860_v48, %v9612_v23  ;;  %v341_v41 = vadd.f32 %v4860_v48, %v9662_v3 }
 0x491   :  { %v343_v23 = vadd.f32 %v4860_v48, %v9680_v60  ;;  %v4708_v3 = vmul.f32 %v5231_v59, %v10007_v54  ;;  %v4710_v60 = vmul.f32 %v5231_v59, %v10011_v12  ;;  %v4718_v54 = vmul.f32 %v5231_v59, %v10027_v6 }
 0x492   :  { %v4683_v19 = vadd.f32 %v4682_v17, %v4668_v9  ;;  %v10083_v9 = vadd.f32 %v4860_v48, %v9615_v0  ;;  %v10086_v17 = vadd.f32 %v4860_v48, %v9618_v40  ;;  %v344_v0 = vadd.f32 %v4860_v48, %v9683_v28 }
 0x493   :  { %v346_v40 = vadd.f32 %v4860_v48, %v9703_v61  ;;  %v4711_v28 = vmul.f32 %v5231_v59, %v10013_v24  ;;  %v4713_v61 = vmul.f32 %v5231_v59, %v10017_v32  ;;  %v4720_v12 = vmul.f32 %v5231_v59, %v10031_v33 }
 0x494   :  { %v4684_v14 = vadd.f32 %v4683_v19, %v4669_v30  ;;  %v339_v30 = vadd.f32 %v4860_v48, %v9644_v1  ;;  %v342_v19 = vadd.f32 %v4860_v48, %v9665_v55  ;;  %v347_v1 = vadd.f32 %v4860_v48, %v9714_v52 }
 0x495   :  { %v4709_v55 = vmul.f32 %v5231_v59, %v10009_v38  ;;  %v4714_v52 = vmul.f32 %v5231_v59, %v10019_v56  ;;  %v4719_v38 = vmul.f32 %v5231_v59, %v10029_v62  ;;  %v4721_v24 = vmul.f32 %v5231_v59, %v10033_v13 }
 0x496   :  { %v4685_v50 = vadd.f32 %v4684_v14, %v4670_v34  ;;  %v345_v34 = vadd.f32 %v4860_v48, %v9700_v11  ;;  %v4706_v14 = vmul.f32 %v5231_v59, %v10003_v25  ;;  %v4712_v11 = vmul.f32 %v5231_v59, %v10015_v7 }
 0x497   :  { %v4716_v25 = vmul.f32 %v5231_v59, %v10023_v49  ;;  %v5232_v49 = vld [vmem:[%s10144_s6] ss:$0 sm:$0xff]  ;;  %s7821_s6 = smov [#allocation5]  }
 0x498   :  { %v4686_v51 = vadd.f32 %v4685_v50, %v4671_v20  ;;  %v4707_v20 = vmul.f32 %v5231_v59, %v10005_v18  ;;  %v4717_v18 = vmul.f32 %v5231_v59, %v10025_v8  ;;  %s4832_s29 = sshll.u32 %s7821_s6, 4  ;;  %s4833_s29 = int_to_ptr.vmem [resolvable:$true] %s4832_s29 }
 0x499   :  { %s7796_s30 = scalar_lea.vmem %s4833_s29, 2048  ;;  %p7801_p1 = scmp.lt.s32.totalorder %s4833_s29, %s4833_s29 }
 0x49a   :  { %v4687_v45 = vadd.f32 %v4686_v51, %v4672_v47  ;;  %p7797_p0 = scmp.ne.s32.totalorder %s4833_s29, %s7796_s30  ;;  %p7802_p2 = scmp.lt.s32.totalorder %s7796_s30, %s7796_s30 }
 0x49c   :  { %v4688_v10 = vadd.f32 %v4687_v45, %v4673_v58  ;;  %p7803_p3 = por %p7802_p2, %p7801_p1 }
 0x49e   :  { %v4689_v36 = vadd.f32 %v4688_v10, %v4674_v37  ;;  %p7804_p4 = pnand %p7803_p3, %p7797_p0 }
 0x4a0   :  { %v4690_v22 = vadd.f32 %v4689_v36, %v4675_v39 }
 0x4a2   :  { %v4691_v4 = vadd.f32 %v4690_v22, %v4676_v16 }
 0x4a4   :  { %v4692_v57 = vrot.slane %v4691_v4, 4 }
 0x4a6   :  { %v4693_v35 = vadd.f32 %v4692_v57, %v4691_v4 }
 0x4a8   :  { %v4694_v46 = vrot.slane %v4693_v35, 2 }
 0x4aa   :  { %v4695_v42 = vadd.f32 %v4694_v46, %v4693_v35 }
 0x4ac   :  { %v4696_v63 = vrot.slane %v4695_v42, 1 }
 0x4ae   :  { %v4697_v15 = vadd.f32 %v4696_v63, %v4695_v42 }
 0x4b0   :  { %v4698_v26 = vmul.f32 0.0078125, %v4697_v15 }
 0x4b2   :  { %v4722_v43 = vadd.f32 1e-05, %v4698_v26 }
 0x4b4   :  { %7793 = vrsqrt.f32 %v4722_v43 }
 0x4be   :  { %v7794_v50 = vpop.eup %7793 }
 0x4bf   :  { %v4724_v7 = vmul.f32 %v7794_v50, %v4706_v14  ;;  %v4725_v47 = vmul.f32 %v7794_v50, %v4707_v20  ;;  %v4726_v32 = vmul.f32 %v7794_v50, %v4708_v3  ;;  %v4727_v51 = vmul.f32 %v7794_v50, %v4709_v55 }
 0x4c0   :  { %v4728_v56 = vmul.f32 %v7794_v50, %v4710_v60  ;;  %v4729_v58 = vmul.f32 %v7794_v50, %v4711_v28  ;;  %v4730_v5 = vmul.f32 %v7794_v50, %v4712_v11  ;;  %v4731_v45 = vmul.f32 %v7794_v50, %v4713_v61 }
 0x4c1   :  { %v4732_v8 = vmul.f32 %v7794_v50, %v4714_v52  ;;  %v4733_v6 = vmul.f32 %v7794_v50, %v4715_v21  ;;  %v4734_v37 = vmul.f32 %v7794_v50, %v4716_v25  ;;  %v4735_v62 = vmul.f32 %v7794_v50, %v4717_v18 }
 0x4c2   :  { %v4736_v10 = vmul.f32 %v7794_v50, %v4718_v54  ;;  %v4737_v33 = vmul.f32 %v7794_v50, %v4719_v38  ;;  %v4738_v39 = vmul.f32 %v7794_v50, %v4720_v12  ;;  %v4739_v13 = vmul.f32 %v7794_v50, %v4721_v24 }
 0x4c3   :  { %v4747_v36 = vadd.f32 %v5232_v49, %v4724_v7  ;;  %v4748_v16 = vadd.f32 %v5232_v49, %v4725_v47  ;;  %v4749_v22 = vadd.f32 %v5232_v49, %v4726_v32  ;;  %v4750_v4 = vadd.f32 %v5232_v49, %v4727_v51 }
 0x4c4   :  { %v4751_v57 = vadd.f32 %v5232_v49, %v4728_v56  ;;  %v4752_v35 = vadd.f32 %v5232_v49, %v4729_v58  ;;  %v4753_v46 = vadd.f32 %v5232_v49, %v4730_v5  ;;  %v4754_v42 = vadd.f32 %v5232_v49, %v4731_v45 }
 0x4c5   :  { %v4755_v63 = vadd.f32 %v5232_v49, %v4732_v8  ;;  %v4756_v15 = vadd.f32 %v5232_v49, %v4733_v6  ;;  %v4757_v26 = vadd.f32 %v5232_v49, %v4734_v37  ;;  %v4758_v43 = vadd.f32 %v5232_v49, %v4735_v62 }
 0x4c6   :  { %v4759_v48 = vadd.f32 %v5232_v49, %v4736_v10  ;;  %v4760_v59 = vadd.f32 %v5232_v49, %v4737_v33  ;;  %v4761_v14 = vadd.f32 %v5232_v49, %v4738_v39  ;;  %v4762_v20 = vadd.f32 %v5232_v49, %v4739_v13 }
 0x4c7   :  { %v4779_v3 = vadd.f32 %v4747_v36, %v339_v30  ;;  %v4780_v55 = vadd.f32 %v4748_v16, %v340_v44  ;;  %v4781_v60 = vadd.f32 %v4749_v22, %v341_v41  ;;  %v4782_v28 = vadd.f32 %v4750_v4, %v342_v19 }
 0x4c8   :  { %v4783_v11 = vadd.f32 %v4751_v57, %v343_v23  ;;  %v4784_v61 = vadd.f32 %v4752_v35, %v344_v0  ;;  %v4785_v52 = vadd.f32 %v4753_v46, %v345_v34  ;;  %v4786_v21 = vadd.f32 %v4754_v42, %v346_v40 }
 0x4c9   :  { %v4787_v25 = vadd.f32 %v4755_v63, %v347_v1  ;;  %v4788_v18 = vadd.f32 %v4756_v15, %v348_v53  ;;  %v4789_v50 = vadd.f32 %v4757_v26, %v10071_v31  ;;  %v4790_v54 = vadd.f32 %v4758_v43, %v10074_v2 }
 0x4ca   :  { %v4791_v38 = vadd.f32 %v4759_v48, %v10077_v29  ;;  %v4792_v12 = vadd.f32 %v4760_v59, %v10080_v27  ;;  %v4793_v24 = vadd.f32 %v4761_v14, %v10083_v9  ;;  %v4794_v30 = vadd.f32 %v4762_v20, %v10086_v17 }
 0x4cb   :  { %v4795_v44 = vmax.f32 %v4779_v3, 0.0  ;;  %v4796_v41 = vmax.f32 %v4780_v55, 0.0  ;;  %v4797_v19 = vmax.f32 %v4781_v60, 0.0  ;;  %v4798_v23 = vmax.f32 %v4782_v28, 0.0 }
 0x4cc   :  { %v4799_v0 = vmax.f32 %v4783_v11, 0.0  ;;  %v4800_v34 = vmax.f32 %v4784_v61, 0.0  ;;  %v4801_v40 = vmax.f32 %v4785_v52, 0.0  ;;  %v4802_v31 = vmax.f32 %v4786_v21, 0.0 }
 0x4cd   :  { %v4803_v1 = vmax.f32 %v4787_v25, 0.0  ;;  %v4804_v2 = vmax.f32 %v4788_v18, 0.0  ;;  %v4805_v53 = vmax.f32 %v4789_v50, 0.0  ;;  %v4806_v29 = vmax.f32 %v4790_v54, 0.0  ;;  %4811 = vst [vmem:[#allocation5] sm:$0xff] %v4795_v44  ;;  %4812 = vst [vmem:[#allocation5 + $0x8] sm:$0xff] %v4796_v41 }
 0x4ce   :  { %4813 = vst [vmem:[#allocation5 + $0x10] sm:$0xff] %v4797_v19  ;;  %4814 = vst [vmem:[#allocation5 + $0x18] sm:$0xff] %v4798_v23  ;;  %v4807_v27 = vmax.f32 %v4791_v38, 0.0  ;;  %v4808_v9 = vmax.f32 %v4792_v12, 0.0  ;;  %v4809_v17 = vmax.f32 %v4793_v24, 0.0  ;;  %v4810_v7 = vmax.f32 %v4794_v30, 0.0 }
 0x4cf   :  { %4815 = vst [vmem:[#allocation5 + $0x20] sm:$0xff] %v4799_v0  ;;  %4816 = vst [vmem:[#allocation5 + $0x28] sm:$0xff] %v4800_v34 }
 0x4d0   :  { %4817 = vst [vmem:[#allocation5 + $0x30] sm:$0xff] %v4801_v40  ;;  %4818 = vst [vmem:[#allocation5 + $0x38] sm:$0xff] %v4802_v31 }
 0x4d1   :  { %4819 = vst [vmem:[#allocation5 + $0x40] sm:$0xff] %v4803_v1  ;;  %4820 = vst [vmem:[#allocation5 + $0x48] sm:$0xff] %v4804_v2 }
 0x4d2   :  { %4821 = vst [vmem:[#allocation5 + $0x50] sm:$0xff] %v4805_v53  ;;  %4822 = vst [vmem:[#allocation5 + $0x58] sm:$0xff] %v4806_v29 }
 0x4d3   :  { %4823 = vst [vmem:[#allocation5 + $0x60] sm:$0xff] %v4807_v27  ;;  %4824 = vst [vmem:[#allocation5 + $0x68] sm:$0xff] %v4808_v9 }
 0x4d4   :  { %4825 = vst [vmem:[#allocation5 + $0x70] sm:$0xff] %v4809_v17  ;;  %4826 = vst [vmem:[#allocation5 + $0x78] sm:$0xff] %v4810_v7 }
 0x4d5   :  { %7807 = shalt.err (!%p7804_p4)
}
 0x4d6   :  { %s7808_s2 = scalar_lea.hbm %s10148_s10, 2048 }
 0x4d7   :  { %p7809_p5 = scmp.ne.s32.totalorder %s10148_s10, %s7808_s2  ;;  %p7812_p6 = scmp.lt.u32.totalorder %s7808_s2, %s10148_s10 }
 0x4d9   :  { %p7814_p7 = pnand %p7812_p6, %p7809_p5 }
 0x4db   :  { %7817 = shalt.err (!%p7814_p7)
}
 0x4dc   :  { %s7822_s8 = smov 128   ;;  %s7823_s16 = smov 8  }
 0x4dd   :  { %4838 = dma.vmem_to_hbm [thread:$0]  %s4833_s29, 2048, %s10148_s10, [#allocation6], %s7822_s8, %s7822_s8, %s7823_s16  }
 0x4de   :  { %7818 = dma.done.wait [#allocation6], 2048  }
 0x4df   :  { %7819 = vsyncadd [#allocation6], 4294965248 }
 0x4e0   :  { %4842 = vsyncpa [#allocation6], 1 }

</bundles_post_ra>
